<compile_context>
chip_gen: v6e
topology: v6e:2x2x1
jax: 0.10.0
libtpu: 0.0.40
codegen_flags: <defaults>
</compile_context>

<pallas_src>
import numpy as np

import jax
import jax.numpy as jnp
from jax.experimental import pallas as pl
from jax.experimental.pallas import tpu as pltpu


K = 4            # conv kernel size
STRIDE = 2
PAD = 1
LRELU_SLOPE = 0.2
EPS = 1e-5       # torch InstanceNorm2d default


# ----------------------------------------------------------------------------
# Static per-tap 0/1 pixel-pairing tables (numpy, prepare time only).
#   Conv2d          : out[oy,ox]  reads   in[s*oy + ky - p, s*ox + kx - p]
#   ConvTranspose2d : in[iy,ix]  writes  out[s*iy + ky - p, s*ix + kx - p]
# st[t, j, m] = 1 iff flat input pixel j pairs with flat output pixel m at tap
# t = ky*K + kx.  Out-of-range pairs are absent (-> zero padding / crop).
# ----------------------------------------------------------------------------
def _tap_matrix(h_in, w_in, h_out, w_out, transposed):
    m_in, m_out = h_in * w_in, h_out * w_out
    st = np.zeros((K * K, m_in, m_out), np.float32)
    for ky in range(K):
        for kx in range(K):
            t = ky * K + kx
            if not transposed:
                for oy in range(h_out):
                    iy = STRIDE * oy + ky - PAD
                    if not (0 <= iy < h_in):
                        continue
                    for ox in range(w_out):
                        ix = STRIDE * ox + kx - PAD
                        if 0 <= ix < w_in:
                            st[t, iy * w_in + ix, oy * w_out + ox] = 1.0
            else:
                for iy in range(h_in):
                    oy = STRIDE * iy + ky - PAD
                    if not (0 <= oy < h_out):
                        continue
                    for ix in range(w_in):
                        ox = STRIDE * ix + kx - PAD
                        if 0 <= ox < w_out:
                            st[t, iy * w_in + ix, oy * w_out + ox] = 1.0
    return st


def _norm_tables(c, m):
    """InstanceNorm pool/broadcast matmul tables (avoids in-kernel reshapes)."""
    e = np.kron(np.eye(c, dtype=np.float32), np.ones((1, m), np.float32))  # (c, c*m)
    p = np.ascontiguousarray(e.T) / np.float32(m)                          # (c*m, c)
    return jnp.asarray(p, jnp.float32), jnp.asarray(e, jnp.float32)


# ----------------------------------------------------------------------------
# Fused UNet kernel: whole forward for a block of B samples, one matmul / layer.
# ----------------------------------------------------------------------------
def _unet_kernel(x_ref,
                 a_d1, b_d1, a_d2, a_d3, b_d3,
                 a_u1, a_u2e, a_u2d, a_u3e, a_u3d, b_u3,
                 p16, e16, p8, e8,
                 o_ref):
    x = x_ref[0]                                    # (B, Cin*HW) f32, flat = c*HW + pix

    def mm(h, a_ref):                               # bf16 operands, f32 accumulate
        return jnp.dot(h.astype(jnp.bfloat16), a_ref[...],
                       preferred_element_type=jnp.float32)

    def lrelu(v):
        return jnp.where(v >= 0.0, v, LRELU_SLOPE * v)

    def relu(v):
        return jnp.maximum(v, 0.0)

    def inorm(y, p_ref, e_ref):                     # InstanceNorm2d(affine=False), f32
        p, e = p_ref[...], e_ref[...]
        mean_c = jnp.dot(y, p, preferred_element_type=jnp.float32)          # (B, C)
        yc = y - jnp.dot(mean_c, e, preferred_element_type=jnp.float32)     # centered
        var_c = jnp.dot(yc * yc, p, preferred_element_type=jnp.float32)     # biased var
        scale_c = jax.lax.rsqrt(var_c + EPS)
        return yc * jnp.dot(scale_c, e, preferred_element_type=jnp.float32)

    d1 = mm(x, a_d1) + b_d1[...]                                   # outer down: Conv
    d2 = inorm(mm(lrelu(d1), a_d2), p16, e16)                      # mid   down: LReLU,Conv,IN
    d3 = mm(lrelu(d2), a_d3) + b_d3[...]                           # inner down: LReLU,Conv
    u1 = inorm(mm(relu(d3), a_u1), p16, e16)                       # inner up  : ReLU,ConvT,IN
    # skip cat([d2, u1]) is folded into split operators (no in-kernel concat)
    u2 = inorm(mm(relu(d2), a_u2e) + mm(relu(u1), a_u2d), p8, e8)  # mid   up  : ReLU,ConvT,IN
    # skip cat([d1, u2]) likewise
    out = jnp.tanh(mm(relu(d1), a_u3e) + mm(relu(u2), a_u3d) + b_u3[...])   # ReLU,ConvT,Tanh

    o_ref[0] = out.astype(o_ref.dtype)              # (B, Cout*HW), lane-dense


# ----------------------------------------------------------------------------
# Parameters (torch-native layouts) and one-time packing into dense operators.
# ----------------------------------------------------------------------------
def init_params(key, input_nc=3, output_nc=3, ngf=8, init_gain=0.02):
    ks = jax.random.split(key, 6)
    n = lambda k, s: jax.random.normal(k, s, jnp.float32) * init_gain
    return {
        # encoder convs: HWIO == torch Conv2d weight.permute(2,3,1,0)
        "W_d1": n(ks[0], (K, K, input_nc, ngf)),      "b_d1": jnp.zeros((ngf,), jnp.float32),
        "W_d2": n(ks[1], (K, K, ngf, ngf * 2)),       "b_d2": jnp.zeros((ngf * 2,), jnp.float32),
        "W_d3": n(ks[2], (K, K, ngf * 2, ngf * 4)),   "b_d3": jnp.zeros((ngf * 4,), jnp.float32),
        # decoder transposed convs (torch layout: Cin, Cout, K, K)
        "W_u1": n(ks[3], (ngf * 4, ngf * 2, K, K)),   "b_u1": jnp.zeros((ngf * 2,), jnp.float32),
        "W_u2": n(ks[4], (ngf * 4, ngf, K, K)),       "b_u2": jnp.zeros((ngf,), jnp.float32),
        "W_u3": n(ks[5], (ngf * 2, output_nc, K, K)), "b_u3": jnp.zeros((output_nc,), jnp.float32),
    }


def prepare_params(params, image_size=16):
    """One-time folding of weights + spatial tap tables into per-layer dense
    operators A = (Cin*M_in, Cout*M_out).  Done once, outside the forward graph."""
    s = image_size
    ngf = params["W_d1"].shape[3]

    def enc_w(w):   # Conv2d HWIO (K,K,Cin,Cout) -> (K*K, Cout, Cin), tap t = ky*K+kx
        k, _, cin, cout = w.shape
        return jnp.transpose(w, (0, 1, 3, 2)).reshape(k * k, cout, cin)

    def dec_w(w):   # ConvTranspose2d (Cin,Cout,K,K) -> (K*K, Cout, Cin)
        cin, cout, k, _ = w.shape
        return jnp.transpose(w, (2, 3, 1, 0)).reshape(k * k, cout, cin)

    def dense_op(wt, st):
        # A[c*M_in+j, o*M_out+m] = sum_t wt[t,o,c] * st[t,j,m]   (each (j,m) hits <=1 tap)
        a = jnp.einsum("toc,tjm->cjom", wt, jnp.asarray(st, jnp.float32))
        cin, m_in, cout, m_out = a.shape
        return a.reshape(cin * m_in, cout * m_out).astype(jnp.bfloat16)

    def bias_flat(b, m_out):   # per-channel bias -> (1, Cout*M_out), f32
        return jnp.repeat(b.astype(jnp.float32), m_out).reshape(1, -1)

    st_d1 = _tap_matrix(s,      s,      s // 2, s // 2, transposed=False)
    st_d2 = _tap_matrix(s // 2, s // 2, s // 4, s // 4, transposed=False)
    st_d3 = _tap_matrix(s // 4, s // 4, s // 8, s // 8, transposed=False)
    st_u1 = _tap_matrix(s // 8, s // 8, s // 4, s // 4, transposed=True)
    st_u2 = _tap_matrix(s // 4, s // 4, s // 2, s // 2, transposed=True)
    st_u3 = _tap_matrix(s // 2, s // 2, s,      s,      transposed=True)

    a_d1 = dense_op(enc_w(params["W_d1"]), st_d1)
    a_d2 = dense_op(enc_w(params["W_d2"]), st_d2)
    a_d3 = dense_op(enc_w(params["W_d3"]), st_d3)
    a_u1 = dense_op(dec_w(params["W_u1"]), st_u1)
    a_u2 = dense_op(dec_w(params["W_u2"]), st_u2)
    a_u3 = dense_op(dec_w(params["W_u3"]), st_u3)

    # Skip concat cat([enc, dec], channel) -> split decoder operator rows instead.
    m4 = (s // 4) ** 2            # pixels at 4x4
    m8 = (s // 2) ** 2            # pixels at 8x8
    enc_rows_u2 = 2 * ngf * m4    # d2 channels occupy rows [0, 2*ngf*m4)
    enc_rows_u3 = ngf * m8        # d1 channels occupy rows [0, ngf*m8)
    a_u2e, a_u2d = a_u2[:enc_rows_u2], a_u2[enc_rows_u2:]
    a_u3e, a_u3d = a_u3[:enc_rows_u3], a_u3[enc_rows_u3:]

    # Bias feeding InstanceNorm(affine=False) is cancelled by the mean-subtract -> drop
    # (b_d2, b_u1, b_u2).  Keep bias where there is no norm (d1, d3) and before tanh (u3).
    b_d1 = bias_flat(params["b_d1"], (s // 2) ** 2)
    b_d3 = bias_flat(params["b_d3"], (s // 8) ** 2)
    b_u3 = bias_flat(params["b_u3"], s * s)

    # InstanceNorm pool / broadcast tables (f32, exact 0/1 and 1/M entries).
    p16, e16 = _norm_tables(2 * ngf, m4)   # d2 / u1 : 16 ch x 16 px
    p8,  e8  = _norm_tables(ngf, m8)       # u2      :  8 ch x 64 px

    return (a_d1, b_d1, a_d2, a_d3, b_d3,
            a_u1, a_u2e, a_u2d, a_u3e, a_u3d, b_u3,
            p16, e16, p8, e8)


# ----------------------------------------------------------------------------
# Pix2PixModel.forward: fake_B = netG(real_A)      (external interface: NCHW)
# ----------------------------------------------------------------------------
def pix2pix_forward(prepared, real_A_nchw):
    n, c_in, h, w = real_A_nchw.shape
    hw = h * w
    out_flat = prepared[8].shape[1]           # a_u3e cols = output_nc * H*W
    out_nc = out_flat // hw

    # NCHW -> (N, Cin*H*W): free row-major reshape (channel-major flat layout).
    x = real_A_nchw.reshape(n, c_in * hw).astype(jnp.float32)

    # Batch-block samples per grid step; keep >= 2 grid steps for v7x's two TCs.
    bsz = min(64, max(1, n // 2)) if n >= 2 else 1
    steps = -(-n // bsz)
    n_pad = steps * bsz
    if n_pad != n:
        x = jnp.pad(x, ((0, n_pad - n), (0, 0)))
    x = x.reshape(steps, bsz, c_in * hw)

    in_specs = [pl.BlockSpec((1, bsz, c_in * hw), lambda i: (i, 0, 0))]
    for arr in prepared:                      # operators / tables: whole array in VMEM
        in_specs.append(pl.BlockSpec(arr.shape, lambda i, _nd=arr.ndim: (0,) * _nd))

    out = pl.pallas_call(
        _unet_kernel,
        grid=(steps,),
        in_specs=in_specs,
        out_specs=pl.BlockSpec((1, bsz, out_flat), lambda i: (i, 0, 0)),
        out_shape=jax.ShapeDtypeStruct((steps, bsz, out_flat), jnp.float32),
        compiler_params=pltpu.CompilerParams(
            dimension_semantics=("parallel",),      # megacore: split batch blocks
        ),
    )(x, *prepared)

    return out.reshape(n_pad, out_nc, h, w)[:n]     # free reshape back to NCHW


# ----------------------------------------------------------------------------
# Pure-JAX f32 reference (for an in-script tolerance check of the kernel math).
# ----------------------------------------------------------------------------
def _reference_forward(params, x):
    def conv(hh, w_hwio, b):
        y = jax.lax.conv_general_dilated(
            hh, w_hwio, window_strides=(2, 2), padding=((1, 1), (1, 1)),
            dimension_numbers=("NCHW", "HWIO", "NCHW"))
        return y + b.reshape(1, -1, 1, 1)

    def convT(hh, w_torch, b):                 # ConvTranspose2d(stride=2, pad=1, k=4)
        w_hwio = jnp.transpose(w_torch[:, :, ::-1, ::-1], (2, 3, 0, 1))
        y = jax.lax.conv_general_dilated(
            hh, w_hwio, window_strides=(1, 1), padding=((2, 2), (2, 2)),
            lhs_dilation=(2, 2), dimension_numbers=("NCHW", "HWIO", "NCHW"))
        return y + b.reshape(1, -1, 1, 1)

    def inorm(hh):
        m = jnp.mean(hh, axis=(2, 3), keepdims=True)
        v = jnp.mean((hh - m) ** 2, axis=(2, 3), keepdims=True)
        return (hh - m) * jax.lax.rsqrt(v + EPS)

    lrelu = lambda v: jnp.where(v >= 0.0, v, LRELU_SLOPE * v)
    relu = lambda v: jnp.maximum(v, 0.0)

    d1 = conv(x, params["W_d1"], params["b_d1"])
    d2 = inorm(conv(lrelu(d1), params["W_d2"], params["b_d2"]))
    d3 = conv(lrelu(d2), params["W_d3"], params["b_d3"])
    u1 = inorm(convT(relu(d3), params["W_u1"], params["b_u1"]))
    u2 = inorm(convT(relu(jnp.concatenate([d2, u1], axis=1)),
                     params["W_u2"], params["b_u2"]))
    return jnp.tanh(convT(relu(jnp.concatenate([d1, u2], axis=1)),
                          params["W_u3"], params["b_u3"]))


# TODO(synk): discriminator netD, GAN/L1 losses, Adam updates and LR schedulers are
# training-time machinery (backward_D / backward_G / optimize_parameters), not forward().


if __name__ == "__main__":
    key = jax.random.PRNGKey(0)
    k_param, k_data = jax.random.split(key)

    params = init_params(k_param, input_nc=3, output_nc=3, ngf=8)
    prepared = prepare_params(params, image_size=16)           # packed once, off the hot path
    real_A = jax.random.normal(k_data, (2, 3, 16, 16), jnp.float32)   # NCHW input

    fwd = jax.jit(pix2pix_forward)
    fake_B = fwd(prepared, real_A)
    jax.block_until_ready(fake_B)

    assert fake_B.shape == (2, 3, 16, 16)
    assert bool(jnp.all(jnp.isfinite(fake_B)))

    # Tolerance check vs. f32 reference (kernel uses bf16 MXU operands).
    ref = _reference_forward(params, real_A)
    np.testing.assert_allclose(np.asarray(fake_B), np.asarray(ref), rtol=0.1, atol=0.02)

    print("KERNEL_OK")
</pallas_src>

<mosaic_0001>
module attributes {stable_mosaic.version = 11 : i64} {
  func.func @_unet_kernel(%arg0: i32, %arg1: memref<1x1x768xf32, #tpu.memory_space<vmem>>, %arg2: memref<768x512xbf16, #tpu.memory_space<vmem>>, %arg3: memref<1x512xf32, #tpu.memory_space<vmem>>, %arg4: memref<512x256xbf16, #tpu.memory_space<vmem>>, %arg5: memref<256x128xbf16, #tpu.memory_space<vmem>>, %arg6: memref<1x128xf32, #tpu.memory_space<vmem>>, %arg7: memref<128x256xbf16, #tpu.memory_space<vmem>>, %arg8: memref<256x512xbf16, #tpu.memory_space<vmem>>, %arg9: memref<256x512xbf16, #tpu.memory_space<vmem>>, %arg10: memref<512x768xbf16, #tpu.memory_space<vmem>>, %arg11: memref<512x768xbf16, #tpu.memory_space<vmem>>, %arg12: memref<1x768xf32, #tpu.memory_space<vmem>>, %arg13: memref<256x16xf32, #tpu.memory_space<vmem>>, %arg14: memref<16x256xf32, #tpu.memory_space<vmem>>, %arg15: memref<512x8xf32, #tpu.memory_space<vmem>>, %arg16: memref<8x512xf32, #tpu.memory_space<vmem>>, %arg17: memref<1x1x768xf32, #tpu.memory_space<vmem>>) attributes {dimension_semantics = [#tpu.dimension_semantics<parallel>], iteration_bounds = array<i64: 2>, scalar_prefetch = 0 : i64, scratch_operands = 0 : i64, tpu.core_type = #tpu.core_type<tc>, window_params = [{transform_indices = @transform_0, window_bounds = array<i64: 1, 1, 768>}, {pipeline_mode = #tpu.pipeline_mode<synchronous>, transform_indices = @transform_1, window_bounds = array<i64: 768, 512>}, {pipeline_mode = #tpu.pipeline_mode<synchronous>, transform_indices = @transform_2, window_bounds = array<i64: 1, 512>}, {pipeline_mode = #tpu.pipeline_mode<synchronous>, transform_indices = @transform_3, window_bounds = array<i64: 512, 256>}, {pipeline_mode = #tpu.pipeline_mode<synchronous>, transform_indices = @transform_4, window_bounds = array<i64: 256, 128>}, {pipeline_mode = #tpu.pipeline_mode<synchronous>, transform_indices = @transform_5, window_bounds = array<i64: 1, 128>}, {pipeline_mode = #tpu.pipeline_mode<synchronous>, transform_indices = @transform_6, window_bounds = array<i64: 128, 256>}, {pipeline_mode = #tpu.pipeline_mode<synchronous>, transform_indices = @transform_7, window_bounds = array<i64: 256, 512>}, {pipeline_mode = #tpu.pipeline_mode<synchronous>, transform_indices = @transform_8, window_bounds = array<i64: 256, 512>}, {pipeline_mode = #tpu.pipeline_mode<synchronous>, transform_indices = @transform_9, window_bounds = array<i64: 512, 768>}, {pipeline_mode = #tpu.pipeline_mode<synchronous>, transform_indices = @transform_10, window_bounds = array<i64: 512, 768>}, {pipeline_mode = #tpu.pipeline_mode<synchronous>, transform_indices = @transform_11, window_bounds = array<i64: 1, 768>}, {pipeline_mode = #tpu.pipeline_mode<synchronous>, transform_indices = @transform_12, window_bounds = array<i64: 256, 16>}, {pipeline_mode = #tpu.pipeline_mode<synchronous>, transform_indices = @transform_13, window_bounds = array<i64: 16, 256>}, {pipeline_mode = #tpu.pipeline_mode<synchronous>, transform_indices = @transform_14, window_bounds = array<i64: 512, 8>}, {pipeline_mode = #tpu.pipeline_mode<synchronous>, transform_indices = @transform_15, window_bounds = array<i64: 8, 512>}, {transform_indices = @transform_16, window_bounds = array<i64: 1, 1, 768>}]} {
    %c0 = arith.constant 0 : index
    %c0_0 = arith.constant 0 : index
    %c0_1 = arith.constant 0 : index
    %0 = vector.load %arg1[%c0, %c0_0, %c0_1] : memref<1x1x768xf32, #tpu.memory_space<vmem>>, vector<1x1x768xf32>
    %1 = vector.shape_cast %0 : vector<1x1x768xf32> to vector<1x768xf32>
    %2 = arith.truncf %1 : vector<1x768xf32> to vector<1x768xbf16>
    %c0_2 = arith.constant 0 : index
    %c0_3 = arith.constant 0 : index
    %3 = vector.load %arg2[%c0_2, %c0_3] : memref<768x512xbf16, #tpu.memory_space<vmem>>, vector<768x512xbf16>
    %cst = arith.constant dense<0.000000e+00> : vector<1x512xf32>
    %4 = tpu.matmul %2, %3, %cst {dimension_numbers = #tpu.dot_dimension_numbers<[1], [0], [0], [1], [0, 0, 1, 1], [], []>} : vector<1x768xbf16>, vector<768x512xbf16>, vector<1x512xf32> -> vector<1x512xf32>
    %c0_4 = arith.constant 0 : index
    %c0_5 = arith.constant 0 : index
    %5 = vector.load %arg3[%c0_4, %c0_5] : memref<1x512xf32, #tpu.memory_space<vmem>>, vector<1x512xf32>
    %6 = arith.addf %4, %5 : vector<1x512xf32>
    %cst_6 = arith.constant 0.000000e+00 : f32
    %7 = vector.broadcast %cst_6 : f32 to vector<1x512xf32>
    %8 = arith.cmpf oge, %6, %7 : vector<1x512xf32>
    %cst_7 = arith.constant 2.000000e-01 : f32
    %9 = vector.broadcast %cst_7 : f32 to vector<1x512xf32>
    %10 = arith.mulf %9, %6 : vector<1x512xf32>
    %11 = arith.select %8, %6, %10 : vector<1x512xi1>, vector<1x512xf32>
    %12 = arith.truncf %11 : vector<1x512xf32> to vector<1x512xbf16>
    %c0_8 = arith.constant 0 : index
    %c0_9 = arith.constant 0 : index
    %13 = vector.load %arg4[%c0_8, %c0_9] : memref<512x256xbf16, #tpu.memory_space<vmem>>, vector<512x256xbf16>
    %cst_10 = arith.constant dense<0.000000e+00> : vector<1x256xf32>
    %14 = tpu.matmul %12, %13, %cst_10 {dimension_numbers = #tpu.dot_dimension_numbers<[1], [0], [0], [1], [0, 0, 1, 1], [], []>} : vector<1x512xbf16>, vector<512x256xbf16>, vector<1x256xf32> -> vector<1x256xf32>
    %c0_11 = arith.constant 0 : index
    %c0_12 = arith.constant 0 : index
    %15 = vector.load %arg13[%c0_11, %c0_12] : memref<256x16xf32, #tpu.memory_space<vmem>>, vector<256x16xf32>
    %c0_13 = arith.constant 0 : index
    %c0_14 = arith.constant 0 : index
    %16 = vector.load %arg14[%c0_13, %c0_14] : memref<16x256xf32, #tpu.memory_space<vmem>>, vector<16x256xf32>
    %cst_15 = arith.constant dense<0.000000e+00> : vector<1x16xf32>
    %17 = tpu.matmul %14, %15, %cst_15 {dimension_numbers = #tpu.dot_dimension_numbers<[1], [0], [0], [1], [0, 0, 1, 1], [], []>} : vector<1x256xf32>, vector<256x16xf32>, vector<1x16xf32> -> vector<1x16xf32>
    %cst_16 = arith.constant dense<0.000000e+00> : vector<1x256xf32>
    %18 = tpu.matmul %17, %16, %cst_16 {dimension_numbers = #tpu.dot_dimension_numbers<[1], [0], [0], [1], [0, 0, 1, 1], [], []>} : vector<1x16xf32>, vector<16x256xf32>, vector<1x256xf32> -> vector<1x256xf32>
    %19 = arith.subf %14, %18 : vector<1x256xf32>
    %20 = arith.mulf %19, %19 : vector<1x256xf32>
    %cst_17 = arith.constant dense<0.000000e+00> : vector<1x16xf32>
    %21 = tpu.matmul %20, %15, %cst_17 {dimension_numbers = #tpu.dot_dimension_numbers<[1], [0], [0], [1], [0, 0, 1, 1], [], []>} : vector<1x256xf32>, vector<256x16xf32>, vector<1x16xf32> -> vector<1x16xf32>
    %cst_18 = arith.constant 9.99999974E-6 : f32
    %22 = vector.broadcast %cst_18 : f32 to vector<1x16xf32>
    %23 = arith.addf %21, %22 : vector<1x16xf32>
    %24 = math.rsqrt %23 : vector<1x16xf32>
    %cst_19 = arith.constant dense<0.000000e+00> : vector<1x256xf32>
    %25 = tpu.matmul %24, %16, %cst_19 {dimension_numbers = #tpu.dot_dimension_numbers<[1], [0], [0], [1], [0, 0, 1, 1], [], []>} : vector<1x16xf32>, vector<16x256xf32>, vector<1x256xf32> -> vector<1x256xf32>
    %26 = arith.mulf %19, %25 : vector<1x256xf32>
    %cst_20 = arith.constant 0.000000e+00 : f32
    %27 = vector.broadcast %cst_20 : f32 to vector<1x256xf32>
    %28 = arith.cmpf oge, %26, %27 : vector<1x256xf32>
    %cst_21 = arith.constant 2.000000e-01 : f32
    %29 = vector.broadcast %cst_21 : f32 to vector<1x256xf32>
    %30 = arith.mulf %29, %26 : vector<1x256xf32>
    %31 = arith.select %28, %26, %30 : vector<1x256xi1>, vector<1x256xf32>
    %32 = arith.truncf %31 : vector<1x256xf32> to vector<1x256xbf16>
    %c0_22 = arith.constant 0 : index
    %c0_23 = arith.constant 0 : index
    %33 = vector.load %arg5[%c0_22, %c0_23] : memref<256x128xbf16, #tpu.memory_space<vmem>>, vector<256x128xbf16>
    %cst_24 = arith.constant dense<0.000000e+00> : vector<1x128xf32>
    %34 = tpu.matmul %32, %33, %cst_24 {dimension_numbers = #tpu.dot_dimension_numbers<[1], [0], [0], [1], [0, 0, 1, 1], [], []>} : vector<1x256xbf16>, vector<256x128xbf16>, vector<1x128xf32> -> vector<1x128xf32>
    %c0_25 = arith.constant 0 : index
    %c0_26 = arith.constant 0 : index
    %35 = vector.load %arg6[%c0_25, %c0_26] : memref<1x128xf32, #tpu.memory_space<vmem>>, vector<1x128xf32>
    %36 = arith.addf %34, %35 : vector<1x128xf32>
    %cst_27 = arith.constant 0.000000e+00 : f32
    %37 = vector.broadcast %cst_27 : f32 to vector<1x128xf32>
    %38 = arith.maximumf %36, %37 : vector<1x128xf32>
    %39 = arith.truncf %38 : vector<1x128xf32> to vector<1x128xbf16>
    %c0_28 = arith.constant 0 : index
    %c0_29 = arith.constant 0 : index
    %40 = vector.load %arg7[%c0_28, %c0_29] : memref<128x256xbf16, #tpu.memory_space<vmem>>, vector<128x256xbf16>
    %cst_30 = arith.constant dense<0.000000e+00> : vector<1x256xf32>
    %41 = tpu.matmul %39, %40, %cst_30 {dimension_numbers = #tpu.dot_dimension_numbers<[1], [0], [0], [1], [0, 0, 1, 1], [], []>} : vector<1x128xbf16>, vector<128x256xbf16>, vector<1x256xf32> -> vector<1x256xf32>
    %c0_31 = arith.constant 0 : index
    %c0_32 = arith.constant 0 : index
    %42 = vector.load %arg13[%c0_31, %c0_32] : memref<256x16xf32, #tpu.memory_space<vmem>>, vector<256x16xf32>
    %c0_33 = arith.constant 0 : index
    %c0_34 = arith.constant 0 : index
    %43 = vector.load %arg14[%c0_33, %c0_34] : memref<16x256xf32, #tpu.memory_space<vmem>>, vector<16x256xf32>
    %cst_35 = arith.constant dense<0.000000e+00> : vector<1x16xf32>
    %44 = tpu.matmul %41, %42, %cst_35 {dimension_numbers = #tpu.dot_dimension_numbers<[1], [0], [0], [1], [0, 0, 1, 1], [], []>} : vector<1x256xf32>, vector<256x16xf32>, vector<1x16xf32> -> vector<1x16xf32>
    %cst_36 = arith.constant dense<0.000000e+00> : vector<1x256xf32>
    %45 = tpu.matmul %44, %43, %cst_36 {dimension_numbers = #tpu.dot_dimension_numbers<[1], [0], [0], [1], [0, 0, 1, 1], [], []>} : vector<1x16xf32>, vector<16x256xf32>, vector<1x256xf32> -> vector<1x256xf32>
    %46 = arith.subf %41, %45 : vector<1x256xf32>
    %47 = arith.mulf %46, %46 : vector<1x256xf32>
    %cst_37 = arith.constant dense<0.000000e+00> : vector<1x16xf32>
    %48 = tpu.matmul %47, %42, %cst_37 {dimension_numbers = #tpu.dot_dimension_numbers<[1], [0], [0], [1], [0, 0, 1, 1], [], []>} : vector<1x256xf32>, vector<256x16xf32>, vector<1x16xf32> -> vector<1x16xf32>
    %cst_38 = arith.constant 9.99999974E-6 : f32
    %49 = vector.broadcast %cst_38 : f32 to vector<1x16xf32>
    %50 = arith.addf %48, %49 : vector<1x16xf32>
    %51 = math.rsqrt %50 : vector<1x16xf32>
    %cst_39 = arith.constant dense<0.000000e+00> : vector<1x256xf32>
    %52 = tpu.matmul %51, %43, %cst_39 {dimension_numbers = #tpu.dot_dimension_numbers<[1], [0], [0], [1], [0, 0, 1, 1], [], []>} : vector<1x16xf32>, vector<16x256xf32>, vector<1x256xf32> -> vector<1x256xf32>
    %53 = arith.mulf %46, %52 : vector<1x256xf32>
    %cst_40 = arith.constant 0.000000e+00 : f32
    %54 = vector.broadcast %cst_40 : f32 to vector<1x256xf32>
    %55 = arith.maximumf %26, %54 : vector<1x256xf32>
    %56 = arith.truncf %55 : vector<1x256xf32> to vector<1x256xbf16>
    %c0_41 = arith.constant 0 : index
    %c0_42 = arith.constant 0 : index
    %57 = vector.load %arg8[%c0_41, %c0_42] : memref<256x512xbf16, #tpu.memory_space<vmem>>, vector<256x512xbf16>
    %cst_43 = arith.constant dense<0.000000e+00> : vector<1x512xf32>
    %58 = tpu.matmul %56, %57, %cst_43 {dimension_numbers = #tpu.dot_dimension_numbers<[1], [0], [0], [1], [0, 0, 1, 1], [], []>} : vector<1x256xbf16>, vector<256x512xbf16>, vector<1x512xf32> -> vector<1x512xf32>
    %cst_44 = arith.constant 0.000000e+00 : f32
    %59 = vector.broadcast %cst_44 : f32 to vector<1x256xf32>
    %60 = arith.maximumf %53, %59 : vector<1x256xf32>
    %61 = arith.truncf %60 : vector<1x256xf32> to vector<1x256xbf16>
    %c0_45 = arith.constant 0 : index
    %c0_46 = arith.constant 0 : index
    %62 = vector.load %arg9[%c0_45, %c0_46] : memref<256x512xbf16, #tpu.memory_space<vmem>>, vector<256x512xbf16>
    %cst_47 = arith.constant dense<0.000000e+00> : vector<1x512xf32>
    %63 = tpu.matmul %61, %62, %cst_47 {dimension_numbers = #tpu.dot_dimension_numbers<[1], [0], [0], [1], [0, 0, 1, 1], [], []>} : vector<1x256xbf16>, vector<256x512xbf16>, vector<1x512xf32> -> vector<1x512xf32>
    %64 = arith.addf %58, %63 : vector<1x512xf32>
    %c0_48 = arith.constant 0 : index
    %c0_49 = arith.constant 0 : index
    %65 = vector.load %arg15[%c0_48, %c0_49] : memref<512x8xf32, #tpu.memory_space<vmem>>, vector<512x8xf32>
    %c0_50 = arith.constant 0 : index
    %c0_51 = arith.constant 0 : index
    %66 = vector.load %arg16[%c0_50, %c0_51] : memref<8x512xf32, #tpu.memory_space<vmem>>, vector<8x512xf32>
    %cst_52 = arith.constant dense<0.000000e+00> : vector<1x8xf32>
    %67 = tpu.matmul %64, %65, %cst_52 {dimension_numbers = #tpu.dot_dimension_numbers<[1], [0], [0], [1], [0, 0, 1, 1], [], []>} : vector<1x512xf32>, vector<512x8xf32>, vector<1x8xf32> -> vector<1x8xf32>
    %cst_53 = arith.constant dense<0.000000e+00> : vector<1x512xf32>
    %68 = tpu.matmul %67, %66, %cst_53 {dimension_numbers = #tpu.dot_dimension_numbers<[1], [0], [0], [1], [0, 0, 1, 1], [], []>} : vector<1x8xf32>, vector<8x512xf32>, vector<1x512xf32> -> vector<1x512xf32>
    %69 = arith.subf %64, %68 : vector<1x512xf32>
    %70 = arith.mulf %69, %69 : vector<1x512xf32>
    %cst_54 = arith.constant dense<0.000000e+00> : vector<1x8xf32>
    %71 = tpu.matmul %70, %65, %cst_54 {dimension_numbers = #tpu.dot_dimension_numbers<[1], [0], [0], [1], [0, 0, 1, 1], [], []>} : vector<1x512xf32>, vector<512x8xf32>, vector<1x8xf32> -> vector<1x8xf32>
    %cst_55 = arith.constant 9.99999974E-6 : f32
    %72 = vector.broadcast %cst_55 : f32 to vector<1x8xf32>
    %73 = arith.addf %71, %72 : vector<1x8xf32>
    %74 = math.rsqrt %73 : vector<1x8xf32>
    %cst_56 = arith.constant dense<0.000000e+00> : vector<1x512xf32>
    %75 = tpu.matmul %74, %66, %cst_56 {dimension_numbers = #tpu.dot_dimension_numbers<[1], [0], [0], [1], [0, 0, 1, 1], [], []>} : vector<1x8xf32>, vector<8x512xf32>, vector<1x512xf32> -> vector<1x512xf32>
    %76 = arith.mulf %69, %75 : vector<1x512xf32>
    %cst_57 = arith.constant 0.000000e+00 : f32
    %77 = vector.broadcast %cst_57 : f32 to vector<1x512xf32>
    %78 = arith.maximumf %6, %77 : vector<1x512xf32>
    %79 = arith.truncf %78 : vector<1x512xf32> to vector<1x512xbf16>
    %c0_58 = arith.constant 0 : index
    %c0_59 = arith.constant 0 : index
    %80 = vector.load %arg10[%c0_58, %c0_59] : memref<512x768xbf16, #tpu.memory_space<vmem>>, vector<512x768xbf16>
    %cst_60 = arith.constant dense<0.000000e+00> : vector<1x768xf32>
    %81 = tpu.matmul %79, %80, %cst_60 {dimension_numbers = #tpu.dot_dimension_numbers<[1], [0], [0], [1], [0, 0, 1, 1], [], []>} : vector<1x512xbf16>, vector<512x768xbf16>, vector<1x768xf32> -> vector<1x768xf32>
    %cst_61 = arith.constant 0.000000e+00 : f32
    %82 = vector.broadcast %cst_61 : f32 to vector<1x512xf32>
    %83 = arith.maximumf %76, %82 : vector<1x512xf32>
    %84 = arith.truncf %83 : vector<1x512xf32> to vector<1x512xbf16>
    %c0_62 = arith.constant 0 : index
    %c0_63 = arith.constant 0 : index
    %85 = vector.load %arg11[%c0_62, %c0_63] : memref<512x768xbf16, #tpu.memory_space<vmem>>, vector<512x768xbf16>
    %cst_64 = arith.constant dense<0.000000e+00> : vector<1x768xf32>
    %86 = tpu.matmul %84, %85, %cst_64 {dimension_numbers = #tpu.dot_dimension_numbers<[1], [0], [0], [1], [0, 0, 1, 1], [], []>} : vector<1x512xbf16>, vector<512x768xbf16>, vector<1x768xf32> -> vector<1x768xf32>
    %87 = arith.addf %81, %86 : vector<1x768xf32>
    %c0_65 = arith.constant 0 : index
    %c0_66 = arith.constant 0 : index
    %88 = vector.load %arg12[%c0_65, %c0_66] : memref<1x768xf32, #tpu.memory_space<vmem>>, vector<1x768xf32>
    %89 = arith.addf %87, %88 : vector<1x768xf32>
    %90 = math.tanh %89 : vector<1x768xf32>
    %c0_67 = arith.constant 0 : index
    %c0_68 = arith.constant 0 : index
    %c0_69 = arith.constant 0 : index
    %91 = vector.load %arg17[%c0_67, %c0_68, %c0_69] : memref<1x1x768xf32, #tpu.memory_space<vmem>>, vector<1x1x768xf32>
    %92 = vector.shape_cast %91 : vector<1x1x768xf32> to vector<1x768xf32>
    %93 = vector.shape_cast %90 : vector<1x768xf32> to vector<1x1x768xf32>
    tpu.vector_store %arg17[%c0_67, %c0_68, %c0_69], %93 {strides = array<i32>} : memref<1x1x768xf32, #tpu.memory_space<vmem>>, vector<1x1x768xf32>,
    return
  }
  func.func @transform_0(%arg0: i32) -> (i32, i32, i32) {
    %c0_i32 = arith.constant 0 : i32
    %c0_i32_0 = arith.constant 0 : i32
    %c0_i32_1 = arith.constant 0 : i32
    return %arg0, %c0_i32, %c0_i32_0 : i32, i32, i32
  }
  func.func @transform_1(%arg0: i32) -> (i32, i32) {
    %c0_i32 = arith.constant 0 : i32
    %c0_i32_0 = arith.constant 0 : i32
    %c0_i32_1 = arith.constant 0 : i32
    return %c0_i32, %c0_i32_0 : i32, i32
  }
  func.func @transform_2(%arg0: i32) -> (i32, i32) {
    %c0_i32 = arith.constant 0 : i32
    %c0_i32_0 = arith.constant 0 : i32
    %c0_i32_1 = arith.constant 0 : i32
    return %c0_i32, %c0_i32_0 : i32, i32
  }
  func.func @transform_3(%arg0: i32) -> (i32, i32) {
    %c0_i32 = arith.constant 0 : i32
    %c0_i32_0 = arith.constant 0 : i32
    %c0_i32_1 = arith.constant 0 : i32
    return %c0_i32, %c0_i32_0 : i32, i32
  }
  func.func @transform_4(%arg0: i32) -> (i32, i32) {
    %c0_i32 = arith.constant 0 : i32
    %c0_i32_0 = arith.constant 0 : i32
    %c0_i32_1 = arith.constant 0 : i32
    return %c0_i32, %c0_i32_0 : i32, i32
  }
  func.func @transform_5(%arg0: i32) -> (i32, i32) {
    %c0_i32 = arith.constant 0 : i32
    %c0_i32_0 = arith.constant 0 : i32
    %c0_i32_1 = arith.constant 0 : i32
    return %c0_i32, %c0_i32_0 : i32, i32
  }
  func.func @transform_6(%arg0: i32) -> (i32, i32) {
    %c0_i32 = arith.constant 0 : i32
    %c0_i32_0 = arith.constant 0 : i32
    %c0_i32_1 = arith.constant 0 : i32
    return %c0_i32, %c0_i32_0 : i32, i32
  }
  func.func @transform_7(%arg0: i32) -> (i32, i32) {
    %c0_i32 = arith.constant 0 : i32
    %c0_i32_0 = arith.constant 0 : i32
    %c0_i32_1 = arith.constant 0 : i32
    return %c0_i32, %c0_i32_0 : i32, i32
  }
  func.func @transform_8(%arg0: i32) -> (i32, i32) {
    %c0_i32 = arith.constant 0 : i32
    %c0_i32_0 = arith.constant 0 : i32
    %c0_i32_1 = arith.constant 0 : i32
    return %c0_i32, %c0_i32_0 : i32, i32
  }
  func.func @transform_9(%arg0: i32) -> (i32, i32) {
    %c0_i32 = arith.constant 0 : i32
    %c0_i32_0 = arith.constant 0 : i32
    %c0_i32_1 = arith.constant 0 : i32
    return %c0_i32, %c0_i32_0 : i32, i32
  }
  func.func @transform_10(%arg0: i32) -> (i32, i32) {
    %c0_i32 = arith.constant 0 : i32
    %c0_i32_0 = arith.constant 0 : i32
    %c0_i32_1 = arith.constant 0 : i32
    return %c0_i32, %c0_i32_0 : i32, i32
  }
  func.func @transform_11(%arg0: i32) -> (i32, i32) {
    %c0_i32 = arith.constant 0 : i32
    %c0_i32_0 = arith.constant 0 : i32
    %c0_i32_1 = arith.constant 0 : i32
    return %c0_i32, %c0_i32_0 : i32, i32
  }
  func.func @transform_12(%arg0: i32) -> (i32, i32) {
    %c0_i32 = arith.constant 0 : i32
    %c0_i32_0 = arith.constant 0 : i32
    %c0_i32_1 = arith.constant 0 : i32
    return %c0_i32, %c0_i32_0 : i32, i32
  }
  func.func @transform_13(%arg0: i32) -> (i32, i32) {
    %c0_i32 = arith.constant 0 : i32
    %c0_i32_0 = arith.constant 0 : i32
    %c0_i32_1 = arith.constant 0 : i32
    return %c0_i32, %c0_i32_0 : i32, i32
  }
  func.func @transform_14(%arg0: i32) -> (i32, i32) {
    %c0_i32 = arith.constant 0 : i32
    %c0_i32_0 = arith.constant 0 : i32
    %c0_i32_1 = arith.constant 0 : i32
    return %c0_i32, %c0_i32_0 : i32, i32
  }
  func.func @transform_15(%arg0: i32) -> (i32, i32) {
    %c0_i32 = arith.constant 0 : i32
    %c0_i32_0 = arith.constant 0 : i32
    %c0_i32_1 = arith.constant 0 : i32
    return %c0_i32, %c0_i32_0 : i32, i32
  }
  func.func @transform_16(%arg0: i32) -> (i32, i32, i32) {
    %c0_i32 = arith.constant 0 : i32
    %c0_i32_0 = arith.constant 0 : i32
    %c0_i32_1 = arith.constant 0 : i32
    return %arg0, %c0_i32, %c0_i32_0 : i32, i32, i32
  }
}

</mosaic_0001>

<bundles_post_ra>
// kernel: pix2pix_forward.1
= control target key start
LH: loop header
LB: loop body
LE: loop exit
PB: predicated region body
PF: predicated region fallthrough
CT: control target
= control target key end

     0   :  { %s12157_s0 = inlined_call_operand.vmem [shape: f32[2,1,768], index: 0, kind: input, shape index: {}]   ;;  %s12158_s1 = inlined_call_operand.hbm [shape: bf16[768,512], index: 1, kind: input, shape index: {}]   ;;  %s12159_s2 = inlined_call_operand.vmem [shape: f32[1,512], index: 2, kind: input, shape index: {}]   ;;  %s12160_s3 = inlined_call_operand.vmem [shape: bf16[512,256], index: 3, kind: input, shape index: {}]   ;;  %s12161_s4 = inlined_call_operand.vmem [shape: bf16[256,128], index: 4, kind: input, shape index: {}]   ;;  %s12162_s5 = inlined_call_operand.vmem [shape: f32[1,128], index: 5, kind: input, shape index: {}]   ;;  %s12163_s6 = inlined_call_operand.vmem [shape: bf16[128,256], index: 6, kind: input, shape index: {}]   ;;  %s12164_s7 = inlined_call_operand.hbm [shape: bf16[256,512], index: 7, kind: input, shape index: {}]   ;;  %s12165_s8 = inlined_call_operand.hbm [shape: bf16[256,512], index: 8, kind: input, shape index: {}]   ;;  %s12166_s9 = inlined_call_operand.hbm [shape: bf16[512,768], index: 9, kind: input, shape index: {}]   ;;  %s12167_s10 = inlined_call_operand.hbm [shape: bf16[512,768], index: 10, kind: input, shape index: {}]   ;;  %s12168_s11 = inlined_call_operand.vmem [shape: f32[1,768], index: 11, kind: input, shape index: {}]   ;;  %s12169_s12 = inlined_call_operand.vmem [shape: f32[256,16], index: 12, kind: input, shape index: {}]   ;;  %s12170_s13 = inlined_call_operand.vmem [shape: f32[16,256], index: 13, kind: input, shape index: {}]   ;;  %s12171_s14 = inlined_call_operand.vmem [shape: f32[512,8], index: 14, kind: input, shape index: {}]   ;;  %s12172_s15 = inlined_call_operand.vmem [shape: f32[8,512], index: 15, kind: input, shape index: {}]   ;;  %s12173_s16 = inlined_call_operand.vmem [shape: f32[2,1,768], index: 16, kind: output, shape index: {}]  }
   0x1   :  { %12208 = sst [smem:[#allocation39_spill]] %s12157_s0 }
   0x2   :  { %12209 = sst [smem:[#allocation40_spill]] %s12164_s7 }
   0x3   :  { %21 = vsyncpa [#allocation3], 0 }
   0x4   :  { %22 = vsyncpa [#allocation5], 0 }
   0x5   :  { %23 = vsyncpa [#allocation8], 0  ;;  %s10728_s21 = smov 0  }
   0x6 LB: > { %s10734_s22 = sadd.s32 4294967295, %s10629_s21   ;;  %p8079_p0 = scmp.ge.s32.totalorder %s10629_s21, 1  ;;  %s10629_s21 = sphi %s10728_s21, %s29_s21  }
   0x7   : > { %p401_p1 = scmp.lt.s32.totalorder %s10629_s21, 3  ;;  %p9241_p2 = scmp.eq.s32.totalorder %s10734_s22, 0 }
   0x8   : > { %s10631_s24 = smov [#allocation4]   ;;  %s10632_s26 = smov [#allocation7]  }
   0x9   : > { %p10739_p3 = pnand %p8079_p0, %p401_p1  ;;  %s441_s25 = sshll.u32 %s10631_s24, 4  ;;  %s442_s25 = int_to_ptr.vmem [resolvable:$true] %s441_s25 }
   0xa   : > { %s467_s27 = sshll.u32 %s10632_s26, 4  ;;  %s10633_s29 = smov [#allocation2]   ;;  %s10745_s27 = int_to_ptr.vmem [resolvable:$true] %s467_s27 }
   0xb   : > { %p9225_p4 = pneg %p10739_p3  ;;  %s10753_s30 = sshll.u32 %s10633_s29, 4  ;;  %s414_s30 = int_to_ptr.vmem [resolvable:$true] %s10753_s30 }
   0xc   : > { %s10492_s17 = scalar_lea.vmem %s442_s25, 8192  ;;  %p10500_p10 = scmp.lt.s32.totalorder %s442_s25, %s442_s25 }
   0xd   : > { %p10749_p5 = pnand %p9241_p2, %p9225_p4  ;;  %p10493_p7 = scmp.ne.s32.totalorder %s442_s25, %s10492_s17 }
   0xe   : > { %p10501_p11 = scmp.lt.s32.totalorder %s10492_s17, %s10492_s17 }
   0xf   : > { %p10757_p6 = pneg %p10749_p5 }
  0x10   : > { %p10502_p12 = por %p10501_p11, %p10500_p10 }
  0x11   : > { %p10495_p8 = pnand %p10493_p7, %p10757_p6 }
  0x13   : > { %p10496_p9 = pneg %p10495_p8 }
  0x15   : > { %p10503_p13 = pnand %p10502_p12, %p10496_p9 }
  0x17   : > { %10506 = shalt.err (!%p10503_p13)
}
  0x18   : > { %s12174_s18 = smov 256   ;;  %s10635_s19 = smov 16  }
  0x19   : > { %s12213_s7 = sld [smem:[#allocation40_spill]]  ;;  %s10518_s26 = scalar_lea.vmem %s10745_s27, 24576 }
  0x1a   : > { %p10519_p0 = scmp.ne.s32.totalorder %s10745_s27, %s10518_s26  ;;  %p10526_p7 = scmp.lt.s32.totalorder %s10745_s27, %s10745_s27 }
  0x1b   : > { %p10527_p8 = scmp.lt.s32.totalorder %s10518_s26, %s10518_s26 }
  0x1c   : > { %p10521_p1 = pnand %p10519_p0, %p10757_p6 }
  0x1d   : > { %p10528_p9 = por %p10527_p8, %p10526_p7 }
  0x1e   : > { %p10522_p4 = pneg %p10521_p1 }
  0x1f   : > { %9231 = dma.hbm_to_vmem [thread:$0]  (!%p10749_p5), %s12213_s7, 8192, %s442_s25, [#allocation5], %s12174_s18, %s12174_s18, %s10635_s19  }
  0x20   : > { %p10529_p10 = pnand %p10528_p9, %p10522_p4 }
  0x22   : > { %10532 = shalt.err (!%p10529_p10)
}
  0x23   : > { %s10636_s29 = smov 384   ;;  %s10637_s17 = smov 24  }
  0x24   : > { %9237 = dma.hbm_to_vmem [thread:$0]  (!%p10749_p5), %s12166_s9, 24576, %s10745_s27, [#allocation8], %s10636_s29, %s10636_s29, %s10637_s17  }
  0x25   : > { %s10638_s24 = smov [#allocation6]   ;;  %s10544_s18 = scalar_lea.vmem %s414_s30, 24576 }
  0x26   : > { %s454_s26 = sshll.u32 %s10638_s24, 4  ;;  %p10545_p11 = scmp.ne.s32.totalorder %s414_s30, %s10544_s18  ;;  %s455_s26 = int_to_ptr.vmem [resolvable:$true] %s454_s26 }
  0x27   : > { %p10552_p0 = scmp.lt.s32.totalorder %s414_s30, %s414_s30  ;;  %p10553_p1 = scmp.lt.s32.totalorder %s10544_s18, %s10544_s18 }
  0x28   : > { %p10547_p12 = pnand %p10545_p11, %p10757_p6 }
  0x29   : > { %p10554_p4 = por %p10553_p1, %p10552_p0 }
  0x2a   : > { %p10548_p13 = pneg %p10547_p12 }
  0x2c   : > { %p10555_p7 = pnand %p10554_p4, %p10548_p13 }
  0x2e   : > { %10558 = shalt.err (!%p10555_p7)
}
  0x2f   : > { %s12214_s7 = smov 256   ;;  %s10570_s20 = scalar_lea.vmem %s455_s26, 8192 }
  0x30   : > { %9228 = dma.hbm_to_vmem [thread:$0]  (!%p10749_p5), %s12158_s1, 24576, %s414_s30, [#allocation3], %s12214_s7, %s12214_s7, %s10635_s19  }
  0x31   : > { %p10571_p8 = scmp.ne.s32.totalorder %s455_s26, %s10570_s20  ;;  %p10578_p11 = scmp.lt.s32.totalorder %s455_s26, %s455_s26 }
  0x32   : > { %p10579_p12 = scmp.lt.s32.totalorder %s10570_s20, %s10570_s20 }
  0x33   : > { %p10573_p9 = pnand %p10571_p8, %p10757_p6 }
  0x34   : > { %p10580_p13 = por %p10579_p12, %p10578_p11 }
  0x35   : > { %p10574_p10 = pneg %p10573_p9 }
  0x37   : > { %p10581_p0 = pnand %p10580_p13, %p10574_p10 }
  0x39   : > { %10584 = shalt.err (!%p10581_p0)
}
  0x3a   : > { %9234 = dma.hbm_to_vmem [thread:$0]  (!%p10749_p5), %s12165_s8, 8192, %s455_s26, [#allocation5], %s12214_s7, %s12214_s7, %s10635_s19  }
  0x3b   : > { %s10639_s30 = smov [#allocation9]  }
  0x3c   : > { %s480_s25 = sshll.u32 %s10639_s30, 4  ;;  %s481_s25 = int_to_ptr.vmem [resolvable:$true] %s480_s25 }
  0x3d   : > { %s10596_s27 = scalar_lea.vmem %s481_s25, 24576  ;;  %p10604_p8 = scmp.lt.s32.totalorder %s481_s25, %s481_s25 }
  0x3e   : > { %p10597_p1 = scmp.ne.s32.totalorder %s481_s25, %s10596_s27  ;;  %p10605_p9 = scmp.lt.s32.totalorder %s10596_s27, %s10596_s27 }
  0x40   : > { %p10599_p4 = pnand %p10597_p1, %p10757_p6  ;;  %p10606_p10 = por %p10605_p9, %p10604_p8 }
  0x42   : > { %p10600_p7 = pneg %p10599_p4 }
  0x44   : > { %p10607_p11 = pnand %p10606_p10, %p10600_p7 }
  0x46   : > { %10610 = shalt.err (!%p10607_p11)
}
  0x47   : > { %9240 = dma.hbm_to_vmem [thread:$0]  (!%p10749_p5), %s12167_s10, 24576, %s481_s25, [#allocation8], %s10636_s29, %s10636_s29, %s10637_s17  }
  0x48   : > { %518 = sbr.rel (%p10739_p3) target bundleno = 4326 (0x10e6), region = 84 }
  0x4d   : > { %10616 = dma.done.wait (%p9241_p2), [#allocation3], 24576  }
  0x4e   : > { %10618 = vsyncadd (%p9241_p2), [#allocation3], 4294942720 }
  0x4f   : > { %10620 = dma.done.wait (%p9241_p2), [#allocation5], 16384  }
  0x50   : > { %10622 = vsyncadd (%p9241_p2), [#allocation5], 4294950912 }
  0x51   : > { %10624 = dma.done.wait (%p9241_p2), [#allocation8], 49152  }
  0x52   : > { %10626 = vsyncadd (%p9241_p2), [#allocation8], 4294918144  ;;  %v9271_v0 = vld [vmem:[#allocation2 + $0xe4] ss:$16 sps:$4 sm:$0xff]   ;;  %v9275_v2 = vld [vmem:[#allocation2 + $0xe0] ss:$16 sps:$4 sm:$0xff]   ;;  %v12176_v36 = vlaneseq }
  0x53   : > { %v9273_v1 = vld [vmem:[#allocation2 + $0x2e4] ss:$16 sps:$4 sm:$0xff]   ;;  %1803 = vmatprep.subr.bf16.mxu0 %v9271_v0  ;;  %v9276_v3 = vld [vmem:[#allocation2 + $0x2e0] ss:$16 sps:$4 sm:$0xff]   ;;  %p582_p2 = scmp.lt.s32.totalorder %s10734_s22, 1  ;;  %s12216_s19 = sld [smem:[#allocation39_spill]] }
  0x54   : > { %1844 = vmatprep.subr.bf16.mxu1 %v9273_v1  ;;  %v9277_v4 = vld [vmem:[#allocation2 + $0xc4] ss:$16 sps:$4 sm:$0xff]   ;;  %1804 = vmatpush1.bf16.msra.mxu0 %v9275_v2  ;;  %v9281_v6 = vld [vmem:[#allocation2 + $0xc0] ss:$16 sps:$4 sm:$0xff]   ;;  %v10837_v40 = vshrl.u32 %v12176_v36, 7  ;;  %vm2637_vm4 = vcmask 130048  }
  0x55   : > { %1845 = vmatpush1.bf16.msra.mxu1 %v9276_v3  ;;  %v9279_v5 = vld [vmem:[#allocation2 + $0x2c4] ss:$16 sps:$4 sm:$0xff]   ;;  %1805 = vmatprep.subr.bf16.mxu0 %v9277_v4  ;;  %v9282_v7 = vld [vmem:[#allocation2 + $0x2c0] ss:$16 sps:$4 sm:$0xff]   ;;  %s12273_s22 = smov (!%p582_p2, %s10734_s22), 1  ;;  %v11884_v36 = vld [vmem:[%s12171_s14 + $0x118] sm:$0xff] }
  0x56   : > { %1846 = vmatprep.subr.bf16.mxu1 %v9279_v5  ;;  %v9283_v8 = vld [vmem:[#allocation2 + $0xa4] ss:$16 sps:$4 sm:$0xff]   ;;  %v9287_v10 = vld [vmem:[#allocation2 + $0xa0] ss:$16 sps:$4 sm:$0xff]   ;;  %s9204_s23 = smul.u32 6, %s12273_s22  ;;  %12215 = vst [vmem:[#allocation13_spill] sm:$0xff] %v10837_v40 }
  0x57   : > { %v9285_v9 = vld [vmem:[#allocation2 + $0x2a4] ss:$16 sps:$4 sm:$0xff]   ;;  %v9288_v11 = vld [vmem:[#allocation2 + $0x2a0] ss:$16 sps:$4 sm:$0xff]   ;;  %v10845_v46 = vsub.s32 1, %v10837_v40  ;;  %v10848_v47 = vsub.s32 3, %v10837_v40 }
  0x58   : > { %1806 = vmatpush1.bf16.msra.mxu0 %v9281_v6  ;;  %v9289_v12 = vld [vmem:[#allocation2 + $0x84] ss:$16 sps:$4 sm:$0xff]   ;;  %v9293_v14 = vld [vmem:[#allocation2 + $0x80] ss:$16 sps:$4 sm:$0xff]   ;;  %v10863_v4 = vsub.s32 0, %v10837_v40  ;;  %v10866_v5 = vsub.s32 2, %v10837_v40  ;;  %s589_s25 = scalar_lea.vmem %s12173_s16, %s9204_s23 }
  0x59   : > { %1847 = vmatpush1.bf16.msra.mxu1 %v9282_v7  ;;  %1807 = vmatprep.subr.bf16.mxu0 %v9283_v8  ;;  %v9291_v13 = vld [vmem:[#allocation2 + $0x284] ss:$16 sps:$4 sm:$0xff]   ;;  %v9294_v15 = vld [vmem:[#allocation2 + $0x280] ss:$16 sps:$4 sm:$0xff]   ;;  %s585_s29 = scalar_lea.vmem %s12216_s19, %s9204_s23  ;;  %12217 = vst [vmem:[#allocation14_spill] sm:$0xff] %v10845_v46  ;;  %12218 = vst [vmem:[#allocation15_spill] sm:$0xff] %v10848_v47 }
  0x5a   : > { %1848 = vmatprep.subr.bf16.mxu1 %v9285_v9  ;;  %v9295_v16 = vld [vmem:[#allocation2 + $0x64] ss:$16 sps:$4 sm:$0xff]   ;;  %v9299_v18 = vld [vmem:[#allocation2 + $0x60] ss:$16 sps:$4 sm:$0xff]   ;;  %12219 = vst [vmem:[#allocation16_spill] sm:$0xff] %v10863_v4  ;;  %12220 = vst [vmem:[#allocation17_spill] sm:$0xff] %v10866_v5 }
  0x5b   : > { %v9297_v17 = vld [vmem:[#allocation2 + $0x264] ss:$16 sps:$4 sm:$0xff]   ;;  %v9300_v19 = vld [vmem:[#allocation2 + $0x260] ss:$16 sps:$4 sm:$0xff]   ;;  %v12177_v9 = vsub.s32 5, %v10837_v40  ;;  %vm4622_vm7 = vcmask 64512  }
  0x5c   : > { %1808 = vmatpush1.bf16.msra.mxu0 %v9287_v10  ;;  %v9301_v20 = vld [vmem:[#allocation2 + $0x44] ss:$16 sps:$4 sm:$0xff]   ;;  %v9305_v22 = vld [vmem:[#allocation2 + $0x40] ss:$16 sps:$4 sm:$0xff]  }
  0x5d   : > { %1849 = vmatpush1.bf16.msra.mxu1 %v9288_v11  ;;  %1809 = vmatprep.subr.bf16.mxu0 %v9289_v12  ;;  %v9303_v21 = vld [vmem:[#allocation2 + $0x244] ss:$16 sps:$4 sm:$0xff]   ;;  %v9306_v23 = vld [vmem:[#allocation2 + $0x240] ss:$16 sps:$4 sm:$0xff]  }
  0x5e   : > { %1850 = vmatprep.subr.bf16.mxu1 %v9291_v13  ;;  %v9307_v24 = vld [vmem:[#allocation2 + $0x24] ss:$16 sps:$4 sm:$0xff]   ;;  %v9311_v26 = vld [vmem:[#allocation2 + $0x20] ss:$16 sps:$4 sm:$0xff]  }
  0x5f   : > { %v9309_v25 = vld [vmem:[#allocation2 + $0x224] ss:$16 sps:$4 sm:$0xff]   ;;  %v9312_v27 = vld [vmem:[#allocation2 + $0x220] ss:$16 sps:$4 sm:$0xff]  }
  0x60   : > { %1810 = vmatpush1.bf16.msra.mxu0 %v9293_v14  ;;  %v9313_v28 = vld [vmem:[#allocation2 + $0x4] ss:$16 sps:$4 sm:$0xff]   ;;  %v9317_v30 = vld [vmem:[#allocation2] ss:$16 sps:$4 sm:$0xff]  }
  0x61   : > { %1851 = vmatpush1.bf16.msra.mxu1 %v9294_v15  ;;  %1811 = vmatprep.subr.bf16.mxu0 %v9295_v16  ;;  %v9315_v29 = vld [vmem:[#allocation2 + $0x204] ss:$16 sps:$4 sm:$0xff]   ;;  %v9318_v31 = vld [vmem:[#allocation2 + $0x200] ss:$16 sps:$4 sm:$0xff]   ;;  %v9372_v15 = vld [vmem:[#allocation2 + $0xec] ss:$16 sps:$4 sm:$0xff]  }
  0x62   : > { %1852 = vmatprep.subr.bf16.mxu1 %v9297_v17  ;;  %v9319_v32 = vld [vmem:[#allocation2 + $0x1e4] ss:$16 sps:$4 sm:$0xff]   ;;  %v9323_v34 = vld [vmem:[#allocation2 + $0x1e0] ss:$16 sps:$4 sm:$0xff]  }
  0x63   : > { %v9321_v33 = vld [vmem:[#allocation2 + $0x3e4] ss:$16 sps:$4 sm:$0xff]   ;;  %v9324_v35 = vld [vmem:[#allocation2 + $0x3e0] ss:$16 sps:$4 sm:$0xff]  }
  0x64   : > { %1812 = vmatpush1.bf16.msra.mxu0 %v9299_v18  ;;  %v9325_v37 = vld [vmem:[#allocation2 + $0x1c4] ss:$16 sps:$4 sm:$0xff]   ;;  %v9329_v39 = vld [vmem:[#allocation2 + $0x1c0] ss:$16 sps:$4 sm:$0xff]  }
  0x65   : > { %1853 = vmatpush1.bf16.msra.mxu1 %v9300_v19  ;;  %1813 = vmatprep.subr.bf16.mxu0 %v9301_v20  ;;  %v9327_v38 = vld [vmem:[#allocation2 + $0x3c4] ss:$16 sps:$4 sm:$0xff]   ;;  %v9330_v41 = vld [vmem:[#allocation2 + $0x3c0] ss:$16 sps:$4 sm:$0xff]   ;;  %v9370_v20 = vld [vmem:[#allocation2 + $0xe8] ss:$16 sps:$4 sm:$0xff]  }
  0x66   : > { %1854 = vmatprep.subr.bf16.mxu1 %v9303_v21  ;;  %v9331_v42 = vld [vmem:[#allocation2 + $0x1a4] ss:$16 sps:$4 sm:$0xff]   ;;  %v9335_v44 = vld [vmem:[#allocation2 + $0x1a0] ss:$16 sps:$4 sm:$0xff]  }
  0x67   : > { %v9333_v43 = vld [vmem:[#allocation2 + $0x3a4] ss:$16 sps:$4 sm:$0xff]   ;;  %v9336_v45 = vld [vmem:[#allocation2 + $0x3a0] ss:$16 sps:$4 sm:$0xff]  }
  0x68   : > { %1814 = vmatpush1.bf16.msra.mxu0 %v9305_v22  ;;  %v9337_v48 = vld [vmem:[#allocation2 + $0x184] ss:$16 sps:$4 sm:$0xff]   ;;  %v9341_v51 = vld [vmem:[#allocation2 + $0x180] ss:$16 sps:$4 sm:$0xff]   ;;  %v9378_v22 = vld [vmem:[#allocation2 + $0xcc] ss:$16 sps:$4 sm:$0xff]  }
  0x69   : > { %1855 = vmatpush1.bf16.msra.mxu1 %v9306_v23  ;;  %1815 = vmatprep.subr.bf16.mxu0 %v9307_v24  ;;  %v9339_v49 = vld [vmem:[#allocation2 + $0x384] ss:$16 sps:$4 sm:$0xff]   ;;  %v9342_v54 = vld [vmem:[#allocation2 + $0x380] ss:$16 sps:$4 sm:$0xff]  }
  0x6a   : > { %1856 = vmatprep.subr.bf16.mxu1 %v9309_v25  ;;  %v10850_v50 = vld [vmem:[%s585_s29] sm:$0x3f]  ;;  %v9376_v25 = vld [vmem:[#allocation2 + $0xc8] ss:$16 sps:$4 sm:$0xff]  }
  0x6b   : > { %v600_v52 = vrot.slane %v10850_v50, %v10845_v46  ;;  %v608_v53 = vrot.slane %v10850_v50, %v10848_v47  ;;  %v9343_v55 = vld [vmem:[#allocation2 + $0x164] ss:$16 sps:$4 sm:$0xff]   ;;  %v9347_v59 = vld [vmem:[#allocation2 + $0x160] ss:$16 sps:$4 sm:$0xff]   ;;  %v596_v11 = vrot.slane %v10850_v50, %v10863_v4  ;;  %v604_v12 = vrot.slane %v10850_v50, %v10866_v5 }
  0x6c   : > { %1816 = vmatpush1.bf16.msra.mxu0 %v9311_v26  ;;  %v9345_v56 = vld [vmem:[#allocation2 + $0x364] ss:$16 sps:$4 sm:$0xff]   ;;  %v9348_v60 = vld [vmem:[#allocation2 + $0x360] ss:$16 sps:$4 sm:$0xff]   ;;  %v616_v16 = vrot.slane %v10850_v50, %v12177_v9 }
  0x6d   : > { %1857 = vmatpush1.bf16.msra.mxu1 %v9312_v27  ;;  %1817 = vmatprep.subr.bf16.mxu0 %v9313_v28  ;;  %v10856_v57 = vpack.c.bf16 %v600_v52, %v600_v52  ;;  %v10858_v58 = vpack.c.bf16 %v608_v53, %v608_v53  ;;  %v9349_v61 = vld [vmem:[#allocation2 + $0x144] ss:$16 sps:$4 sm:$0xff]   ;;  %v9353_v63 = vld [vmem:[#allocation2 + $0x140] ss:$16 sps:$4 sm:$0xff]   ;;  %v10876_v17 = vpack.c.bf16 %v596_v11, %v596_v11  ;;  %v9384_v27 = vld [vmem:[#allocation2 + $0xac] ss:$16 sps:$4 sm:$0xff]  }
  0x6e   : > { %1858 = vmatprep.subr.bf16.mxu1 %v9315_v29  ;;  %v9351_v62 = vld [vmem:[#allocation2 + $0x344] ss:$16 sps:$4 sm:$0xff]   ;;  %v9354_v0 = vld [vmem:[#allocation2 + $0x340] ss:$16 sps:$4 sm:$0xff]   ;;  %v10878_v18 = vpack.c.bf16 %v604_v12, %v604_v12  ;;  %v10880_v23 = vpack.c.bf16 %v616_v16, %v616_v16  ;;  %v9382_v29 = vld [vmem:[#allocation2 + $0xa8] ss:$16 sps:$4 sm:$0xff]  }
  0x6f   : > { %1835 = vmatprep.mubr.bf16.mxu0 %v10856_v57  ;;  %1876 = vmatprep.mubr.bf16.mxu1 %v10858_v58  ;;  %v9355_v1 = vld [vmem:[#allocation2 + $0x124] ss:$16 sps:$4 sm:$0xff]   ;;  %v9359_v3 = vld [vmem:[#allocation2 + $0x120] ss:$16 sps:$4 sm:$0xff]   ;;  %v9414_v52 = vld [vmem:[#allocation2 + $0xc] ss:$16 sps:$4 sm:$0xff]  }
  0x70   : > { %1818 = vmatpush1.bf16.msra.mxu0 %v9317_v30  ;;  %v9357_v2 = vld [vmem:[#allocation2 + $0x324] ss:$16 sps:$4 sm:$0xff]   ;;  %v9360_v6 = vld [vmem:[#allocation2 + $0x320] ss:$16 sps:$4 sm:$0xff]   ;;  %v9444_v12 = vld [vmem:[#allocation2 + $0x16c] ss:$16 sps:$4 sm:$0xff]  }
  0x71   : > { %1859 = vmatpush1.bf16.msra.mxu1 %v9318_v31  ;;  %1819 = vmatprep.subr.bf16.mxu0 %v9319_v32  ;;  %v9361_v7 = vld [vmem:[#allocation2 + $0x104] ss:$16 sps:$4 sm:$0xff]   ;;  %v9365_v10 = vld [vmem:[#allocation2 + $0x100] ss:$16 sps:$4 sm:$0xff]   ;;  %v9390_v31 = vld [vmem:[#allocation2 + $0x8c] ss:$16 sps:$4 sm:$0xff]  }
  0x72   : > { %1860 = vmatprep.subr.bf16.mxu1 %v9321_v33  ;;  %v9363_v8 = vld [vmem:[#allocation2 + $0x304] ss:$16 sps:$4 sm:$0xff]   ;;  %v9366_v13 = vld [vmem:[#allocation2 + $0x300] ss:$16 sps:$4 sm:$0xff]   ;;  %v9388_v33 = vld [vmem:[#allocation2 + $0x88] ss:$16 sps:$4 sm:$0xff]  }
  0x73   : > { %v9369_v14 = vld [vmem:[#allocation2 + $0x4e4] ss:$16 sps:$4 sm:$0xff]   ;;  %v9367_v19 = vld [vmem:[#allocation2 + $0x4e0] ss:$16 sps:$4 sm:$0xff]   ;;  %v9450_v16 = vld [vmem:[#allocation2 + $0x14c] ss:$16 sps:$4 sm:$0xff]  }
  0x74   : > { %1820 = vmatpush2.bf16.msra.mxu0 %v9323_v34  ;;  %v9375_v21 = vld [vmem:[#allocation2 + $0x4c4] ss:$16 sps:$4 sm:$0xff]   ;;  %v9373_v24 = vld [vmem:[#allocation2 + $0x4c0] ss:$16 sps:$4 sm:$0xff]  }
  0x75   : > { %1861 = vmatpush2.bf16.msra.mxu1 %v9324_v35  ;;  %1821 = vmatprep.subr.bf16.mxu0 %v9325_v37  ;;  %v9381_v26 = vld [vmem:[#allocation2 + $0x4a4] ss:$16 sps:$4 sm:$0xff]   ;;  %v9379_v28 = vld [vmem:[#allocation2 + $0x4a0] ss:$16 sps:$4 sm:$0xff]   ;;  %v9396_v35 = vld [vmem:[#allocation2 + $0x6c] ss:$16 sps:$4 sm:$0xff]  }
  0x76   : > { %1862 = vmatprep.subr.bf16.mxu1 %v9327_v38  ;;  %v9387_v30 = vld [vmem:[#allocation2 + $0x484] ss:$16 sps:$4 sm:$0xff]   ;;  %v9385_v32 = vld [vmem:[#allocation2 + $0x480] ss:$16 sps:$4 sm:$0xff]   ;;  %v9394_v38 = vld [vmem:[#allocation2 + $0x68] ss:$16 sps:$4 sm:$0xff]  }
  0x77   : > { %v9393_v34 = vld [vmem:[#allocation2 + $0x464] ss:$16 sps:$4 sm:$0xff]   ;;  %v9391_v37 = vld [vmem:[#allocation2 + $0x460] ss:$16 sps:$4 sm:$0xff]  }
  0x78   : > { %1822 = vmatpush2.bf16.msra.mxu0 %v9329_v39  ;;  %v9399_v39 = vld [vmem:[#allocation2 + $0x444] ss:$16 sps:$4 sm:$0xff]   ;;  %v9409_v53 = vld [vmem:[#allocation2 + $0x400] ss:$16 sps:$4 sm:$0xff]  }
  0x79   : > { %1863 = vmatpush2.bf16.msra.mxu1 %v9330_v41  ;;  %1823 = vmatprep.subr.bf16.mxu0 %v9331_v42  ;;  %v9402_v41 = vld [vmem:[#allocation2 + $0x4c] ss:$16 sps:$4 sm:$0xff]   ;;  %v9397_v42 = vld [vmem:[#allocation2 + $0x440] ss:$16 sps:$4 sm:$0xff]   ;;  %v9441_v11 = vld [vmem:[#allocation2 + $0x564] ss:$16 sps:$4 sm:$0xff]  }
  0x7a   : > { %1864 = vmatprep.subr.bf16.mxu1 %v9333_v43  ;;  %v9400_v43 = vld [vmem:[#allocation2 + $0x48] ss:$16 sps:$4 sm:$0xff]   ;;  %v11895_v9 = vld [vmem:[%s12171_s14 + $0x90] sm:$0xff] }
  0x7b   : > { %12236 = vst [vmem:[#allocation33_spill] sm:$0xff] %v11895_v9 }
  0x7c   : > { %1824 = vmatpush2.bf16.msra.mxu0 %v9335_v44  ;;  %v9405_v44 = vld [vmem:[#allocation2 + $0x424] ss:$16 sps:$4 sm:$0xff]  }
  0x7d   : > { %1865 = vmatpush2.bf16.msra.mxu1 %v9336_v45  ;;  %1825 = vmatprep.subr.bf16.mxu0 %v9337_v48  ;;  %v9408_v45 = vld [vmem:[#allocation2 + $0x2c] ss:$16 sps:$4 sm:$0xff]   ;;  %v9403_v48 = vld [vmem:[#allocation2 + $0x420] ss:$16 sps:$4 sm:$0xff]  }
  0x7e   : > { %1866 = vmatprep.subr.bf16.mxu1 %v9339_v49  ;;  %v9406_v49 = vld [vmem:[#allocation2 + $0x28] ss:$16 sps:$4 sm:$0xff]  }
  0x80   : > { %1826 = vmatpush2.bf16.msra.mxu0 %v9341_v51  ;;  %v9411_v51 = vld [vmem:[#allocation2 + $0x404] ss:$16 sps:$4 sm:$0xff]  }
  0x81   : > { %1867 = vmatpush2.bf16.msra.mxu1 %v9342_v54  ;;  %1827 = vmatprep.subr.bf16.mxu0 %v9343_v55  ;;  %v9412_v54 = vld [vmem:[#allocation2 + $0x8] ss:$16 sps:$4 sm:$0xff]   ;;  %v9417_v55 = vld [vmem:[#allocation2 + $0x5e4] ss:$16 sps:$4 sm:$0xff]  }
  0x82   : > { %1868 = vmatprep.subr.bf16.mxu1 %v9345_v56  ;;  %v9420_v56 = vld [vmem:[#allocation2 + $0x1ec] ss:$16 sps:$4 sm:$0xff]  }
  0x84   : > { %1828 = vmatpush2.bf16.msra.mxu0 %v9347_v59  ;;  %v9418_v59 = vld [vmem:[#allocation2 + $0x1e8] ss:$16 sps:$4 sm:$0xff]  }
  0x85   : > { %1869 = vmatpush2.bf16.msra.mxu1 %v9348_v60  ;;  %1829 = vmatprep.subr.bf16.mxu0 %v9349_v61  ;;  %v9423_v60 = vld [vmem:[#allocation2 + $0x5c4] ss:$16 sps:$4 sm:$0xff]   ;;  %v9426_v61 = vld [vmem:[#allocation2 + $0x1cc] ss:$16 sps:$4 sm:$0xff]  }
  0x86   : > { %1870 = vmatprep.subr.bf16.mxu1 %v9351_v62  ;;  %v9421_v62 = vld [vmem:[#allocation2 + $0x5c0] ss:$16 sps:$4 sm:$0xff]  }
  0x88   : > { %1830 = vmatpush2.bf16.msra.mxu0 %v9353_v63  ;;  %v9424_v63 = vld [vmem:[#allocation2 + $0x1c8] ss:$16 sps:$4 sm:$0xff]  }
  0x89   : > { %1871 = vmatpush2.bf16.msra.mxu1 %v9354_v0  ;;  %1831 = vmatprep.subr.bf16.mxu0 %v9355_v1  ;;  %v9429_v0 = vld [vmem:[#allocation2 + $0x5a4] ss:$16 sps:$4 sm:$0xff]   ;;  %v9432_v1 = vld [vmem:[#allocation2 + $0x1ac] ss:$16 sps:$4 sm:$0xff]  }
  0x8a   : > { %1872 = vmatprep.subr.bf16.mxu1 %v9357_v2  ;;  %v9427_v2 = vld [vmem:[#allocation2 + $0x5a0] ss:$16 sps:$4 sm:$0xff]  }
  0x8c   : > { %1832 = vmatpush2.bf16.msra.mxu0 %v9359_v3  ;;  %v9430_v3 = vld [vmem:[#allocation2 + $0x1a8] ss:$16 sps:$4 sm:$0xff]  }
  0x8d   : > { %1873 = vmatpush2.bf16.msra.mxu1 %v9360_v6  ;;  %1833 = vmatprep.subr.bf16.mxu0 %v9361_v7  ;;  %v9435_v6 = vld [vmem:[#allocation2 + $0x584] ss:$16 sps:$4 sm:$0xff]   ;;  %v9438_v7 = vld [vmem:[#allocation2 + $0x18c] ss:$16 sps:$4 sm:$0xff]  }
  0x8e   : > { %1874 = vmatprep.subr.bf16.mxu1 %v9363_v8  ;;  %v9433_v8 = vld [vmem:[#allocation2 + $0x580] ss:$16 sps:$4 sm:$0xff]  }
  0x90   : > { %1834 = vmatpush2.bf16.msra.mxu0 %v9365_v10  ;;  %v9436_v10 = vld [vmem:[#allocation2 + $0x188] ss:$16 sps:$4 sm:$0xff]  }
  0x91   : > { %1875 = vmatpush2.bf16.msra.mxu1 %v9366_v13  ;;  %1885 = vmatprep.subr.bf16.mxu0 %v9369_v14  ;;  %v9439_v13 = vld [vmem:[#allocation2 + $0x560] ss:$16 sps:$4 sm:$0xff]   ;;  %v9442_v14 = vld [vmem:[#allocation2 + $0x168] ss:$16 sps:$4 sm:$0xff]  }
  0x92   : > { %1926 = vmatprep.subr.bf16.mxu1 %v9372_v15  ;;  %v9447_v15 = vld [vmem:[#allocation2 + $0x544] ss:$16 sps:$4 sm:$0xff]  }
  0x93   : > { %1836 = vmatmul.mubr.bf16.vlgmr.msra.gmra.mxu0 %v10876_v17 }
  0x94   : > { %1877 = vmatmul.mubr.bf16.vlgmr.msra.gmra.mxu1 %v10878_v18  ;;  %1886 = vmatpush1.bf16.msra.mxu0 %v9367_v19  ;;  %v9445_v19 = vld [vmem:[#allocation2 + $0x540] ss:$16 sps:$4 sm:$0xff]  }
  0x95   : > { %1927 = vmatpush1.bf16.msra.mxu1 %v9370_v20  ;;  %1887 = vmatprep.subr.bf16.mxu0 %v9375_v21  ;;  %v9448_v20 = vld [vmem:[#allocation2 + $0x148] ss:$16 sps:$4 sm:$0xff]   ;;  %v9453_v21 = vld [vmem:[#allocation2 + $0x524] ss:$16 sps:$4 sm:$0xff]  }
  0x96   : > { %1928 = vmatprep.subr.bf16.mxu1 %v9378_v22  ;;  %1917 = vmatprep.mubr.bf16.mxu0 %v10880_v23  ;;  %v9456_v22 = vld [vmem:[#allocation2 + $0x12c] ss:$16 sps:$4 sm:$0xff]  }
  0x97   : > { %1958 = vmatprep.mubr.bf16.mxu1 %v10856_v57  ;;  %v9415_v57 = vld [vmem:[#allocation2 + $0x5e0] ss:$16 sps:$4 sm:$0xff]  }
  0x98   : > { %1888 = vmatpush1.bf16.msra.mxu0 %v9373_v24  ;;  %v9451_v24 = vld [vmem:[#allocation2 + $0x520] ss:$16 sps:$4 sm:$0xff]  }
  0x99   : > { %1929 = vmatpush1.bf16.msra.mxu1 %v9376_v25  ;;  %1889 = vmatprep.subr.bf16.mxu0 %v9381_v26  ;;  %v12178_v25 = vsub.s32 4, %v10837_v40  ;;  %v9454_v26 = vld [vmem:[#allocation2 + $0x128] ss:$16 sps:$4 sm:$0xff]   ;;  %v11912_v40 = vld [vmem:[%s12171_s14 + $0x110] sm:$0xff] }
  0x9a   : > { %1930 = vmatprep.subr.bf16.mxu1 %v9384_v27  ;;  %v9459_v27 = vld [vmem:[#allocation2 + $0x504] ss:$16 sps:$4 sm:$0xff]  }
  0x9c   : > { %1890 = vmatpush1.bf16.msra.mxu0 %v9379_v28  ;;  %v9462_v28 = vld [vmem:[#allocation2 + $0x10c] ss:$16 sps:$4 sm:$0xff]  }
  0x9d   : > { %1931 = vmatpush1.bf16.msra.mxu1 %v9382_v29  ;;  %1891 = vmatprep.subr.bf16.mxu0 %v9387_v30  ;;  %v9457_v29 = vld [vmem:[#allocation2 + $0x500] ss:$16 sps:$4 sm:$0xff]   ;;  %v612_v30 = vrot.slane %v10850_v50, %v12178_v25  ;;  %v9477_v50 = vld [vmem:[#allocation2 + $0x2ac] ss:$16 sps:$4 sm:$0xff]  }
  0x9e   : > { %1932 = vmatprep.subr.bf16.mxu1 %v9390_v31  ;;  %v9460_v31 = vld [vmem:[#allocation2 + $0x108] ss:$16 sps:$4 sm:$0xff]   ;;  %v11900_v25 = vld [vmem:[%s12171_s14 + $0x190] sm:$0xff] }
  0xa0   : > { %1892 = vmatpush1.bf16.msra.mxu0 %v9385_v32  ;;  %v9465_v32 = vld [vmem:[#allocation2 + $0x2ec] ss:$16 sps:$4 sm:$0xff]  }
  0xa1   : > { %1933 = vmatpush1.bf16.msra.mxu1 %v9388_v33  ;;  %1893 = vmatprep.subr.bf16.mxu0 %v9393_v34  ;;  %v9468_v33 = vld [vmem:[#allocation2 + $0x4ec] ss:$16 sps:$4 sm:$0xff]   ;;  %v9463_v34 = vld [vmem:[#allocation2 + $0x2e8] ss:$16 sps:$4 sm:$0xff]  }
  0xa2   : > { %1934 = vmatprep.subr.bf16.mxu1 %v9396_v35  ;;  %v10890_v35 = vpack.c.bf16 %v612_v30, %v612_v30  ;;  %v9543_v30 = vld [vmem:[#allocation2 + $0x34c] ss:$16 sps:$4 sm:$0xff]  }
  0xa4   : > { %1894 = vmatpush1.bf16.msra.mxu0 %v9391_v37  ;;  %v9466_v37 = vld [vmem:[#allocation2 + $0x4e8] ss:$16 sps:$4 sm:$0xff]  }
  0xa5   : > { %1935 = vmatpush1.bf16.msra.mxu1 %v9394_v38  ;;  %1895 = vmatprep.subr.bf16.mxu0 %v9399_v39  ;;  %v9471_v38 = vld [vmem:[#allocation2 + $0x2cc] ss:$16 sps:$4 sm:$0xff]  }
  0xa6   : > { %1936 = vmatprep.subr.bf16.mxu1 %v9402_v41  ;;  %v9474_v39 = vld [vmem:[#allocation2 + $0x4cc] ss:$16 sps:$4 sm:$0xff]   ;;  %v9469_v41 = vld [vmem:[#allocation2 + $0x2c8] ss:$16 sps:$4 sm:$0xff]  }
  0xa8   : > { %1896 = vmatpush1.bf16.msra.mxu0 %v9397_v42  ;;  %v9472_v42 = vld [vmem:[#allocation2 + $0x4c8] ss:$16 sps:$4 sm:$0xff]  }
  0xa9   : > { %1937 = vmatpush1.bf16.msra.mxu1 %v9400_v43  ;;  %1897 = vmatprep.subr.bf16.mxu0 %v9405_v44  ;;  %v9480_v43 = vld [vmem:[#allocation2 + $0x4ac] ss:$16 sps:$4 sm:$0xff]   ;;  %v9475_v44 = vld [vmem:[#allocation2 + $0x2a8] ss:$16 sps:$4 sm:$0xff]  }
  0xaa   : > { %1938 = vmatprep.subr.bf16.mxu1 %v9408_v45  ;;  %v9478_v45 = vld [vmem:[#allocation2 + $0x4a8] ss:$16 sps:$4 sm:$0xff]  }
  0xac   : > { %1898 = vmatpush1.bf16.msra.mxu0 %v9403_v48  ;;  %v9483_v48 = vld [vmem:[#allocation2 + $0x28c] ss:$16 sps:$4 sm:$0xff]  }
  0xad   : > { %1939 = vmatpush1.bf16.msra.mxu1 %v9406_v49  ;;  %1899 = vmatprep.subr.bf16.mxu0 %v9411_v51  ;;  %v9486_v49 = vld [vmem:[#allocation2 + $0x48c] ss:$16 sps:$4 sm:$0xff]   ;;  %v9484_v51 = vld [vmem:[#allocation2 + $0x488] ss:$16 sps:$4 sm:$0xff]  }
  0xae   : > { %1940 = vmatprep.subr.bf16.mxu1 %v9414_v52  ;;  %v9489_v52 = vld [vmem:[#allocation2 + $0x26c] ss:$16 sps:$4 sm:$0xff]  }
  0xb0   : > { %1900 = vmatpush1.bf16.msra.mxu0 %v9409_v53  ;;  %v9492_v53 = vld [vmem:[#allocation2 + $0x46c] ss:$16 sps:$4 sm:$0xff]  }
  0xb1   : > { %1941 = vmatpush1.bf16.msra.mxu1 %v9412_v54  ;;  %1901 = vmatprep.subr.bf16.mxu0 %v9417_v55  ;;  %v9487_v54 = vld [vmem:[#allocation2 + $0x268] ss:$16 sps:$4 sm:$0xff]   ;;  %v9498_v55 = vld [vmem:[#allocation2 + $0x44c] ss:$16 sps:$4 sm:$0xff]  }
  0xb2   : > { %1942 = vmatprep.subr.bf16.mxu1 %v9420_v56  ;;  %v9493_v56 = vld [vmem:[#allocation2 + $0x248] ss:$16 sps:$4 sm:$0xff]  }
  0xb4   : > { %1902 = vmatpush2.bf16.msra.mxu0 %v9415_v57  ;;  %v9496_v57 = vld [vmem:[#allocation2 + $0x448] ss:$16 sps:$4 sm:$0xff]  }
  0xb5   : > { %1943 = vmatpush2.bf16.msra.mxu1 %v9418_v59  ;;  %1903 = vmatprep.subr.bf16.mxu0 %v9423_v60  ;;  %v9501_v59 = vld [vmem:[#allocation2 + $0x22c] ss:$16 sps:$4 sm:$0xff]  }
  0xb6   : > { %1944 = vmatprep.subr.bf16.mxu1 %v9426_v61  ;;  %v9504_v60 = vld [vmem:[#allocation2 + $0x42c] ss:$16 sps:$4 sm:$0xff]   ;;  %v9499_v61 = vld [vmem:[#allocation2 + $0x228] ss:$16 sps:$4 sm:$0xff]  }
  0xb8   : > { %1904 = vmatpush2.bf16.msra.mxu0 %v9421_v62  ;;  %v9502_v62 = vld [vmem:[#allocation2 + $0x428] ss:$16 sps:$4 sm:$0xff]  }
  0xb9   : > { %1945 = vmatpush2.bf16.msra.mxu1 %v9424_v63  ;;  %1905 = vmatprep.subr.bf16.mxu0 %v9429_v0  ;;  %v9507_v63 = vld [vmem:[#allocation2 + $0x20c] ss:$16 sps:$4 sm:$0xff]  }
  0xba   : > { %1946 = vmatprep.subr.bf16.mxu1 %v9432_v1  ;;  %v9510_v0 = vld [vmem:[#allocation2 + $0x40c] ss:$16 sps:$4 sm:$0xff]   ;;  %v9505_v1 = vld [vmem:[#allocation2 + $0x208] ss:$16 sps:$4 sm:$0xff]  }
  0xbc   : > { %1906 = vmatpush2.bf16.msra.mxu0 %v9427_v2  ;;  %v9508_v2 = vld [vmem:[#allocation2 + $0x408] ss:$16 sps:$4 sm:$0xff]  }
  0xbd   : > { %1947 = vmatpush2.bf16.msra.mxu1 %v9430_v3  ;;  %1907 = vmatprep.subr.bf16.mxu0 %v9435_v6  ;;  %v9513_v3 = vld [vmem:[#allocation2 + $0x3ec] ss:$16 sps:$4 sm:$0xff]  }
  0xbe   : > { %1948 = vmatprep.subr.bf16.mxu1 %v9438_v7  ;;  %v9516_v6 = vld [vmem:[#allocation2 + $0x5ec] ss:$16 sps:$4 sm:$0xff]   ;;  %v9511_v7 = vld [vmem:[#allocation2 + $0x3e8] ss:$16 sps:$4 sm:$0xff]  }
  0xc0   : > { %1908 = vmatpush2.bf16.msra.mxu0 %v9433_v8  ;;  %v9514_v8 = vld [vmem:[#allocation2 + $0x5e8] ss:$16 sps:$4 sm:$0xff]  }
  0xc1   : > { %1949 = vmatpush2.bf16.msra.mxu1 %v9436_v10  ;;  %1909 = vmatprep.subr.bf16.mxu0 %v9441_v11  ;;  %v9519_v10 = vld [vmem:[#allocation2 + $0x3cc] ss:$16 sps:$4 sm:$0xff]  }
  0xc2   : > { %1950 = vmatprep.subr.bf16.mxu1 %v9444_v12  ;;  %v9522_v11 = vld [vmem:[#allocation2 + $0x5cc] ss:$16 sps:$4 sm:$0xff]   ;;  %v9517_v12 = vld [vmem:[#allocation2 + $0x3c8] ss:$16 sps:$4 sm:$0xff]  }
  0xc4   : > { %1910 = vmatpush2.bf16.msra.mxu0 %v9439_v13  ;;  %v9520_v13 = vld [vmem:[#allocation2 + $0x5c8] ss:$16 sps:$4 sm:$0xff]  }
  0xc5   : > { %1951 = vmatpush2.bf16.msra.mxu1 %v9442_v14  ;;  %1911 = vmatprep.subr.bf16.mxu0 %v9447_v15  ;;  %v9525_v14 = vld [vmem:[#allocation2 + $0x3ac] ss:$16 sps:$4 sm:$0xff]  }
  0xc6   : > { %1952 = vmatprep.subr.bf16.mxu1 %v9450_v16  ;;  %v9528_v15 = vld [vmem:[#allocation2 + $0x5ac] ss:$16 sps:$4 sm:$0xff]   ;;  %v9523_v16 = vld [vmem:[#allocation2 + $0x3a8] ss:$16 sps:$4 sm:$0xff]  }
  0xc8   : > { %1912 = vmatpush2.bf16.msra.mxu0 %v9445_v19  ;;  %v9526_v19 = vld [vmem:[#allocation2 + $0x5a8] ss:$16 sps:$4 sm:$0xff]  }
  0xc9   : > { %1953 = vmatpush2.bf16.msra.mxu1 %v9448_v20  ;;  %1913 = vmatprep.subr.bf16.mxu0 %v9453_v21  ;;  %v9531_v20 = vld [vmem:[#allocation2 + $0x38c] ss:$16 sps:$4 sm:$0xff]  }
  0xca   : > { %1954 = vmatprep.subr.bf16.mxu1 %v9456_v22  ;;  %v9534_v21 = vld [vmem:[#allocation2 + $0x58c] ss:$16 sps:$4 sm:$0xff]   ;;  %v9529_v22 = vld [vmem:[#allocation2 + $0x388] ss:$16 sps:$4 sm:$0xff]  }
  0xcc   : > { %1914 = vmatpush2.bf16.msra.mxu0 %v9451_v24  ;;  %v9532_v24 = vld [vmem:[#allocation2 + $0x588] ss:$16 sps:$4 sm:$0xff]  }
  0xcd   : > { %1955 = vmatpush2.bf16.msra.mxu1 %v9454_v26  ;;  %1915 = vmatprep.subr.bf16.mxu0 %v9459_v27  ;;  %v9537_v26 = vld [vmem:[#allocation2 + $0x36c] ss:$16 sps:$4 sm:$0xff]  }
  0xce   : > { %1956 = vmatprep.subr.bf16.mxu1 %v9462_v28  ;;  %v9540_v27 = vld [vmem:[#allocation2 + $0x56c] ss:$16 sps:$4 sm:$0xff]   ;;  %v9535_v28 = vld [vmem:[#allocation2 + $0x368] ss:$16 sps:$4 sm:$0xff]  }
  0xd0   : > { %1916 = vmatpush2.bf16.msra.mxu0 %v9457_v29  ;;  %v9538_v29 = vld [vmem:[#allocation2 + $0x568] ss:$16 sps:$4 sm:$0xff]  }
  0xd1   : > { %1957 = vmatpush2.bf16.msra.mxu1 %v9460_v31  ;;  %1967 = vmatprep.subr.bf16.mxu0 %v9465_v32  ;;  %v9546_v31 = vld [vmem:[#allocation2 + $0x54c] ss:$16 sps:$4 sm:$0xff]   ;;  %v9541_v32 = vld [vmem:[#allocation2 + $0x348] ss:$16 sps:$4 sm:$0xff]  }
  0xd2   : > { %2008 = vmatprep.subr.bf16.mxu1 %v9468_v33  ;;  %v9544_v33 = vld [vmem:[#allocation2 + $0x548] ss:$16 sps:$4 sm:$0xff]  }
  0xd3   : > { %1918 = vmatmul.mubr.bf16.vlgmr.msra.gmra.mxu0 %v10890_v35 }
  0xd4   : > { %1959 = vmatmul.mubr.bf16.vlgmr.msra.gmra.mxu1 %v10876_v17  ;;  %1968 = vmatpush1.bf16.msra.mxu0 %v9463_v34  ;;  %v9481_v17 = vld [vmem:[#allocation2 + $0x288] ss:$16 sps:$4 sm:$0xff]   ;;  %v9549_v34 = vld [vmem:[#allocation2 + $0x32c] ss:$16 sps:$4 sm:$0xff]  }
  0xd5   : > { %2009 = vmatpush1.bf16.msra.mxu1 %v9466_v37  ;;  %1969 = vmatprep.subr.bf16.mxu0 %v9471_v38  ;;  %v9552_v37 = vld [vmem:[#allocation2 + $0x52c] ss:$16 sps:$4 sm:$0xff]   ;;  %v9547_v38 = vld [vmem:[#allocation2 + $0x328] ss:$16 sps:$4 sm:$0xff]  }
  0xd6   : > { %2010 = vmatprep.subr.bf16.mxu1 %v9474_v39  ;;  %1999 = vmatprep.mubr.bf16.mxu0 %v10858_v58  ;;  %v9490_v58 = vld [vmem:[#allocation2 + $0x468] ss:$16 sps:$4 sm:$0xff]  }
  0xd7   : > { %2040 = vmatprep.mubr.bf16.mxu1 %v10880_v23  ;;  %v9495_v23 = vld [vmem:[#allocation2 + $0x24c] ss:$16 sps:$4 sm:$0xff]   ;;  %v9550_v39 = vld [vmem:[#allocation2 + $0x528] ss:$16 sps:$4 sm:$0xff]  }
  0xd8   : > { %1970 = vmatpush1.bf16.msra.mxu0 %v9469_v41  ;;  %v9555_v41 = vld [vmem:[#allocation2 + $0x30c] ss:$16 sps:$4 sm:$0xff]  }
  0xd9   : > { %2011 = vmatpush1.bf16.msra.mxu1 %v9472_v42  ;;  %1971 = vmatprep.subr.bf16.mxu0 %v9477_v50  ;;  %v9558_v42 = vld [vmem:[#allocation2 + $0x50c] ss:$16 sps:$4 sm:$0xff]   ;;  %v9553_v50 = vld [vmem:[#allocation2 + $0x308] ss:$16 sps:$4 sm:$0xff]  }
  0xda   : > { %2012 = vmatprep.subr.bf16.mxu1 %v9480_v43  ;;  %v9556_v43 = vld [vmem:[#allocation2 + $0x508] ss:$16 sps:$4 sm:$0xff]  }
  0xdc   : > { %1972 = vmatpush1.bf16.msra.mxu0 %v9475_v44  ;;  %v9561_v44 = vld [vmem:[%s12160_s3 + $0x74] ss:$8 sps:$4 sm:$0xff]  }
  0xdd   : > { %2013 = vmatpush1.bf16.msra.mxu1 %v9478_v45  ;;  %1973 = vmatprep.subr.bf16.mxu0 %v9483_v48  ;;  %v9559_v45 = vld [vmem:[%s12160_s3 + $0x70] ss:$8 sps:$4 sm:$0xff]   ;;  %v9564_v48 = vld [vmem:[%s12160_s3 + $0x64] ss:$8 sps:$4 sm:$0xff]  }
  0xde   : > { %2014 = vmatprep.subr.bf16.mxu1 %v9486_v49  ;;  %v9562_v49 = vld [vmem:[%s12160_s3 + $0x60] ss:$8 sps:$4 sm:$0xff]  }
  0xe0   : > { %1974 = vmatpush1.bf16.msra.mxu0 %v9481_v17  ;;  %v9567_v17 = vld [vmem:[%s12160_s3 + $0x54] ss:$8 sps:$4 sm:$0xff]  }
  0xe1   : > { %2015 = vmatpush1.bf16.msra.mxu1 %v9484_v51  ;;  %1975 = vmatprep.subr.bf16.mxu0 %v9489_v52  ;;  %v9565_v51 = vld [vmem:[%s12160_s3 + $0x50] ss:$8 sps:$4 sm:$0xff]   ;;  %v9573_v52 = vld [vmem:[%s12160_s3 + $0x34] ss:$8 sps:$4 sm:$0xff]  }
  0xe2   : > { %2016 = vmatprep.subr.bf16.mxu1 %v9492_v53  ;;  %v9607_v53 = vld [vmem:[%s12160_s3 + $0x170] ss:$8 sps:$4 sm:$0xff]  }
  0xe4   : > { %1976 = vmatpush1.bf16.msra.mxu0 %v9487_v54  ;;  %v9609_v54 = vld [vmem:[%s12160_s3 + $0x174] ss:$8 sps:$4 sm:$0xff]  }
  0xe5   : > { %2017 = vmatpush1.bf16.msra.mxu1 %v9490_v58  ;;  %1977 = vmatprep.subr.bf16.mxu0 %v9495_v23  ;;  %v9612_v58 = vld [vmem:[%s12160_s3 + $0x164] ss:$8 sps:$4 sm:$0xff]   ;;  %v9571_v23 = vld [vmem:[%s12160_s3 + $0x30] ss:$8 sps:$4 sm:$0xff]  }
  0xe6   : > { %2018 = vmatprep.subr.bf16.mxu1 %v9498_v55  ;;  %v9576_v55 = vld [vmem:[%s12160_s3 + $0x24] ss:$8 sps:$4 sm:$0xff]  }
  0xe8   : > { %1978 = vmatpush1.bf16.msra.mxu0 %v9493_v56  ;;  %v9610_v56 = vld [vmem:[%s12160_s3 + $0x160] ss:$8 sps:$4 sm:$0xff]  }
  0xe9   : > { %2019 = vmatpush1.bf16.msra.mxu1 %v9496_v57  ;;  %1979 = vmatprep.subr.bf16.mxu0 %v9501_v59  ;;  %v9615_v57 = vld [vmem:[%s12160_s3 + $0x154] ss:$8 sps:$4 sm:$0xff]   ;;  %v9574_v59 = vld [vmem:[%s12160_s3 + $0x20] ss:$8 sps:$4 sm:$0xff]  }
  0xea   : > { %2020 = vmatprep.subr.bf16.mxu1 %v9504_v60  ;;  %v9579_v60 = vld [vmem:[%s12160_s3 + $0x14] ss:$8 sps:$4 sm:$0xff]  }
  0xec   : > { %1980 = vmatpush1.bf16.msra.mxu0 %v9499_v61  ;;  %v9613_v61 = vld [vmem:[%s12160_s3 + $0x150] ss:$8 sps:$4 sm:$0xff]  }
  0xed   : > { %2021 = vmatpush1.bf16.msra.mxu1 %v9502_v62  ;;  %1981 = vmatprep.subr.bf16.mxu0 %v9507_v63  ;;  %v9577_v62 = vld [vmem:[%s12160_s3 + $0x10] ss:$8 sps:$4 sm:$0xff]   ;;  %v9618_v63 = vld [vmem:[%s12160_s3 + $0x144] ss:$8 sps:$4 sm:$0xff]  }
  0xee   : > { %2022 = vmatprep.subr.bf16.mxu1 %v9510_v0  ;;  %v9582_v0 = vld [vmem:[%s12160_s3 + $0x4] ss:$8 sps:$4 sm:$0xff]  }
  0xf0   : > { %1982 = vmatpush1.bf16.msra.mxu0 %v9505_v1  ;;  %v9616_v1 = vld [vmem:[%s12160_s3 + $0x140] ss:$8 sps:$4 sm:$0xff]  }
  0xf1   : > { %2023 = vmatpush1.bf16.msra.mxu1 %v9508_v2  ;;  %1983 = vmatprep.subr.bf16.mxu0 %v9513_v3  ;;  %v9621_v2 = vld [vmem:[%s12160_s3 + $0x134] ss:$8 sps:$4 sm:$0xff]   ;;  %v9580_v3 = vld [vmem:[%s12160_s3] ss:$8 sps:$4 sm:$0xff]  }
  0xf2   : > { %2024 = vmatprep.subr.bf16.mxu1 %v9516_v6  ;;  %v9585_v6 = vld [vmem:[%s12160_s3 + $0xf4] ss:$8 sps:$4 sm:$0xff]  }
  0xf4   : > { %1984 = vmatpush2.bf16.msra.mxu0 %v9511_v7  ;;  %v9619_v7 = vld [vmem:[%s12160_s3 + $0x130] ss:$8 sps:$4 sm:$0xff]  }
  0xf5   : > { %2025 = vmatpush2.bf16.msra.mxu1 %v9514_v8  ;;  %1985 = vmatprep.subr.bf16.mxu0 %v9519_v10  ;;  %v9624_v8 = vld [vmem:[%s12160_s3 + $0x124] ss:$8 sps:$4 sm:$0xff]   ;;  %v9583_v10 = vld [vmem:[%s12160_s3 + $0xf0] ss:$8 sps:$4 sm:$0xff]  }
  0xf6   : > { %2026 = vmatprep.subr.bf16.mxu1 %v9522_v11  ;;  %v9588_v11 = vld [vmem:[%s12160_s3 + $0xe4] ss:$8 sps:$4 sm:$0xff]  }
  0xf8   : > { %1986 = vmatpush2.bf16.msra.mxu0 %v9517_v12  ;;  %v9622_v12 = vld [vmem:[%s12160_s3 + $0x120] ss:$8 sps:$4 sm:$0xff]  }
  0xf9   : > { %2027 = vmatpush2.bf16.msra.mxu1 %v9520_v13  ;;  %1987 = vmatprep.subr.bf16.mxu0 %v9525_v14  ;;  %v9627_v13 = vld [vmem:[%s12160_s3 + $0x114] ss:$8 sps:$4 sm:$0xff]   ;;  %v9586_v14 = vld [vmem:[%s12160_s3 + $0xe0] ss:$8 sps:$4 sm:$0xff]  }
  0xfa   : > { %2028 = vmatprep.subr.bf16.mxu1 %v9528_v15  ;;  %v9591_v15 = vld [vmem:[%s12160_s3 + $0xd4] ss:$8 sps:$4 sm:$0xff]  }
  0xfc   : > { %1988 = vmatpush2.bf16.msra.mxu0 %v9523_v16  ;;  %v9625_v16 = vld [vmem:[%s12160_s3 + $0x110] ss:$8 sps:$4 sm:$0xff]  }
  0xfd   : > { %2029 = vmatpush2.bf16.msra.mxu1 %v9526_v19  ;;  %1989 = vmatprep.subr.bf16.mxu0 %v9531_v20  ;;  %v9630_v19 = vld [vmem:[%s12160_s3 + $0x104] ss:$8 sps:$4 sm:$0xff]   ;;  %v9589_v20 = vld [vmem:[%s12160_s3 + $0xd0] ss:$8 sps:$4 sm:$0xff]  }
  0xfe   : > { %2030 = vmatprep.subr.bf16.mxu1 %v9534_v21  ;;  %v9594_v21 = vld [vmem:[%s12160_s3 + $0xc4] ss:$8 sps:$4 sm:$0xff]  }
 0x100   : > { %1990 = vmatpush2.bf16.msra.mxu0 %v9529_v22  ;;  %v9628_v22 = vld [vmem:[%s12160_s3 + $0x100] ss:$8 sps:$4 sm:$0xff]  }
 0x101   : > { %2031 = vmatpush2.bf16.msra.mxu1 %v9532_v24  ;;  %1991 = vmatprep.subr.bf16.mxu0 %v9537_v26  ;;  %v9633_v24 = vld [vmem:[%s12160_s3 + $0x1f4] ss:$8 sps:$4 sm:$0xff]   ;;  %v9592_v26 = vld [vmem:[%s12160_s3 + $0xc0] ss:$8 sps:$4 sm:$0xff]  }
 0x102   : > { %2032 = vmatprep.subr.bf16.mxu1 %v9540_v27  ;;  %v9597_v27 = vld [vmem:[%s12160_s3 + $0xb4] ss:$8 sps:$4 sm:$0xff]  }
 0x104   : > { %1992 = vmatpush2.bf16.msra.mxu0 %v9535_v28  ;;  %v9631_v28 = vld [vmem:[%s12160_s3 + $0x1f0] ss:$8 sps:$4 sm:$0xff]  }
 0x105   : > { %2033 = vmatpush2.bf16.msra.mxu1 %v9538_v29  ;;  %1993 = vmatprep.subr.bf16.mxu0 %v9543_v30  ;;  %v9636_v29 = vld [vmem:[%s12160_s3 + $0x1e4] ss:$8 sps:$4 sm:$0xff]   ;;  %v9595_v30 = vld [vmem:[%s12160_s3 + $0xb0] ss:$8 sps:$4 sm:$0xff]  }
 0x106   : > { %2034 = vmatprep.subr.bf16.mxu1 %v9546_v31  ;;  %v9600_v31 = vld [vmem:[%s12160_s3 + $0xa4] ss:$8 sps:$4 sm:$0xff]  }
 0x108   : > { %1994 = vmatpush2.bf16.msra.mxu0 %v9541_v32  ;;  %v9634_v32 = vld [vmem:[%s12160_s3 + $0x1e0] ss:$8 sps:$4 sm:$0xff]  }
 0x109   : > { %2035 = vmatpush2.bf16.msra.mxu1 %v9544_v33  ;;  %1995 = vmatprep.subr.bf16.mxu0 %v9549_v34  ;;  %v9639_v33 = vld [vmem:[%s12160_s3 + $0x1d4] ss:$8 sps:$4 sm:$0xff]   ;;  %v9598_v34 = vld [vmem:[%s12160_s3 + $0xa0] ss:$8 sps:$4 sm:$0xff]  }
 0x10a   : > { %2036 = vmatprep.subr.bf16.mxu1 %v9552_v37  ;;  %v9603_v37 = vld [vmem:[%s12160_s3 + $0x94] ss:$8 sps:$4 sm:$0xff]  }
 0x10c   : > { %1996 = vmatpush2.bf16.msra.mxu0 %v9547_v38  ;;  %v9637_v38 = vld [vmem:[%s12160_s3 + $0x1d0] ss:$8 sps:$4 sm:$0xff]  }
 0x10d   : > { %2037 = vmatpush2.bf16.msra.mxu1 %v9550_v39  ;;  %1997 = vmatprep.subr.bf16.mxu0 %v9555_v41  ;;  %v9642_v39 = vld [vmem:[%s12160_s3 + $0x1c4] ss:$8 sps:$4 sm:$0xff]   ;;  %v9601_v41 = vld [vmem:[%s12160_s3 + $0x90] ss:$8 sps:$4 sm:$0xff]  }
 0x10e   : > { %2038 = vmatprep.subr.bf16.mxu1 %v9558_v42  ;;  %v9606_v42 = vld [vmem:[%s12160_s3 + $0x84] ss:$8 sps:$4 sm:$0xff]  }
 0x110   : > { %1998 = vmatpush2.bf16.msra.mxu0 %v9553_v50  ;;  %v9640_v50 = vld [vmem:[%s12160_s3 + $0x1c0] ss:$8 sps:$4 sm:$0xff]  }
 0x111   : > { %2039 = vmatpush2.bf16.msra.mxu1 %v9556_v43  ;;  %2449 = vmatprep.subr.bf16.mxu0 %v9561_v44  ;;  %v9645_v43 = vld [vmem:[%s12160_s3 + $0x1b4] ss:$8 sps:$4 sm:$0xff]   ;;  %v9604_v44 = vld [vmem:[%s12160_s3 + $0x80] ss:$8 sps:$4 sm:$0xff]  }
 0x112   : > { %2490 = vmatprep.subr.bf16.mxu1 %v9609_v54 }
 0x113   : > { %2000 = vmatmul.mubr.bf16.vlgmr.msra.gmra.mxu0 %v10878_v18  ;;  %v9570_v18 = vld [vmem:[%s12160_s3 + $0x44] ss:$8 sps:$4 sm:$0xff]  }
 0x114   : > { %2041 = vmatmul.mubr.bf16.vlgmr.msra.gmra.mxu1 %v10890_v35  ;;  %2450 = vmatpush1.bf16.msra.mxu0 %v9559_v45  ;;  %v9568_v35 = vld [vmem:[%s12160_s3 + $0x40] ss:$8 sps:$4 sm:$0xff]   ;;  %v9643_v45 = vld [vmem:[%s12160_s3 + $0x1b0] ss:$8 sps:$4 sm:$0xff]  }
 0x115   : > { %2451 = vmatprep.subr.bf16.mxu0 %v9564_v48  ;;  %2491 = vmatpush1.bf16.msra.mxu1 %v9607_v53  ;;  %v9648_v48 = vld [vmem:[%s12160_s3 + $0x1a4] ss:$8 sps:$4 sm:$0xff]  }
 0x116   : > { %2492 = vmatprep.subr.bf16.mxu1 %v9612_v58  ;;  %v9649_v58 = vld [vmem:[%s12160_s3 + $0x190] ss:$8 sps:$4 sm:$0xff]  }
 0x118   : > { %2452 = vmatpush1.bf16.msra.mxu0 %v9562_v49 }
 0x119   : > { %2453 = vmatprep.subr.bf16.mxu0 %v9567_v17  ;;  %2493 = vmatpush1.bf16.msra.mxu1 %v9610_v56  ;;  %v9652_v56 = vld [vmem:[%s12160_s3 + $0x180] ss:$8 sps:$4 sm:$0xff]  }
 0x11a   : > { %2494 = vmatprep.subr.bf16.mxu1 %v9615_v57  ;;  %v9654_v57 = vld [vmem:[%s12160_s3 + $0x184] ss:$8 sps:$4 sm:$0xff]  }
 0x11c   : > { %2454 = vmatpush1.bf16.msra.mxu0 %v9565_v51  ;;  %v9646_v51 = vld [vmem:[%s12160_s3 + $0x1a0] ss:$8 sps:$4 sm:$0xff]  }
 0x11d   : > { %2455 = vmatprep.subr.bf16.mxu0 %v9570_v18  ;;  %2495 = vmatpush1.bf16.msra.mxu1 %v9613_v61 }
 0x11e   : > { %2496 = vmatprep.subr.bf16.mxu1 %v9618_v63 }
 0x120   : > { %2456 = vmatpush1.bf16.msra.mxu0 %v9568_v35 }
 0x121   : > { %2457 = vmatprep.subr.bf16.mxu0 %v9573_v52  ;;  %2497 = vmatpush1.bf16.msra.mxu1 %v9616_v1  ;;  %v9651_v52 = vld [vmem:[%s12160_s3 + $0x194] ss:$8 sps:$4 sm:$0xff]  }
 0x122   : > { %2498 = vmatprep.subr.bf16.mxu1 %v9621_v2 }
 0x124   : > { %2458 = vmatpush1.bf16.msra.mxu0 %v9571_v23 }
 0x125   : > { %2459 = vmatprep.subr.bf16.mxu0 %v9576_v55  ;;  %2499 = vmatpush1.bf16.msra.mxu1 %v9619_v7 }
 0x126   : > { %2500 = vmatprep.subr.bf16.mxu1 %v9624_v8 }
 0x128   : > { %2460 = vmatpush1.bf16.msra.mxu0 %v9574_v59  ;;  %v821_v59 = vld [vmem:[%s12159_s2] sm:$0xf] }
 0x129   : > { %2461 = vmatprep.subr.bf16.mxu0 %v9579_v60  ;;  %2501 = vmatpush1.bf16.msra.mxu1 %v9622_v12  ;;  %v1786_v60 = vrot.slane %v821_v59, %v10863_v4  ;;  %v1790_v61 = vrot.slane %v821_v59, %v10845_v46  ;;  %v11931_v46 = vld [vmem:[%s12171_s14 + $0x8] sm:$0xff] }
 0x12a   : > { %2502 = vmatprep.subr.bf16.mxu1 %v9627_v13  ;;  %12239 = vst [vmem:[#allocation36_spill] sm:$0xff] %v11931_v46  ;;  %v11936_v4 = vld [vmem:[%s12171_s14 + $0x108] sm:$0xff] }
 0x12c   : > { %2462 = vmatpush1.bf16.msra.mxu0 %v9577_v62 }
 0x12d   : > { %2463 = vmatprep.subr.bf16.mxu0 %v9582_v0  ;;  %2503 = vmatpush1.bf16.msra.mxu1 %v9625_v16 }
 0x12e   : > { %2504 = vmatprep.subr.bf16.mxu1 %v9630_v19 }
 0x130   : > { %2464 = vmatpush1.bf16.msra.mxu0 %v9580_v3 }
 0x131   : > { %2465 = vmatprep.subr.bf16.mxu0 %v9585_v6  ;;  %2505 = vmatpush1.bf16.msra.mxu1 %v9628_v22 }
 0x132   : > { %2506 = vmatprep.subr.bf16.mxu1 %v9633_v24  ;;  %v1794_v24 = vrot.slane %v821_v59, %v10866_v5  ;;  %v11924_v5 = vld [vmem:[%s12171_s14 + $0x188] sm:$0xff] }
 0x134   : > { %2466 = vmatpush2.bf16.msra.mxu0 %v9583_v10 }
 0x135   : > { %2467 = vmatprep.subr.bf16.mxu0 %v9588_v11  ;;  %2507 = vmatpush2.bf16.msra.mxu1 %v9631_v28 }
 0x136   : > { %2508 = vmatprep.subr.bf16.mxu1 %v9636_v29 }
 0x138   : > { %2468 = vmatpush2.bf16.msra.mxu0 %v9586_v14 }
 0x139   : > { %2469 = vmatprep.subr.bf16.mxu0 %v9591_v15  ;;  %2509 = vmatpush2.bf16.msra.mxu1 %v9634_v32 }
 0x13a   : > { %2510 = vmatprep.subr.bf16.mxu1 %v9639_v33 }
 0x13c   : > { %2470 = vmatpush2.bf16.msra.mxu0 %v9589_v20 }
 0x13d   : > { %2471 = vmatprep.subr.bf16.mxu0 %v9594_v21  ;;  %2511 = vmatpush2.bf16.msra.mxu1 %v9637_v38 }
 0x13e   : > { %2512 = vmatprep.subr.bf16.mxu1 %v9642_v39 }
 0x140   : > { %2472 = vmatpush2.bf16.msra.mxu0 %v9592_v26  ;;  %v1798_v26 = vrot.slane %v821_v59, %v10848_v47  ;;  %v11184_v59 = vld [vmem:[%s12169_s12 + $0x50] sm:$0xff]  ;;  %v11919_v47 = vld [vmem:[%s12171_s14 + $0x88] sm:$0xff] }
 0x141   : > { %2473 = vmatprep.subr.bf16.mxu0 %v9597_v27  ;;  %2513 = vmatpush2.bf16.msra.mxu1 %v9640_v50  ;;  %12238 = vst [vmem:[#allocation35_spill] sm:$0xff] %v11919_v47 }
 0x142   : > { %2514 = vmatprep.subr.bf16.mxu1 %v9645_v43 }
 0x144   : > { %2474 = vmatpush2.bf16.msra.mxu0 %v9595_v30 }
 0x145   : > { %2475 = vmatprep.subr.bf16.mxu0 %v9600_v31  ;;  %2515 = vmatpush2.bf16.msra.mxu1 %v9643_v45 }
 0x146   : > { %2516 = vmatprep.subr.bf16.mxu1 %v9648_v48 }
 0x148   : > { %2476 = vmatpush2.bf16.msra.mxu0 %v9598_v34 }
 0x149   : > { %2477 = vmatprep.subr.bf16.mxu0 %v9603_v37  ;;  %2517 = vmatpush2.bf16.msra.mxu1 %v9646_v51  ;;  %v11120_v51 = vld [vmem:[%s12169_s12 + $0xf8] sm:$0xff] }
 0x14a   : > { %2518 = vmatprep.subr.bf16.mxu1 %v9651_v52  ;;  %v11136_v52 = vld [vmem:[%s12169_s12 + $0x70] sm:$0xff] }
 0x14c   : > { %2478 = vmatpush2.bf16.msra.mxu0 %v9601_v41 }
 0x14d   : > { %2479 = vmatprep.subr.bf16.mxu0 %v9606_v42  ;;  %2519 = vmatpush2.bf16.msra.mxu1 %v9649_v58  ;;  %v11154_v58 = vld [vmem:[%s12169_s12 + $0xe0] sm:$0xff] }
 0x14e   : > { %2520 = vmatprep.subr.bf16.mxu1 %v9654_v57  ;;  %v11178_v57 = vld [vmem:[%s12169_s12 + $0xd0] sm:$0xff] }
 0x150   : > { %2480 = vmatpush2.bf16.msra.mxu0 %v9604_v44 }
 0x151   : > { %2521 = vmatpush2.bf16.msra.mxu1 %v9652_v56  ;;  %8902 = vmatprep.subr.mxu0 %v11120_v51  ;;  %v11172_v56 = vld [vmem:[%s12169_s12 + $0x58] sm:$0xff] }
 0x153   : > { %v1837_v49 = vpop.f32.mrf.mxu0 }
 0x154   : > { %v1878_v17 = vpop.f32.mrf.mxu1  ;;  %v1838_v62 = vadd.f32 %v1837_v49, %v1786_v60  ;;  %v11190_v60 = vld [vmem:[%s12169_s12 + $0xc8] sm:$0xff] }
 0x155   : > { %v1839_v18 = vpop.f32.mrf.mxu0 }
 0x156   : > { %v1880_v35 = vpop.f32.mrf.mxu1  ;;  %v1840_v63 = vadd.f32 %v1839_v18, %v1790_v61  ;;  %v1879_v0 = vadd.f32 %v1878_v17, %v1838_v62  ;;  %v11125_v18 = vld [vmem:[%s12169_s12 + $0x78] sm:$0xff]  ;;  %v11196_v61 = vld [vmem:[%s12169_s12 + $0x48] sm:$0xff]  ;;  %v11202_v62 = vld [vmem:[%s12169_s12 + $0xc0] sm:$0xff] }
 0x157   : > { %v1841_v53 = vpop.f32.mrf.mxu0 }
 0x158   : > { %v1882_v54 = vpop.f32.mrf.mxu1  ;;  %v1881_v3 = vadd.f32 %v1880_v35, %v1840_v63  ;;  %v11130_v35 = vld [vmem:[%s12169_s12 + $0xf0] sm:$0xff]  ;;  %v11142_v53 = vld [vmem:[%s12169_s12 + $0xe8] sm:$0xff]  ;;  %v11208_v63 = vld [vmem:[%s12169_s12 + $0x40] sm:$0xff] }
 0x159   : > { %v1842_v23 = vpop.f32.mrf.mxu0  ;;  %v11148_v54 = vld [vmem:[%s12169_s12 + $0x68] sm:$0xff] }
 0x15a   : > { %v1883_v55 = vpop.f32.mrf.mxu1  ;;  %v11160_v23 = vld [vmem:[%s12169_s12 + $0x60] sm:$0xff] }
 0x15b   : > { %v11166_v55 = vld [vmem:[%s12169_s12 + $0xd8] sm:$0xff] }
 0x193   : > { %v1919_v1 = vpop.f32.mrf.mxu0 }
 0x194   : > { %v1960_v2 = vpop.f32.mrf.mxu1  ;;  %v11095_v6 = vadd.f32 %v1919_v1, %v1879_v0  ;;  %v11214_v0 = vld [vmem:[%s12169_s12 + $0xb8] sm:$0xff] }
 0x195   : > { %v1921_v7 = vpop.f32.mrf.mxu0  ;;  %v1961_v27 = vadd.f32 %v1960_v2, %v1794_v24  ;;  %v11220_v1 = vld [vmem:[%s12169_s12 + $0x38] sm:$0xff]  ;;  %v11226_v2 = vld [vmem:[%s12169_s12 + $0xb0] sm:$0xff] }
 0x196   : > { %12221 = vst [vmem:[#allocation18_spill] sm:$0xff] %v11095_v6  ;;  %v1962_v8 = vpop.f32.mrf.mxu1  ;;  %vm2049_vm0 = vcmp.ge.f32.partialorder %v11095_v6, 0.0  ;;  %v2053_v10 = vmul.f32 0.2, %v11095_v6  ;;  %v11099_v11 = vadd.f32 %v1921_v7, %v1881_v3  ;;  %v11232_v3 = vld [vmem:[%s12169_s12 + $0x30] sm:$0xff]  ;;  %v11238_v7 = vld [vmem:[%s12169_s12 + $0xa8] sm:$0xff] }
 0x197   : > { %v1923_v12 = vpop.f32.mrf.mxu0  ;;  %v1963_v30 = vadd.f32 %v1962_v8, %v1798_v26  ;;  %v11244_v8 = vld [vmem:[%s12169_s12 + $0x28] sm:$0xff]  ;;  %v11312_v24 = vld [vmem:[%s12170_s13 + $0x18] sm:$0xff]  ;;  %v11317_v26 = vld [vmem:[%s12170_s13 + $0x10] sm:$0xff] }
 0x198   : > { %12222 = vst [vmem:[#allocation19_spill] sm:$0xff] %v11099_v11  ;;  %v1964_v13 = vpop.f32.mrf.mxu1  ;;  %v2054_v14 = vmul.f32 0.2, %v11099_v11  ;;  %vm2050_vm1 = vcmp.ge.f32.partialorder %v11099_v11, 0.0  ;;  %v2057_v19 = vsel %vm2049_vm0, %v11095_v6, %v2053_v10  ;;  %v11250_v10 = vld [vmem:[%s12169_s12 + $0xa0] sm:$0xff]  ;;  %2669 = vmatprep.subr.mxu1 %v11312_v24 }
 0x199   : > { %v1924_v15 = vpop.f32.mrf.mxu0  ;;  %v2061_v22 = vpack.c.bf16 %v2057_v19, %v2057_v19  ;;  %v11256_v12 = vld [vmem:[%s12169_s12 + $0x20] sm:$0xff]  ;;  %v11262_v13 = vld [vmem:[%s12169_s12 + $0x98] sm:$0xff]  ;;  %v11288_v19 = vld [vmem:[%s12169_s12 + $0x88] sm:$0xff] }
 0x19a   : > { %v1965_v16 = vpop.f32.mrf.mxu1  ;;  %v2058_v20 = vsel %vm2050_vm1, %v11099_v11, %v2054_v14  ;;  %v11268_v14 = vld [vmem:[%s12169_s12 + $0x18] sm:$0xff]  ;;  %v11276_v15 = vld [vmem:[%s12169_s12 + $0x90] sm:$0xff]  ;;  %v4462_v6 = vld [vmem:[%s12171_s14 + $0x180] sm:$0xff] }
 0x19b   : > { %v2062_v21 = vpack.c.bf16 %v2058_v20, %v2058_v20  ;;  %v11282_v16 = vld [vmem:[%s12169_s12 + $0x10] sm:$0xff]  ;;  %v11294_v20 = vld [vmem:[%s12169_s12 + $0x8] sm:$0xff]  ;;  %v4446_v11 = vld [vmem:[%s12171_s14 + $0x100] sm:$0xff] }
 0x19d   : > { %2481 = vmatprep.mubr.bf16.mxu0 %v2062_v21  ;;  %v11300_v21 = vld [vmem:[%s12169_s12 + $0x80] sm:$0xff] }
 0x19e   : > { %2482 = vmatmul.mubr.bf16.vlgmr.msra.gmra.mxu0 %v2061_v22  ;;  %v11306_v22 = vld [vmem:[%s12169_s12] sm:$0xff] }
 0x19f   : > { %8903 = vmatpush3.msra.mxu0 %v11125_v18 }
 0x1a0   : > { %8904 = vmatprep.subr.mxu0 %v11130_v35 }
 0x1a1   : > { %8905 = vmatpush3.msra.mxu0 %v11136_v52 }
 0x1a2   : > { %8906 = vmatprep.subr.mxu0 %v11142_v53 }
 0x1a3   : > { %8907 = vmatpush3.msra.mxu0 %v11148_v54 }
 0x1a4   : > { %8908 = vmatprep.subr.mxu0 %v11154_v58 }
 0x1a5   : > { %8909 = vmatpush3.msra.mxu0 %v11160_v23 }
 0x1a6   : > { %8910 = vmatprep.subr.mxu0 %v11166_v55 }
 0x1a7   : > { %8911 = vmatpush3.msra.mxu0 %v11172_v56 }
 0x1a8   : > { %8912 = vmatprep.subr.mxu0 %v11178_v57 }
 0x1a9   : > { %8913 = vmatpush3.msra.mxu0 %v11184_v59 }
 0x1aa   : > { %8914 = vmatprep.subr.mxu0 %v11190_v60 }
 0x1ab   : > { %8915 = vmatpush3.msra.mxu0 %v11196_v61 }
 0x1ac   : > { %8916 = vmatprep.subr.mxu0 %v11202_v62 }
 0x1ad   : > { %8917 = vmatpush3.msra.mxu0 %v11208_v63 }
 0x1ae   : > { %8918 = vmatprep.subr.mxu0 %v11214_v0 }
 0x1af   : > { %8919 = vmatpush3.msra.mxu0 %v11220_v1 }
 0x1b0   : > { %8920 = vmatprep.subr.mxu0 %v11226_v2 }
 0x1b1   : > { %8921 = vmatpush3.msra.mxu0 %v11232_v3 }
 0x1b2   : > { %8922 = vmatprep.subr.mxu0 %v11238_v7 }
 0x1b3   : > { %8923 = vmatpush3.msra.mxu0 %v11244_v8 }
 0x1b4   : > { %8924 = vmatprep.subr.mxu0 %v11250_v10 }
 0x1b5   : > { %8925 = vmatpush3.msra.mxu0 %v11256_v12 }
 0x1b6   : > { %8926 = vmatprep.subr.mxu0 %v11262_v13 }
 0x1b7   : > { %8927 = vmatpush3.msra.mxu0 %v11268_v14 }
 0x1b8   : > { %8928 = vmatprep.subr.mxu0 %v11276_v15 }
 0x1b9   : > { %8929 = vmatpush3.msra.mxu0 %v11282_v16 }
 0x1ba   : > { %8930 = vmatprep.subr.mxu0 %v11288_v19 }
 0x1bb   : > { %8931 = vmatpush3.msra.mxu0 %v11294_v20 }
 0x1bc   : > { %8932 = vmatprep.subr.mxu0 %v11300_v21 }
 0x1bd   : > { %8933 = vmatpush3.msra.mxu0 %v11306_v22 }
 0x1be   : > { %2818 = vmatprep.subr.mxu0 %v11312_v24 }
 0x1d3   : > { %v2001_v28 = vpop.f32.mrf.mxu0 }
 0x1d4   : > { %v2042_v29 = vpop.f32.mrf.mxu1  ;;  %v2002_v31 = vadd.f32 %v2001_v28, %v1961_v27 }
 0x1d5   : > { %v2003_v32 = vpop.f32.mrf.mxu0 }
 0x1d6   : > { %v2044_v33 = vpop.f32.mrf.mxu1  ;;  %v11107_v34 = vadd.f32 %v2042_v29, %v2002_v31  ;;  %v2004_v37 = vadd.f32 %v2003_v32, %v1963_v30 }
 0x1d7   : > { %v2005_v38 = vpop.f32.mrf.mxu0 }
 0x1d8   : > { %12223 = vst [vmem:[#allocation20_spill] sm:$0xff] %v11107_v34  ;;  %v2046_v39 = vpop.f32.mrf.mxu1  ;;  %vm2051_vm2 = vcmp.ge.f32.partialorder %v11107_v34, 0.0  ;;  %v2055_v41 = vmul.f32 0.2, %v11107_v34  ;;  %v11111_v42 = vadd.f32 %v2044_v33, %v2004_v37 }
 0x1d9   : > { %v2006_v50 = vpop.f32.mrf.mxu0 }
 0x1da   : > { %12224 = vst [vmem:[#allocation21_spill] sm:$0xff] %v11111_v42  ;;  %v2047_v43 = vpop.f32.mrf.mxu1  ;;  %v2056_v44 = vmul.f32 0.2, %v11111_v42  ;;  %vm2052_vm3 = vcmp.ge.f32.partialorder %v11111_v42, 0.0  ;;  %v2059_v45 = vsel %vm2051_vm2, %v11107_v34, %v2055_v41  ;;  %v11326_v41 = vld [vmem:[%s12170_s13 + $0x8] sm:$0xff]  ;;  %v11331_v50 = vld [vmem:[%s12170_s13] sm:$0xff] }
 0x1db   : > { %v2063_v17 = vpack.c.bf16 %v2059_v45, %v2059_v45  ;;  %v12179_v43 = vmov 0.0   ;;  %v11943_v34 = vld [vmem:[%s12171_s14 + $0x80] sm:$0xff] }
 0x1dc   : > { %v2060_v48 = vsel %vm2052_vm3, %v11111_v42, %v2056_v44  ;;  %12240 = vst [vmem:[#allocation37_spill] sm:$0xff] %v11943_v34  ;;  %v11952_v42 = vld [vmem:[%s12171_s14] sm:$0xff] }
 0x1dd   : > { %v2064_v49 = vpack.c.bf16 %v2060_v48, %v2060_v48  ;;  %12241 = vst [vmem:[#allocation38_spill] sm:$0xff] %v11952_v42 }
 0x1df   : > { %2522 = vmatprep.mubr.bf16.mxu1 %v2064_v49 }
 0x1e0   : > { %2523 = vmatmul.mubr.bf16.vlgmr.msra.gmra.mxu1 %v2063_v17 }
 0x1e1   : > { %2670 = vmatpush1.msra.mxu1 %v11317_v26  ;;  %2705 = vmatprep.mubr.f32.mxu1 %v12179_v43 }
 0x1e2   : > { %2671 = vmatprep.subr.mxu1 %v11326_v41 }
 0x1e3   : > { %2672 = vmatpush1.msra.mxu1 %v11331_v50 }
 0x1e4   : > { %8937 = vmatprep.subr.mxu1 %v11120_v51 }
 0x25e   : > { %v2483_v27 = vpop.f32.mrf.mxu0 }
 0x260   : > { %v2485_v28 = vpop.f32.mrf.mxu0 }
 0x262   : > { %v2487_v29 = vpop.f32.mrf.mxu0 }
 0x264   : > { %v2488_v30 = vpop.f32.mrf.mxu0 }
 0x2a0   : > { %v2524_v31 = vpop.f32.mrf.mxu1 }
 0x2a1   : > { %v2525_v37 = vadd.f32 %v2524_v31, %v2483_v27  ;;  %v9655_v31 = vld [vmem:[%s12161_s4 + $0x78] sm:$0xff]  }
 0x2a2   : > { %v2526_v32 = vpop.f32.mrf.mxu1 }
 0x2a3   : > { %v2527_v33 = vadd.f32 %v2526_v32, %v2485_v28 }
 0x2a4   : > { %v2528_v38 = vpop.f32.mrf.mxu1 }
 0x2a5   : > { %2631 = vmatprep.mubr.f32.mxu0 %v2527_v33 }
 0x2a6   : > { %v2529_v39 = vpop.f32.mrf.mxu1  ;;  %2632 = vmatmul.mubr.f32.vlgmr.msra.gmra.mxu0 %v2525_v37 }
 0x2a7   : > { %2819 = vmatpush1.msra.mxu0 %v11317_v26  ;;  %2854 = vmatprep.mubr.f32.mxu0 %v12179_v43 }
 0x2a8   : > { %2820 = vmatprep.subr.mxu0 %v11326_v41 }
 0x2a9   : > { %2821 = vmatpush1.msra.mxu0 %v11331_v50 }
 0x2aa   : > { %8972 = vmatprep.subr.bf16.mxu0 %v9655_v31  ;;  %v9663_v31 = vld [vmem:[%s12161_s4 + $0x58] sm:$0xff]  }
 0x366   : > { %v8934_v44 = vpop.f32.mrf.mxu0 }
 0x368   : > { %v8935_v45 = vpop.f32.mrf.mxu0 }
 0x369   : > { %v8936_v48 = vadd.f32 %v8935_v45, %v8934_v44  ;;  %v9657_v44 = vld [vmem:[%s12161_s4 + $0x70] sm:$0xff]  }
 0x36b   : > { %8348 = vmatmul.mubr.msk.f32.vlgmr.msra.gmra.mxu1 %vm2637_vm4, %v8936_v48  ;;  %v9658_v48 = vld [vmem:[%s12161_s4 + $0x30] sm:$0xff]  }
 0x36c   : > { %8938 = vmatpush3.msra.mxu1 %v11125_v18 }
 0x36d   : > { %8939 = vmatprep.subr.mxu1 %v11130_v35 }
 0x36e   : > { %8940 = vmatpush3.msra.mxu1 %v11136_v52 }
 0x36f   : > { %8941 = vmatprep.subr.mxu1 %v11142_v53 }
 0x370   : > { %8942 = vmatpush3.msra.mxu1 %v11148_v54 }
 0x371   : > { %8943 = vmatprep.subr.mxu1 %v11154_v58 }
 0x372   : > { %8944 = vmatpush3.msra.mxu1 %v11160_v23 }
 0x373   : > { %8945 = vmatprep.subr.mxu1 %v11166_v55 }
 0x374   : > { %8946 = vmatpush3.msra.mxu1 %v11172_v56 }
 0x375   : > { %8947 = vmatprep.subr.mxu1 %v11178_v57 }
 0x376   : > { %8948 = vmatpush3.msra.mxu1 %v11184_v59 }
 0x377   : > { %8949 = vmatprep.subr.mxu1 %v11190_v60 }
 0x378   : > { %8950 = vmatpush3.msra.mxu1 %v11196_v61 }
 0x379   : > { %8951 = vmatprep.subr.mxu1 %v11202_v62 }
 0x37a   : > { %8952 = vmatpush3.msra.mxu1 %v11208_v63 }
 0x37b   : > { %8953 = vmatprep.subr.mxu1 %v11214_v0 }
 0x37c   : > { %8954 = vmatpush3.msra.mxu1 %v11220_v1 }
 0x37d   : > { %8955 = vmatprep.subr.mxu1 %v11226_v2 }
 0x37e   : > { %8956 = vmatpush3.msra.mxu1 %v11232_v3 }
 0x37f   : > { %8957 = vmatprep.subr.mxu1 %v11238_v7 }
 0x380   : > { %8958 = vmatpush3.msra.mxu1 %v11244_v8 }
 0x381   : > { %8959 = vmatprep.subr.mxu1 %v11250_v10 }
 0x382   : > { %8960 = vmatpush3.msra.mxu1 %v11256_v12 }
 0x383   : > { %8961 = vmatprep.subr.mxu1 %v11262_v13 }
 0x384   : > { %8962 = vmatpush3.msra.mxu1 %v11268_v14 }
 0x385   : > { %8963 = vmatprep.subr.mxu1 %v11276_v15 }
 0x386   : > { %8964 = vmatpush3.msra.mxu1 %v11282_v16 }
 0x387   : > { %8965 = vmatprep.subr.mxu1 %v11288_v19 }
 0x388   : > { %8966 = vmatpush3.msra.mxu1 %v11294_v20 }
 0x389   : > { %8967 = vmatprep.subr.mxu1 %v11300_v21 }
 0x38a   : > { %8968 = vmatpush3.msra.mxu1 %v11306_v22 }
 0x42b   : > { %v2707_v49 = vpop.f32.mrf.mxu1 }
 0x42c   : > { %v11372_v17 = vsub.f32 %v2525_v37, %v2707_v49  ;;  %v9659_v49 = vld [vmem:[%s12161_s4 + $0x68] sm:$0xff]  }
 0x42d   : > { %v2709_v27 = vpop.f32.mrf.mxu1 }
 0x42e   : > { %v11374_v28 = vsub.f32 %v2527_v33, %v2709_v27  ;;  %v2714_v30 = vmul.f32 %v11372_v17, %v11372_v17  ;;  %v9656_v33 = vld [vmem:[%s12161_s4 + $0x38] sm:$0xff]   ;;  %v9660_v27 = vld [vmem:[%s12161_s4 + $0x28] sm:$0xff]  }
 0x430   : > { %v2715_v29 = vmul.f32 %v11374_v28, %v11374_v28 }
 0x432   : > { %2780 = vmatprep.mubr.f32.mxu1 %v2715_v29  ;;  %v9661_v29 = vld [vmem:[%s12161_s4 + $0x60] sm:$0xff]  }
 0x433   : > { %2781 = vmatmul.mubr.f32.vlgmr.msra.gmra.mxu1 %v2714_v30  ;;  %v9662_v30 = vld [vmem:[%s12161_s4 + $0x20] sm:$0xff]  }
 0x4f3   : > { %v8969_v32 = vpop.f32.mrf.mxu1 }
 0x4f5   : > { %v8970_v38 = vpop.f32.mrf.mxu1 }
 0x4f6   : > { %v8971_v37 = vadd.f32 %v8970_v38, %v8969_v32  ;;  %v9664_v32 = vld [vmem:[%s12161_s4 + $0x18] sm:$0xff]   ;;  %v9665_v38 = vld [vmem:[%s12161_s4 + $0x50] sm:$0xff]  }
 0x4f8   : > { %v2783_v39 = vadd.f32 1e-05, %v8971_v37  ;;  %v9666_v37 = vld [vmem:[%s12161_s4 + $0x10] sm:$0xff]  }
 0x4fa   : > { %10463 = vrsqrt.f32 %v2783_v39  ;;  %v9667_v39 = vld [vmem:[%s12161_s4 + $0x48] sm:$0xff]  }
 0x507   : > { %v10464_v45 = vpop.eup %10463 }
 0x508   : > { %8349 = vmatmul.mubr.msk.f32.vlgmr.msra.gmra.mxu0 %vm2637_vm4, %v10464_v45  ;;  %v9670_v45 = vld [vmem:[%s12161_s4] sm:$0xff]  }
 0x509   : > { %8973 = vmatpush3.bf16.msra.mxu0 %v9656_v33  ;;  %v9668_v33 = vld [vmem:[%s12161_s4 + $0x8] sm:$0xff]  }
 0x50a   : > { %8974 = vmatprep.subr.bf16.mxu0 %v9657_v44  ;;  %v9669_v44 = vld [vmem:[%s12161_s4 + $0x40] sm:$0xff]  }
 0x50d   : > { %8975 = vmatpush3.bf16.msra.mxu0 %v9658_v48  ;;  %v9671_v48 = vld [vmem:[%s12163_s6 + $0x70] ss:$8 sps:$4 sm:$0xff]  }
 0x50e   : > { %8976 = vmatprep.subr.bf16.mxu0 %v9659_v49  ;;  %v9673_v49 = vld [vmem:[%s12163_s6 + $0x74] ss:$8 sps:$4 sm:$0xff]  }
 0x50f   : > { %3138 = vmatprep.subr.bf16.mxu1 %v9673_v49 }
 0x510   : > { %3139 = vmatpush1.bf16.msra.mxu1 %v9671_v48 }
 0x511   : > { %8977 = vmatpush3.bf16.msra.mxu0 %v9660_v27  ;;  %v9676_v27 = vld [vmem:[%s12163_s6 + $0x64] ss:$8 sps:$4 sm:$0xff]  }
 0x512   : > { %8978 = vmatprep.subr.bf16.mxu0 %v9661_v29  ;;  %v9674_v29 = vld [vmem:[%s12163_s6 + $0x60] ss:$8 sps:$4 sm:$0xff]   ;;  %3140 = vmatprep.subr.bf16.mxu1 %v9676_v27 }
 0x514   : > { %3141 = vmatpush1.bf16.msra.mxu1 %v9674_v29 }
 0x515   : > { %8979 = vmatpush3.bf16.msra.mxu0 %v9662_v30  ;;  %v9679_v30 = vld [vmem:[%s12163_s6 + $0x54] ss:$8 sps:$4 sm:$0xff]  }
 0x516   : > { %8980 = vmatprep.subr.bf16.mxu0 %v9663_v31  ;;  %v9677_v31 = vld [vmem:[%s12163_s6 + $0x50] ss:$8 sps:$4 sm:$0xff]   ;;  %3142 = vmatprep.subr.bf16.mxu1 %v9679_v30 }
 0x518   : > { %3143 = vmatpush1.bf16.msra.mxu1 %v9677_v31 }
 0x519   : > { %8981 = vmatpush3.bf16.msra.mxu0 %v9664_v32  ;;  %v9682_v32 = vld [vmem:[%s12163_s6 + $0x44] ss:$8 sps:$4 sm:$0xff]  }
 0x51a   : > { %8982 = vmatprep.subr.bf16.mxu0 %v9665_v38  ;;  %v9680_v38 = vld [vmem:[%s12163_s6 + $0x40] ss:$8 sps:$4 sm:$0xff]   ;;  %3144 = vmatprep.subr.bf16.mxu1 %v9682_v32 }
 0x51c   : > { %3145 = vmatpush1.bf16.msra.mxu1 %v9680_v38 }
 0x51d   : > { %8983 = vmatpush3.bf16.msra.mxu0 %v9666_v37  ;;  %v9685_v37 = vld [vmem:[%s12163_s6 + $0x34] ss:$8 sps:$4 sm:$0xff]  }
 0x51e   : > { %8984 = vmatprep.subr.bf16.mxu0 %v9667_v39  ;;  %v9683_v39 = vld [vmem:[%s12163_s6 + $0x30] ss:$8 sps:$4 sm:$0xff]   ;;  %3146 = vmatprep.subr.bf16.mxu1 %v9685_v37 }
 0x520   : > { %3147 = vmatpush1.bf16.msra.mxu1 %v9683_v39  ;;  %v9694_v39 = vld [vmem:[%s12163_s6 + $0x4] ss:$8 sps:$4 sm:$0xff]  }
 0x521   : > { %8985 = vmatpush3.bf16.msra.mxu0 %v9668_v33  ;;  %v9688_v33 = vld [vmem:[%s12163_s6 + $0x24] ss:$8 sps:$4 sm:$0xff]  }
 0x522   : > { %8986 = vmatprep.subr.bf16.mxu0 %v9669_v44  ;;  %v9686_v44 = vld [vmem:[%s12163_s6 + $0x20] ss:$8 sps:$4 sm:$0xff]   ;;  %3148 = vmatprep.subr.bf16.mxu1 %v9688_v33 }
 0x523   : > { %v9692_v33 = vld [vmem:[%s12163_s6] ss:$8 sps:$4 sm:$0xff]  }
 0x524   : > { %3149 = vmatpush1.bf16.msra.mxu1 %v9686_v44  ;;  %v10641_v44 = vmov 0  }
 0x525   : > { %8987 = vmatpush3.bf16.msra.mxu0 %v9670_v45  ;;  %3170 = vmatprep.mubr.bf16.mxu1 %v10641_v44 }
 0x526   : > { %8994 = vmatprep.subr.mxu0 %v11120_v51 }
 0x5c8   : > { %v2856_v45 = vpop.f32.mrf.mxu0 }
 0x5c9   : > { %v11467_v48 = vmul.f32 %v2856_v45, %v11372_v17  ;;  %v9691_v17 = vld [vmem:[%s12163_s6 + $0x14] ss:$8 sps:$4 sm:$0xff]  }
 0x5ca   : > { %v2858_v49 = vpop.f32.mrf.mxu0  ;;  %3150 = vmatprep.subr.bf16.mxu1 %v9691_v17 }
 0x5cb   : > { %vm2863_vm5 = vcmp.ge.f32.partialorder %v11467_v48, 0.0  ;;  %v2865_v27 = vmul.f32 0.2, %v11467_v48  ;;  %v11472_v29 = vmul.f32 %v2858_v49, %v11374_v28  ;;  %v9689_v28 = vld [vmem:[%s12163_s6 + $0x10] ss:$8 sps:$4 sm:$0xff]  }
 0x5cc   : > { %3151 = vmatpush1.bf16.msra.mxu1 %v9689_v28  ;;  %v2903_v49 = vld [vmem:[%s12162_s5] sm:$0x1] }
 0x5cd   : > { %v2866_v30 = vmul.f32 0.2, %v11472_v29  ;;  %vm2864_vm6 = vcmp.ge.f32.partialorder %v11472_v29, 0.0  ;;  %v2867_v31 = vsel %vm2863_vm5, %v11467_v48, %v2865_v27  ;;  %3152 = vmatprep.subr.bf16.mxu1 %v9694_v39 }
 0x5ce   : > { %v2869_v37 = vpack.c.bf16 %v2867_v31, %v2867_v31 }
 0x5cf   : > { %v2868_v32 = vsel %vm2864_vm6, %v11472_v29, %v2866_v30 }
 0x5d0   : > { %v2870_v38 = vpack.c.bf16 %v2868_v32, %v2868_v32  ;;  %3153 = vmatpush1.bf16.msra.mxu1 %v9692_v33 }
 0x5d1   : > { %3280 = vmatprep.subr.mxu1 %v11312_v24 }
 0x5d2   : > { %3032 = vmatprep.mubr.bf16.mxu0 %v2870_v38 }
 0x5d3   : > { %3033 = vmatmul.mubr.bf16.vlgmr.msra.gmra.mxu0 %v2869_v37 }
 0x5d4   : > { %8995 = vmatpush3.msra.mxu0 %v11125_v18 }
 0x5d5   : > { %8996 = vmatprep.subr.mxu0 %v11130_v35 }
 0x5d6   : > { %8997 = vmatpush3.msra.mxu0 %v11136_v52 }
 0x5d7   : > { %8998 = vmatprep.subr.mxu0 %v11142_v53 }
 0x5d8   : > { %8999 = vmatpush3.msra.mxu0 %v11148_v54 }
 0x5d9   : > { %9000 = vmatprep.subr.mxu0 %v11154_v58 }
 0x5da   : > { %9001 = vmatpush3.msra.mxu0 %v11160_v23 }
 0x5db   : > { %9002 = vmatprep.subr.mxu0 %v11166_v55 }
 0x5dc   : > { %9003 = vmatpush3.msra.mxu0 %v11172_v56 }
 0x5dd   : > { %9004 = vmatprep.subr.mxu0 %v11178_v57 }
 0x5de   : > { %9005 = vmatpush3.msra.mxu0 %v11184_v59 }
 0x5df   : > { %9006 = vmatprep.subr.mxu0 %v11190_v60 }
 0x5e0   : > { %9007 = vmatpush3.msra.mxu0 %v11196_v61 }
 0x5e1   : > { %9008 = vmatprep.subr.mxu0 %v11202_v62 }
 0x5e2   : > { %9009 = vmatpush3.msra.mxu0 %v11208_v63 }
 0x5e3   : > { %9010 = vmatprep.subr.mxu0 %v11214_v0 }
 0x5e4   : > { %9011 = vmatpush3.msra.mxu0 %v11220_v1 }
 0x5e5   : > { %9012 = vmatprep.subr.mxu0 %v11226_v2 }
 0x5e6   : > { %9013 = vmatpush3.msra.mxu0 %v11232_v3 }
 0x5e7   : > { %9014 = vmatprep.subr.mxu0 %v11238_v7 }
 0x5e8   : > { %9015 = vmatpush3.msra.mxu0 %v11244_v8 }
 0x5e9   : > { %9016 = vmatprep.subr.mxu0 %v11250_v10 }
 0x5ea   : > { %9017 = vmatpush3.msra.mxu0 %v11256_v12 }
 0x5eb   : > { %9018 = vmatprep.subr.mxu0 %v11262_v13 }
 0x5ec   : > { %9019 = vmatpush3.msra.mxu0 %v11268_v14 }
 0x5ed   : > { %9020 = vmatprep.subr.mxu0 %v11276_v15 }
 0x5ee   : > { %9021 = vmatpush3.msra.mxu0 %v11282_v16 }
 0x5ef   : > { %9022 = vmatprep.subr.mxu0 %v11288_v19 }
 0x5f0   : > { %9023 = vmatpush3.msra.mxu0 %v11294_v20 }
 0x5f1   : > { %9024 = vmatprep.subr.mxu0 %v11300_v21 }
 0x5f2   : > { %9025 = vmatpush3.msra.mxu0 %v11306_v22 }
 0x5f3   : > { %3429 = vmatprep.subr.mxu0 %v11312_v24 }
 0x693   : > { %v8988_v45 = vpop.f32.mrf.mxu0 }
 0x695   : > { %v8989_v27 = vpop.f32.mrf.mxu0 }
 0x696   : > { %v8990_v30 = vadd.f32 %v8989_v27, %v8988_v45 }
 0x697   : > { %v8991_v31 = vpop.f32.mrf.mxu0 }
 0x698   : > { %v3035_v32 = vadd.f32 %v8990_v30, %v2903_v49 }
 0x699   : > { %v8992_v38 = vpop.f32.mrf.mxu0 }
 0x69a   : > { %v3040_v37 = vmax.f32 %v3035_v32, 0.0  ;;  %v9695_v38 = vld [vmem:[#allocation6 + $0xe0] ss:$16 sps:$4 sm:$0xff]  }
 0x69c   : > { %v3041_v17 = vpack.c.bf16 %v3040_v37, %v3040_v37  ;;  %v9703_v37 = vld [vmem:[#allocation6 + $0xc4] ss:$16 sps:$4 sm:$0xff]  }
 0x69e   : > { %3171 = vmatmul.mubr.bf16.vlgmr.msra.gmra.mxu1 %v3041_v17 }
 0x69f   : > { %3281 = vmatpush1.msra.mxu1 %v11317_v26  ;;  %3316 = vmatprep.mubr.f32.mxu1 %v12179_v43 }
 0x6a0   : > { %3282 = vmatprep.subr.mxu1 %v11326_v41 }
 0x6a1   : > { %3283 = vmatpush1.msra.mxu1 %v11331_v50 }
 0x6a2   : > { %9029 = vmatprep.subr.mxu1 %v11120_v51 }
 0x75e   : > { %v3172_v24 = vpop.f32.mrf.mxu1 }
 0x760   : > { %v3174_v28 = vpop.f32.mrf.mxu1 }
 0x761   : > { %3243 = vmatprep.mubr.f32.mxu0 %v3174_v28 }
 0x762   : > { %v3176_v39 = vpop.f32.mrf.mxu1  ;;  %3244 = vmatmul.mubr.f32.vlgmr.msra.gmra.mxu0 %v3172_v24 }
 0x763   : > { %3430 = vmatpush1.msra.mxu0 %v11317_v26  ;;  %3465 = vmatprep.mubr.f32.mxu0 %v12179_v43  ;;  %v9770_v26 = vld [vmem:[#allocation6 + $0x168] ss:$16 sps:$4 sm:$0xff]   ;;  %v9707_v39 = vld [vmem:[#allocation6 + $0xa0] ss:$16 sps:$4 sm:$0xff]  }
 0x764   : > { %v3177_v33 = vpop.f32.mrf.mxu1  ;;  %3431 = vmatprep.subr.mxu0 %v11326_v41  ;;  %v9778_v41 = vld [vmem:[#allocation6 + $0x14c] ss:$16 sps:$4 sm:$0xff]   ;;  %v11907_v43 = vld [vmem:[%s12171_s14 + $0x10] sm:$0xff] }
 0x765   : > { %3432 = vmatpush1.msra.mxu0 %v11331_v50  ;;  %v9776_v50 = vld [vmem:[#allocation6 + $0x148] ss:$16 sps:$4 sm:$0xff]   ;;  %v9715_v33 = vld [vmem:[#allocation6 + $0x84] ss:$16 sps:$4 sm:$0xff]   ;;  %12237 = vst [vmem:[#allocation34_spill] sm:$0xff] %v11907_v43 }
 0x822   : > { %v9026_v44 = vpop.f32.mrf.mxu0 }
 0x824   : > { %v9027_v45 = vpop.f32.mrf.mxu0 }
 0x825   : > { %v9028_v49 = vadd.f32 %v9027_v45, %v9026_v44  ;;  %v9713_v44 = vld [vmem:[#allocation6 + $0x80] ss:$16 sps:$4 sm:$0xff]   ;;  %v9721_v45 = vld [vmem:[#allocation6 + $0x64] ss:$16 sps:$4 sm:$0xff]  }
 0x827   : > { %8382 = vmatmul.mubr.msk.f32.vlgmr.msra.gmra.mxu1 %vm2637_vm4, %v9028_v49  ;;  %v9719_v49 = vld [vmem:[#allocation6 + $0x60] ss:$16 sps:$4 sm:$0xff]  }
 0x828   : > { %9030 = vmatpush3.msra.mxu1 %v11125_v18 }
 0x829   : > { %9031 = vmatprep.subr.mxu1 %v11130_v35 }
 0x82a   : > { %9032 = vmatpush3.msra.mxu1 %v11136_v52 }
 0x82b   : > { %9033 = vmatprep.subr.mxu1 %v11142_v53 }
 0x82c   : > { %9034 = vmatpush3.msra.mxu1 %v11148_v54 }
 0x82d   : > { %9035 = vmatprep.subr.mxu1 %v11154_v58  ;;  %v9697_v58 = vld [vmem:[#allocation6 + $0xe4] ss:$16 sps:$4 sm:$0xff]  }
 0x82e   : > { %9036 = vmatpush3.msra.mxu1 %v11160_v23  ;;  %v9698_v23 = vld [vmem:[#allocation6 + $0xe8] ss:$16 sps:$4 sm:$0xff]   ;;  %3930 = vmatprep.subr.bf16.mxu0 %v9697_v58  ;;  %v9739_v58 = vld [vmem:[#allocation6 + $0x4] ss:$16 sps:$4 sm:$0xff]  }
 0x82f   : > { %9037 = vmatprep.subr.mxu1 %v11166_v55  ;;  %v9700_v55 = vld [vmem:[#allocation6 + $0xec] ss:$16 sps:$4 sm:$0xff]  }
 0x830   : > { %9038 = vmatpush3.msra.mxu1 %v11172_v56  ;;  %v9706_v56 = vld [vmem:[#allocation6 + $0xcc] ss:$16 sps:$4 sm:$0xff]  }
 0x831   : > { %9039 = vmatprep.subr.mxu1 %v11178_v57  ;;  %v9704_v57 = vld [vmem:[#allocation6 + $0xc8] ss:$16 sps:$4 sm:$0xff]  }
 0x832   : > { %9040 = vmatpush3.msra.mxu1 %v11184_v59  ;;  %v9712_v59 = vld [vmem:[#allocation6 + $0xac] ss:$16 sps:$4 sm:$0xff]  }
 0x833   : > { %9041 = vmatprep.subr.mxu1 %v11190_v60  ;;  %v9710_v60 = vld [vmem:[#allocation6 + $0xa8] ss:$16 sps:$4 sm:$0xff]  }
 0x834   : > { %9042 = vmatpush3.msra.mxu1 %v11196_v61  ;;  %v9718_v61 = vld [vmem:[#allocation6 + $0x8c] ss:$16 sps:$4 sm:$0xff]  }
 0x835   : > { %9043 = vmatprep.subr.mxu1 %v11202_v62  ;;  %v9716_v62 = vld [vmem:[#allocation6 + $0x88] ss:$16 sps:$4 sm:$0xff]  }
 0x836   : > { %9044 = vmatpush3.msra.mxu1 %v11208_v63  ;;  %v9724_v63 = vld [vmem:[#allocation6 + $0x6c] ss:$16 sps:$4 sm:$0xff]  }
 0x837   : > { %9045 = vmatprep.subr.mxu1 %v11214_v0  ;;  %v9722_v0 = vld [vmem:[#allocation6 + $0x68] ss:$16 sps:$4 sm:$0xff]  }
 0x838   : > { %9046 = vmatpush3.msra.mxu1 %v11220_v1  ;;  %v9730_v1 = vld [vmem:[#allocation6 + $0x4c] ss:$16 sps:$4 sm:$0xff]  }
 0x839   : > { %9047 = vmatprep.subr.mxu1 %v11226_v2  ;;  %v9728_v2 = vld [vmem:[#allocation6 + $0x48] ss:$16 sps:$4 sm:$0xff]  }
 0x83a   : > { %9048 = vmatpush3.msra.mxu1 %v11232_v3  ;;  %v9736_v3 = vld [vmem:[#allocation6 + $0x2c] ss:$16 sps:$4 sm:$0xff]  }
 0x83b   : > { %9049 = vmatprep.subr.mxu1 %v11238_v7  ;;  %v9734_v7 = vld [vmem:[#allocation6 + $0x28] ss:$16 sps:$4 sm:$0xff]  }
 0x83c   : > { %9050 = vmatpush3.msra.mxu1 %v11244_v8  ;;  %v9742_v8 = vld [vmem:[#allocation6 + $0xc] ss:$16 sps:$4 sm:$0xff]  }
 0x83d   : > { %9051 = vmatprep.subr.mxu1 %v11250_v10  ;;  %v9740_v10 = vld [vmem:[#allocation6 + $0x8] ss:$16 sps:$4 sm:$0xff]  }
 0x83e   : > { %9052 = vmatpush3.msra.mxu1 %v11256_v12  ;;  %v9748_v12 = vld [vmem:[#allocation6 + $0x1ec] ss:$16 sps:$4 sm:$0xff]  }
 0x83f   : > { %9053 = vmatprep.subr.mxu1 %v11262_v13  ;;  %v9746_v13 = vld [vmem:[#allocation6 + $0x1e8] ss:$16 sps:$4 sm:$0xff]  }
 0x840   : > { %9054 = vmatpush3.msra.mxu1 %v11268_v14  ;;  %v9754_v14 = vld [vmem:[#allocation6 + $0x1cc] ss:$16 sps:$4 sm:$0xff]  }
 0x841   : > { %9055 = vmatprep.subr.mxu1 %v11276_v15  ;;  %v9752_v15 = vld [vmem:[#allocation6 + $0x1c8] ss:$16 sps:$4 sm:$0xff]  }
 0x842   : > { %9056 = vmatpush3.msra.mxu1 %v11282_v16  ;;  %v9760_v16 = vld [vmem:[#allocation6 + $0x1ac] ss:$16 sps:$4 sm:$0xff]  }
 0x843   : > { %9057 = vmatprep.subr.mxu1 %v11288_v19  ;;  %v9758_v19 = vld [vmem:[#allocation6 + $0x1a8] ss:$16 sps:$4 sm:$0xff]  }
 0x844   : > { %9058 = vmatpush3.msra.mxu1 %v11294_v20  ;;  %v9766_v20 = vld [vmem:[#allocation6 + $0x18c] ss:$16 sps:$4 sm:$0xff]  }
 0x845   : > { %9059 = vmatprep.subr.mxu1 %v11300_v21  ;;  %v9764_v21 = vld [vmem:[#allocation6 + $0x188] ss:$16 sps:$4 sm:$0xff]  }
 0x846   : > { %9060 = vmatpush3.msra.mxu1 %v11306_v22  ;;  %v9772_v22 = vld [vmem:[#allocation6 + $0x16c] ss:$16 sps:$4 sm:$0xff]  }
 0x847   : > { %3971 = vmatprep.subr.bf16.mxu1 %v9700_v55  ;;  %v9745_v55 = vld [vmem:[#allocation6 + $0x1e4] ss:$16 sps:$4 sm:$0xff]  }
 0x8e7   : > { %v3318_v51 = vpop.f32.mrf.mxu1 }
 0x8e8   : > { %v11567_v18 = vsub.f32 %v3172_v24, %v3318_v51  ;;  %v9701_v24 = vld [vmem:[#allocation6 + $0xc0] ss:$16 sps:$4 sm:$0xff]   ;;  %v9727_v51 = vld [vmem:[#allocation6 + $0x44] ss:$16 sps:$4 sm:$0xff]  }
 0x8e9   : > { %v3320_v35 = vpop.f32.mrf.mxu1 }
 0x8ea   : > { %v11569_v52 = vsub.f32 %v3174_v28, %v3320_v35  ;;  %v3325_v54 = vmul.f32 %v11567_v18, %v11567_v18  ;;  %v9709_v28 = vld [vmem:[#allocation6 + $0xa4] ss:$16 sps:$4 sm:$0xff]   ;;  %v9725_v35 = vld [vmem:[#allocation6 + $0x40] ss:$16 sps:$4 sm:$0xff]  }
 0x8ec   : > { %v3326_v53 = vmul.f32 %v11569_v52, %v11569_v52 }
 0x8ee   : > { %3391 = vmatprep.mubr.f32.mxu1 %v3326_v53  ;;  %v9733_v53 = vld [vmem:[#allocation6 + $0x24] ss:$16 sps:$4 sm:$0xff]  }
 0x8ef   : > { %3392 = vmatmul.mubr.f32.vlgmr.msra.gmra.mxu1 %v3325_v54  ;;  %v9731_v54 = vld [vmem:[#allocation6 + $0x20] ss:$16 sps:$4 sm:$0xff]  }
 0x8f0   : > { %3972 = vmatpush1.bf16.msra.mxu1 %v9698_v23  ;;  %v9737_v23 = vld [vmem:[#allocation6] ss:$16 sps:$4 sm:$0xff]  }
 0x8f1   : > { %3973 = vmatprep.subr.bf16.mxu1 %v9706_v56  ;;  %v9743_v56 = vld [vmem:[#allocation6 + $0x1e0] ss:$16 sps:$4 sm:$0xff]  }
 0x8f4   : > { %3974 = vmatpush1.bf16.msra.mxu1 %v9704_v57  ;;  %v9751_v57 = vld [vmem:[#allocation6 + $0x1c4] ss:$16 sps:$4 sm:$0xff]  }
 0x8f5   : > { %3975 = vmatprep.subr.bf16.mxu1 %v9712_v59  ;;  %v9749_v59 = vld [vmem:[#allocation6 + $0x1c0] ss:$16 sps:$4 sm:$0xff]  }
 0x8f8   : > { %3976 = vmatpush1.bf16.msra.mxu1 %v9710_v60  ;;  %v9757_v60 = vld [vmem:[#allocation6 + $0x1a4] ss:$16 sps:$4 sm:$0xff]  }
 0x8f9   : > { %3977 = vmatprep.subr.bf16.mxu1 %v9718_v61  ;;  %v9755_v61 = vld [vmem:[#allocation6 + $0x1a0] ss:$16 sps:$4 sm:$0xff]  }
 0x8fc   : > { %3978 = vmatpush1.bf16.msra.mxu1 %v9716_v62  ;;  %v9763_v62 = vld [vmem:[#allocation6 + $0x184] ss:$16 sps:$4 sm:$0xff]  }
 0x8fd   : > { %3979 = vmatprep.subr.bf16.mxu1 %v9724_v63  ;;  %v9761_v63 = vld [vmem:[#allocation6 + $0x180] ss:$16 sps:$4 sm:$0xff]  }
 0x900   : > { %3980 = vmatpush1.bf16.msra.mxu1 %v9722_v0  ;;  %v9769_v0 = vld [vmem:[#allocation6 + $0x164] ss:$16 sps:$4 sm:$0xff]  }
 0x901   : > { %3981 = vmatprep.subr.bf16.mxu1 %v9730_v1  ;;  %v9767_v1 = vld [vmem:[#allocation6 + $0x160] ss:$16 sps:$4 sm:$0xff]  }
 0x904   : > { %3982 = vmatpush1.bf16.msra.mxu1 %v9728_v2  ;;  %v9775_v2 = vld [vmem:[#allocation6 + $0x144] ss:$16 sps:$4 sm:$0xff]  }
 0x905   : > { %3983 = vmatprep.subr.bf16.mxu1 %v9736_v3  ;;  %v9773_v3 = vld [vmem:[#allocation6 + $0x140] ss:$16 sps:$4 sm:$0xff]  }
 0x908   : > { %3984 = vmatpush1.bf16.msra.mxu1 %v9734_v7  ;;  %v9781_v7 = vld [vmem:[#allocation6 + $0x124] ss:$16 sps:$4 sm:$0xff]  }
 0x909   : > { %3985 = vmatprep.subr.bf16.mxu1 %v9742_v8  ;;  %v9784_v8 = vld [vmem:[#allocation6 + $0x12c] ss:$16 sps:$4 sm:$0xff]  }
 0x90c   : > { %3986 = vmatpush1.bf16.msra.mxu1 %v9740_v10  ;;  %v9779_v10 = vld [vmem:[#allocation6 + $0x120] ss:$16 sps:$4 sm:$0xff]  }
 0x90d   : > { %3987 = vmatprep.subr.bf16.mxu1 %v9748_v12  ;;  %v9782_v12 = vld [vmem:[#allocation6 + $0x128] ss:$16 sps:$4 sm:$0xff]  }
 0x910   : > { %3988 = vmatpush2.bf16.msra.mxu1 %v9746_v13  ;;  %v9787_v13 = vld [vmem:[#allocation6 + $0x104] ss:$16 sps:$4 sm:$0xff]  }
 0x911   : > { %3989 = vmatprep.subr.bf16.mxu1 %v9754_v14  ;;  %v9790_v14 = vld [vmem:[#allocation6 + $0x10c] ss:$16 sps:$4 sm:$0xff]  }
 0x914   : > { %3990 = vmatpush2.bf16.msra.mxu1 %v9752_v15  ;;  %v9785_v15 = vld [vmem:[#allocation6 + $0x100] ss:$16 sps:$4 sm:$0xff]  }
 0x915   : > { %3991 = vmatprep.subr.bf16.mxu1 %v9760_v16  ;;  %v9788_v16 = vld [vmem:[#allocation6 + $0x108] ss:$16 sps:$4 sm:$0xff]  }
 0x918   : > { %3992 = vmatpush2.bf16.msra.mxu1 %v9758_v19  ;;  %v9793_v19 = vld [vmem:[#allocation4 + $0xe4] ss:$16 sps:$4 sm:$0xff]  }
 0x919   : > { %3993 = vmatprep.subr.bf16.mxu1 %v9766_v20  ;;  %v9796_v20 = vld [vmem:[#allocation4 + $0xec] ss:$16 sps:$4 sm:$0xff]  }
 0x91c   : > { %3994 = vmatpush2.bf16.msra.mxu1 %v9764_v21 }
 0x91d   : > { %3995 = vmatprep.subr.bf16.mxu1 %v9772_v22 }
 0x920   : > { %3996 = vmatpush2.bf16.msra.mxu1 %v9770_v26 }
 0x921   : > { %3997 = vmatprep.subr.bf16.mxu1 %v9778_v41 }
 0x924   : > { %3998 = vmatpush2.bf16.msra.mxu1 %v9776_v50 }
 0x925   : > { %3999 = vmatprep.subr.bf16.mxu1 %v9784_v8  ;;  %v9844_v8 = vld [vmem:[#allocation4 + $0x1ec] ss:$16 sps:$4 sm:$0xff]  }
 0x928   : > { %4000 = vmatpush2.bf16.msra.mxu1 %v9782_v12  ;;  %v9842_v12 = vld [vmem:[#allocation4 + $0x1e8] ss:$16 sps:$4 sm:$0xff]  }
 0x929   : > { %4001 = vmatprep.subr.bf16.mxu1 %v9790_v14  ;;  %v9850_v14 = vld [vmem:[#allocation4 + $0x1cc] ss:$16 sps:$4 sm:$0xff]  }
 0x92c   : > { %4002 = vmatpush2.bf16.msra.mxu1 %v9788_v16  ;;  %v9848_v16 = vld [vmem:[#allocation4 + $0x1c8] ss:$16 sps:$4 sm:$0xff]  }
 0x92d   : > { %4373 = vmatprep.subr.bf16.mxu1 %v9796_v20  ;;  %v9856_v20 = vld [vmem:[#allocation4 + $0x1ac] ss:$16 sps:$4 sm:$0xff]  }
 0x9af   : > { %v9061_v27 = vpop.f32.mrf.mxu1 }
 0x9b1   : > { %v9062_v30 = vpop.f32.mrf.mxu1 }
 0x9b2   : > { %v9063_v31 = vadd.f32 %v9062_v30, %v9061_v27  ;;  %v3475_v30 = vmax.f32 %v11472_v29, 0.0  ;;  %v9803_v29 = vld [vmem:[#allocation4 + $0xa0] ss:$16 sps:$4 sm:$0xff]  }
 0x9b4   : > { %v3394_v32 = vadd.f32 1e-05, %v9063_v31 }
 0x9b6   : > { %10465 = vrsqrt.f32 %v3394_v32  ;;  %v9791_v32 = vld [vmem:[#allocation4 + $0xe0] ss:$16 sps:$4 sm:$0xff]  }
 0x9c3   : > { %v10466_v17 = vpop.eup %10465 }
 0x9c4   : > { %8383 = vmatmul.mubr.msk.f32.vlgmr.msra.gmra.mxu0 %vm2637_vm4, %v10466_v17  ;;  %v9799_v17 = vld [vmem:[#allocation4 + $0xc4] ss:$16 sps:$4 sm:$0xff]  }
 0x9c5   : > { %3931 = vmatpush1.bf16.msra.mxu0 %v9695_v38  ;;  %v9794_v38 = vld [vmem:[#allocation4 + $0xe8] ss:$16 sps:$4 sm:$0xff]  }
 0x9c6   : > { %3932 = vmatprep.subr.bf16.mxu0 %v9703_v37 }
 0x9c9   : > { %3933 = vmatpush1.bf16.msra.mxu0 %v9701_v24  ;;  %v9802_v24 = vld [vmem:[#allocation4 + $0xcc] ss:$16 sps:$4 sm:$0xff]  }
 0x9ca   : > { %3934 = vmatprep.subr.bf16.mxu0 %v9709_v28  ;;  %v3477_v28 = vpack.c.bf16 %v3475_v30, %v3475_v30  ;;  %v9865_v30 = vld [vmem:[#allocation4 + $0x164] ss:$16 sps:$4 sm:$0xff]  }
 0x9cd   : > { %3935 = vmatpush1.bf16.msra.mxu0 %v9707_v39  ;;  %v9800_v39 = vld [vmem:[#allocation4 + $0xc8] ss:$16 sps:$4 sm:$0xff]  }
 0x9ce   : > { %3936 = vmatprep.subr.bf16.mxu0 %v9715_v33  ;;  %v9808_v33 = vld [vmem:[#allocation4 + $0xac] ss:$16 sps:$4 sm:$0xff]  }
 0x9d1   : > { %3937 = vmatpush1.bf16.msra.mxu0 %v9713_v44  ;;  %v9806_v44 = vld [vmem:[#allocation4 + $0xa8] ss:$16 sps:$4 sm:$0xff]  }
 0x9d2   : > { %3938 = vmatprep.subr.bf16.mxu0 %v9721_v45  ;;  %v9811_v45 = vld [vmem:[#allocation4 + $0x84] ss:$16 sps:$4 sm:$0xff]  }
 0x9d5   : > { %3939 = vmatpush1.bf16.msra.mxu0 %v9719_v49  ;;  %v9814_v49 = vld [vmem:[#allocation4 + $0x8c] ss:$16 sps:$4 sm:$0xff]  }
 0x9d6   : > { %3940 = vmatprep.subr.bf16.mxu0 %v9727_v51  ;;  %v9809_v51 = vld [vmem:[#allocation4 + $0x80] ss:$16 sps:$4 sm:$0xff]  }
 0x9d9   : > { %3941 = vmatpush1.bf16.msra.mxu0 %v9725_v35  ;;  %v9812_v35 = vld [vmem:[#allocation4 + $0x88] ss:$16 sps:$4 sm:$0xff]  }
 0x9da   : > { %3942 = vmatprep.subr.bf16.mxu0 %v9733_v53  ;;  %v9817_v53 = vld [vmem:[#allocation4 + $0x64] ss:$16 sps:$4 sm:$0xff]  }
 0x9dd   : > { %3943 = vmatpush1.bf16.msra.mxu0 %v9731_v54  ;;  %v9820_v54 = vld [vmem:[#allocation4 + $0x6c] ss:$16 sps:$4 sm:$0xff]  }
 0x9de   : > { %3944 = vmatprep.subr.bf16.mxu0 %v9739_v58  ;;  %v9815_v58 = vld [vmem:[#allocation4 + $0x60] ss:$16 sps:$4 sm:$0xff]  }
 0x9e1   : > { %3945 = vmatpush1.bf16.msra.mxu0 %v9737_v23  ;;  %v9818_v23 = vld [vmem:[#allocation4 + $0x68] ss:$16 sps:$4 sm:$0xff]  }
 0x9e2   : > { %3946 = vmatprep.subr.bf16.mxu0 %v9745_v55  ;;  %v9823_v55 = vld [vmem:[#allocation4 + $0x44] ss:$16 sps:$4 sm:$0xff]  }
 0x9e5   : > { %3947 = vmatpush2.bf16.msra.mxu0 %v9743_v56  ;;  %v9826_v56 = vld [vmem:[#allocation4 + $0x4c] ss:$16 sps:$4 sm:$0xff]  }
 0x9e6   : > { %3948 = vmatprep.subr.bf16.mxu0 %v9751_v57  ;;  %v9821_v57 = vld [vmem:[#allocation4 + $0x40] ss:$16 sps:$4 sm:$0xff]  }
 0x9e9   : > { %3949 = vmatpush2.bf16.msra.mxu0 %v9749_v59  ;;  %v9824_v59 = vld [vmem:[#allocation4 + $0x48] ss:$16 sps:$4 sm:$0xff]  }
 0x9ea   : > { %3950 = vmatprep.subr.bf16.mxu0 %v9757_v60  ;;  %v9829_v60 = vld [vmem:[#allocation4 + $0x24] ss:$16 sps:$4 sm:$0xff]  }
 0x9ed   : > { %3951 = vmatpush2.bf16.msra.mxu0 %v9755_v61  ;;  %v9832_v61 = vld [vmem:[#allocation4 + $0x2c] ss:$16 sps:$4 sm:$0xff]  }
 0x9ee   : > { %3952 = vmatprep.subr.bf16.mxu0 %v9763_v62  ;;  %v9827_v62 = vld [vmem:[#allocation4 + $0x20] ss:$16 sps:$4 sm:$0xff]  }
 0x9f1   : > { %3953 = vmatpush2.bf16.msra.mxu0 %v9761_v63  ;;  %v9830_v63 = vld [vmem:[#allocation4 + $0x28] ss:$16 sps:$4 sm:$0xff]  }
 0x9f2   : > { %3954 = vmatprep.subr.bf16.mxu0 %v9769_v0  ;;  %v9835_v0 = vld [vmem:[#allocation4 + $0x4] ss:$16 sps:$4 sm:$0xff]  }
 0x9f5   : > { %3955 = vmatpush2.bf16.msra.mxu0 %v9767_v1  ;;  %v9838_v1 = vld [vmem:[#allocation4 + $0xc] ss:$16 sps:$4 sm:$0xff]  }
 0x9f6   : > { %3956 = vmatprep.subr.bf16.mxu0 %v9775_v2  ;;  %v9833_v2 = vld [vmem:[#allocation4] ss:$16 sps:$4 sm:$0xff]  }
 0x9f9   : > { %3957 = vmatpush2.bf16.msra.mxu0 %v9773_v3  ;;  %v9836_v3 = vld [vmem:[#allocation4 + $0x8] ss:$16 sps:$4 sm:$0xff]  }
 0x9fa   : > { %3958 = vmatprep.subr.bf16.mxu0 %v9781_v7  ;;  %v9841_v7 = vld [vmem:[#allocation4 + $0x1e4] ss:$16 sps:$4 sm:$0xff]  }
 0x9fd   : > { %3959 = vmatpush2.bf16.msra.mxu0 %v9779_v10  ;;  %v9839_v10 = vld [vmem:[#allocation4 + $0x1e0] ss:$16 sps:$4 sm:$0xff]  }
 0x9fe   : > { %3960 = vmatprep.subr.bf16.mxu0 %v9787_v13  ;;  %v9847_v13 = vld [vmem:[#allocation4 + $0x1c4] ss:$16 sps:$4 sm:$0xff]  }
 0xa01   : > { %3961 = vmatpush2.bf16.msra.mxu0 %v9785_v15  ;;  %v9845_v15 = vld [vmem:[#allocation4 + $0x1c0] ss:$16 sps:$4 sm:$0xff]  }
 0xa02   : > { %4332 = vmatprep.subr.bf16.mxu0 %v9793_v19  ;;  %v9853_v19 = vld [vmem:[#allocation4 + $0x1a4] ss:$16 sps:$4 sm:$0xff]  }
 0xa84   : > { %v3467_v21 = vpop.f32.mrf.mxu0 }
 0xa85   : > { %v3472_v22 = vmul.f32 %v3467_v21, %v11567_v18  ;;  %v9797_v18 = vld [vmem:[#allocation4 + $0xc0] ss:$16 sps:$4 sm:$0xff]  }
 0xa86   : > { %v3469_v26 = vpop.f32.mrf.mxu0  ;;  %v9851_v21 = vld [vmem:[#allocation4 + $0x1a0] ss:$16 sps:$4 sm:$0xff]  }
 0xa87   : > { %v3473_v41 = vmul.f32 %v3469_v26, %v11569_v52  ;;  %v3542_v50 = vmax.f32 %v3472_v22, 0.0  ;;  %v9805_v52 = vld [vmem:[#allocation4 + $0xa4] ss:$16 sps:$4 sm:$0xff]   ;;  %v9854_v22 = vld [vmem:[#allocation4 + $0x1a8] ss:$16 sps:$4 sm:$0xff]  }
 0xa88   : > { %v9859_v26 = vld [vmem:[#allocation4 + $0x184] ss:$16 sps:$4 sm:$0xff]  }
 0xa89   : > { %v3543_v27 = vmax.f32 %v3473_v41, 0.0  ;;  %v3544_v37 = vpack.c.bf16 %v3542_v50, %v3542_v50  ;;  %v9862_v41 = vld [vmem:[#allocation4 + $0x18c] ss:$16 sps:$4 sm:$0xff]   ;;  %v9857_v50 = vld [vmem:[#allocation4 + $0x180] ss:$16 sps:$4 sm:$0xff]  }
 0xa8b   : > { %v3545_v31 = vpack.c.bf16 %v3543_v27, %v3543_v27  ;;  %v9860_v27 = vld [vmem:[#allocation4 + $0x188] ss:$16 sps:$4 sm:$0xff]  }
 0xa8d   : > { %3962 = vmatprep.mubr.bf16.mxu0 %v3545_v31  ;;  %4003 = vmatprep.mubr.bf16.mxu1 %v3545_v31  ;;  %v9868_v31 = vld [vmem:[#allocation4 + $0x16c] ss:$16 sps:$4 sm:$0xff]  }
 0xa8e   : > { %3963 = vmatmul.mubr.bf16.vlgmr.msra.gmra.mxu0 %v3544_v37  ;;  %4004 = vmatmul.mubr.bf16.vlgmr.msra.gmra.mxu1 %v3544_v37  ;;  %v9871_v37 = vld [vmem:[#allocation4 + $0x144] ss:$16 sps:$4 sm:$0xff]  }
 0xa8f   : > { %4333 = vmatpush1.bf16.msra.mxu0 %v9791_v32  ;;  %4374 = vmatpush1.bf16.msra.mxu1 %v9794_v38  ;;  %v9863_v32 = vld [vmem:[#allocation4 + $0x160] ss:$16 sps:$4 sm:$0xff]   ;;  %v9866_v38 = vld [vmem:[#allocation4 + $0x168] ss:$16 sps:$4 sm:$0xff]  }
 0xa90   : > { %4364 = vmatprep.mubr.bf16.mxu0 %v3477_v28  ;;  %4405 = vmatprep.mubr.bf16.mxu1 %v3477_v28  ;;  %v9872_v28 = vld [vmem:[#allocation4 + $0x148] ss:$16 sps:$4 sm:$0xff]  }
 0xa91   : > { %4334 = vmatprep.subr.bf16.mxu0 %v9799_v17  ;;  %4375 = vmatprep.subr.bf16.mxu1 %v9802_v24  ;;  %v9874_v17 = vld [vmem:[#allocation4 + $0x14c] ss:$16 sps:$4 sm:$0xff]   ;;  %v9869_v24 = vld [vmem:[#allocation4 + $0x140] ss:$16 sps:$4 sm:$0xff]  }
 0xa93   : > { %4335 = vmatpush1.bf16.msra.mxu0 %v9797_v18  ;;  %4376 = vmatpush1.bf16.msra.mxu1 %v9800_v39  ;;  %v9877_v18 = vld [vmem:[#allocation4 + $0x124] ss:$16 sps:$4 sm:$0xff]   ;;  %v9880_v39 = vld [vmem:[#allocation4 + $0x12c] ss:$16 sps:$4 sm:$0xff]  }
 0xa94   : > { %4336 = vmatprep.subr.bf16.mxu0 %v9805_v52  ;;  %4377 = vmatprep.subr.bf16.mxu1 %v9808_v33  ;;  %v9875_v52 = vld [vmem:[#allocation4 + $0x120] ss:$16 sps:$4 sm:$0xff]   ;;  %v9878_v33 = vld [vmem:[#allocation4 + $0x128] ss:$16 sps:$4 sm:$0xff]  }
 0xa97   : > { %4337 = vmatpush1.bf16.msra.mxu0 %v9803_v29  ;;  %4378 = vmatpush1.bf16.msra.mxu1 %v9806_v44  ;;  %v9883_v29 = vld [vmem:[#allocation4 + $0x104] ss:$16 sps:$4 sm:$0xff]   ;;  %v9886_v44 = vld [vmem:[#allocation4 + $0x10c] ss:$16 sps:$4 sm:$0xff]  }
 0xa98   : > { %4338 = vmatprep.subr.bf16.mxu0 %v9811_v45  ;;  %4379 = vmatprep.subr.bf16.mxu1 %v9814_v49  ;;  %v9881_v45 = vld [vmem:[#allocation4 + $0x100] ss:$16 sps:$4 sm:$0xff]   ;;  %v9884_v49 = vld [vmem:[#allocation4 + $0x108] ss:$16 sps:$4 sm:$0xff]  }
 0xa9b   : > { %4339 = vmatpush1.bf16.msra.mxu0 %v9809_v51  ;;  %4380 = vmatpush1.bf16.msra.mxu1 %v9812_v35  ;;  %v3474_v51 = vmax.f32 %v11467_v48, 0.0  ;;  %v11600_v48 = vld [vmem:[%s12171_s14 + $0x178] sm:$0xff] }
 0xa9c   : > { %4340 = vmatprep.subr.bf16.mxu0 %v9817_v53  ;;  %4381 = vmatprep.subr.bf16.mxu1 %v9820_v54  ;;  %v11583_v53 = vld [vmem:[%s12171_s14 + $0xf8] sm:$0xff] }
 0xa9d   : > { %v3476_v35 = vpack.c.bf16 %v3474_v51, %v3474_v51  ;;  %v11588_v54 = vld [vmem:[%s12171_s14 + $0x1f8] sm:$0xff] }
 0xa9e   : > { %v11872_v51 = vld [vmem:[%s12171_s14 + $0x198] sm:$0xff] }
 0xa9f   : > { %4341 = vmatpush1.bf16.msra.mxu0 %v9815_v58  ;;  %4382 = vmatpush1.bf16.msra.mxu1 %v9818_v23  ;;  %v11593_v58 = vld [vmem:[%s12171_s14 + $0x78] sm:$0xff]  ;;  %v11605_v23 = vld [vmem:[%s12171_s14 + $0xf0] sm:$0xff] }
 0xaa0   : > { %4342 = vmatprep.subr.bf16.mxu0 %v9823_v55  ;;  %4383 = vmatprep.subr.bf16.mxu1 %v9826_v56  ;;  %v11610_v55 = vld [vmem:[%s12171_s14 + $0x1f0] sm:$0xff] }
 0xaa1   : > { %v11617_v56 = vld [vmem:[%s12171_s14 + $0x70] sm:$0xff] }
 0xaa3   : > { %4343 = vmatpush1.bf16.msra.mxu0 %v9821_v57  ;;  %4384 = vmatpush1.bf16.msra.mxu1 %v9824_v59  ;;  %v11622_v57 = vld [vmem:[%s12171_s14 + $0x170] sm:$0xff]  ;;  %v11627_v59 = vld [vmem:[%s12171_s14 + $0xe8] sm:$0xff] }
 0xaa4   : > { %4344 = vmatprep.subr.bf16.mxu0 %v9829_v60  ;;  %4385 = vmatprep.subr.bf16.mxu1 %v9832_v61  ;;  %v11634_v60 = vld [vmem:[%s12171_s14 + $0x1e8] sm:$0xff] }
 0xaa5   : > { %v11639_v61 = vld [vmem:[%s12171_s14 + $0x68] sm:$0xff] }
 0xaa7   : > { %4345 = vmatpush1.bf16.msra.mxu0 %v9827_v62  ;;  %4386 = vmatpush1.bf16.msra.mxu1 %v9830_v63  ;;  %v11644_v62 = vld [vmem:[%s12171_s14 + $0x168] sm:$0xff]  ;;  %v11651_v63 = vld [vmem:[%s12171_s14 + $0xe0] sm:$0xff] }
 0xaa8   : > { %4346 = vmatprep.subr.bf16.mxu0 %v9835_v0  ;;  %4387 = vmatprep.subr.bf16.mxu1 %v9838_v1  ;;  %v11656_v0 = vld [vmem:[%s12171_s14 + $0x1e0] sm:$0xff] }
 0xaa9   : > { %v11663_v1 = vld [vmem:[%s12171_s14 + $0x60] sm:$0xff] }
 0xaab   : > { %4347 = vmatpush1.bf16.msra.mxu0 %v9833_v2  ;;  %4388 = vmatpush1.bf16.msra.mxu1 %v9836_v3  ;;  %v11668_v2 = vld [vmem:[%s12171_s14 + $0x160] sm:$0xff]  ;;  %v11675_v3 = vld [vmem:[%s12171_s14 + $0xd8] sm:$0xff] }
 0xaac   : > { %4348 = vmatprep.subr.bf16.mxu0 %v9841_v7  ;;  %4389 = vmatprep.subr.bf16.mxu1 %v9844_v8  ;;  %v11680_v7 = vld [vmem:[%s12171_s14 + $0x1d8] sm:$0xff] }
 0xaad   : > { %v11687_v8 = vld [vmem:[%s12171_s14 + $0x58] sm:$0xff] }
 0xaaf   : > { %4349 = vmatpush2.bf16.msra.mxu0 %v9839_v10  ;;  %4390 = vmatpush2.bf16.msra.mxu1 %v9842_v12  ;;  %v11692_v10 = vld [vmem:[%s12171_s14 + $0x158] sm:$0xff]  ;;  %v11699_v12 = vld [vmem:[%s12171_s14 + $0xd0] sm:$0xff] }
 0xab0   : > { %4350 = vmatprep.subr.bf16.mxu0 %v9847_v13  ;;  %4391 = vmatprep.subr.bf16.mxu1 %v9850_v14  ;;  %v11704_v13 = vld [vmem:[%s12171_s14 + $0x1d0] sm:$0xff] }
 0xab1   : > { %v11711_v14 = vld [vmem:[%s12171_s14 + $0x50] sm:$0xff] }
 0xab3   : > { %4351 = vmatpush2.bf16.msra.mxu0 %v9845_v15  ;;  %4392 = vmatpush2.bf16.msra.mxu1 %v9848_v16  ;;  %v11716_v15 = vld [vmem:[%s12171_s14 + $0x150] sm:$0xff]  ;;  %v11723_v16 = vld [vmem:[%s12171_s14 + $0xc8] sm:$0xff] }
 0xab4   : > { %4352 = vmatprep.subr.bf16.mxu0 %v9853_v19  ;;  %4393 = vmatprep.subr.bf16.mxu1 %v9856_v20  ;;  %v11728_v19 = vld [vmem:[%s12171_s14 + $0x1c8] sm:$0xff] }
 0xab5   : > { %v11735_v20 = vld [vmem:[%s12171_s14 + $0x48] sm:$0xff] }
 0xab7   : > { %4353 = vmatpush2.bf16.msra.mxu0 %v9851_v21  ;;  %4394 = vmatpush2.bf16.msra.mxu1 %v9854_v22  ;;  %v11740_v21 = vld [vmem:[%s12171_s14 + $0x148] sm:$0xff]  ;;  %v11747_v22 = vld [vmem:[%s12171_s14 + $0xc0] sm:$0xff] }
 0xab8   : > { %4354 = vmatprep.subr.bf16.mxu0 %v9859_v26  ;;  %4395 = vmatprep.subr.bf16.mxu1 %v9862_v41  ;;  %v11752_v26 = vld [vmem:[%s12171_s14 + $0x1c0] sm:$0xff] }
 0xab9   : > { %v11759_v41 = vld [vmem:[%s12171_s14 + $0x40] sm:$0xff] }
 0xaba   : > { %12225 = vst [vmem:[#allocation22_spill] sm:$0xff] %v11759_v41 }
 0xabb   : > { %4355 = vmatpush2.bf16.msra.mxu0 %v9857_v50  ;;  %4396 = vmatpush2.bf16.msra.mxu1 %v9860_v27  ;;  %v11764_v50 = vld [vmem:[%s12171_s14 + $0x140] sm:$0xff]  ;;  %v11771_v27 = vld [vmem:[%s12171_s14 + $0xb8] sm:$0xff] }
 0xabc   : > { %4356 = vmatprep.subr.bf16.mxu0 %v9865_v30  ;;  %4397 = vmatprep.subr.bf16.mxu1 %v9868_v31  ;;  %12226 = vst [vmem:[#allocation23_spill] sm:$0xff] %v11771_v27  ;;  %v11776_v30 = vld [vmem:[%s12171_s14 + $0x1b8] sm:$0xff] }
 0xabd   : > { %v11783_v31 = vld [vmem:[%s12171_s14 + $0x38] sm:$0xff] }
 0xabe   : > { %12227 = vst [vmem:[#allocation24_spill] sm:$0xff] %v11783_v31 }
 0xabf   : > { %4357 = vmatpush2.bf16.msra.mxu0 %v9863_v32  ;;  %4398 = vmatpush2.bf16.msra.mxu1 %v9866_v38  ;;  %v11788_v32 = vld [vmem:[%s12171_s14 + $0x138] sm:$0xff]  ;;  %v11795_v38 = vld [vmem:[%s12171_s14 + $0xb0] sm:$0xff] }
 0xac0   : > { %4358 = vmatprep.subr.bf16.mxu0 %v9871_v37  ;;  %4399 = vmatprep.subr.bf16.mxu1 %v9874_v17  ;;  %12228 = vst [vmem:[#allocation25_spill] sm:$0xff] %v11795_v38  ;;  %v11800_v37 = vld [vmem:[%s12171_s14 + $0x1b0] sm:$0xff] }
 0xac1   : > { %v11807_v17 = vld [vmem:[%s12171_s14 + $0x30] sm:$0xff] }
 0xac2   : > { %12229 = vst [vmem:[#allocation26_spill] sm:$0xff] %v11807_v17 }
 0xac3   : > { %4359 = vmatpush2.bf16.msra.mxu0 %v9869_v24  ;;  %4400 = vmatpush2.bf16.msra.mxu1 %v9872_v28  ;;  %v11812_v24 = vld [vmem:[%s12171_s14 + $0x130] sm:$0xff]  ;;  %v11819_v28 = vld [vmem:[%s12171_s14 + $0xa8] sm:$0xff] }
 0xac4   : > { %4360 = vmatprep.subr.bf16.mxu0 %v9877_v18  ;;  %4401 = vmatprep.subr.bf16.mxu1 %v9880_v39  ;;  %12230 = vst [vmem:[#allocation27_spill] sm:$0xff] %v11819_v28  ;;  %v11824_v18 = vld [vmem:[%s12171_s14 + $0x1a8] sm:$0xff] }
 0xac5   : > { %v11831_v39 = vld [vmem:[%s12171_s14 + $0x28] sm:$0xff] }
 0xac6   : > { %12231 = vst [vmem:[#allocation28_spill] sm:$0xff] %v11831_v39 }
 0xac7   : > { %4361 = vmatpush2.bf16.msra.mxu0 %v9875_v52  ;;  %4402 = vmatpush2.bf16.msra.mxu1 %v9878_v33  ;;  %v11836_v52 = vld [vmem:[%s12171_s14 + $0x128] sm:$0xff]  ;;  %v11843_v33 = vld [vmem:[%s12171_s14 + $0xa0] sm:$0xff] }
 0xac8   : > { %4362 = vmatprep.subr.bf16.mxu0 %v9883_v29  ;;  %4403 = vmatprep.subr.bf16.mxu1 %v9886_v44  ;;  %12232 = vst [vmem:[#allocation29_spill] sm:$0xff] %v11843_v33  ;;  %v11848_v29 = vld [vmem:[%s12171_s14 + $0x1a0] sm:$0xff] }
 0xac9   : > { %v11855_v44 = vld [vmem:[%s12171_s14 + $0x20] sm:$0xff] }
 0xaca   : > { %12233 = vst [vmem:[#allocation30_spill] sm:$0xff] %v11855_v44 }
 0xacb   : > { %4363 = vmatpush2.bf16.msra.mxu0 %v9881_v45  ;;  %4404 = vmatpush2.bf16.msra.mxu1 %v9884_v49  ;;  %v11860_v45 = vld [vmem:[%s12171_s14 + $0x120] sm:$0xff]  ;;  %v11867_v49 = vld [vmem:[%s12171_s14 + $0x98] sm:$0xff] }
 0xacc   : > { %9064 = vmatprep.subr.mxu0 %v11583_v53  ;;  %9099 = vmatprep.subr.mxu1 %v11588_v54  ;;  %12234 = vst [vmem:[#allocation31_spill] sm:$0xff] %v11867_v49 }
 0xace   : > { %4365 = vmatmul.mubr.bf16.vlgmr.msra.gmra.mxu0 %v3476_v35  ;;  %4406 = vmatmul.mubr.bf16.vlgmr.msra.gmra.mxu1 %v3476_v35  ;;  %v11879_v35 = vld [vmem:[%s12171_s14 + $0x18] sm:$0xff] }
 0xacf   : > { %9065 = vmatpush3.msra.mxu0 %v11593_v58  ;;  %9100 = vmatpush3.msra.mxu1 %v11600_v48  ;;  %12235 = vst [vmem:[#allocation32_spill] sm:$0xff] %v11879_v35 }
 0xad0   : > { %9066 = vmatprep.subr.mxu0 %v11605_v23  ;;  %9101 = vmatprep.subr.mxu1 %v11610_v55 }
 0xad1   : > { %9067 = vmatpush3.msra.mxu0 %v11617_v56  ;;  %9102 = vmatpush3.msra.mxu1 %v11622_v57 }
 0xad2   : > { %9068 = vmatprep.subr.mxu0 %v11627_v59  ;;  %9103 = vmatprep.subr.mxu1 %v11634_v60 }
 0xad3   : > { %9069 = vmatpush3.msra.mxu0 %v11639_v61  ;;  %9104 = vmatpush3.msra.mxu1 %v11644_v62 }
 0xad4   : > { %9070 = vmatprep.subr.mxu0 %v11651_v63  ;;  %9105 = vmatprep.subr.mxu1 %v11656_v0 }
 0xad5   : > { %9071 = vmatpush3.msra.mxu0 %v11663_v1  ;;  %9106 = vmatpush3.msra.mxu1 %v11668_v2 }
 0xad6   : > { %9072 = vmatprep.subr.mxu0 %v11675_v3  ;;  %9107 = vmatprep.subr.mxu1 %v11680_v7 }
 0xad7   : > { %9073 = vmatpush3.msra.mxu0 %v11687_v8  ;;  %9108 = vmatpush3.msra.mxu1 %v11692_v10 }
 0xad8   : > { %9074 = vmatprep.subr.mxu0 %v11699_v12  ;;  %9109 = vmatprep.subr.mxu1 %v11704_v13 }
 0xad9   : > { %9075 = vmatpush3.msra.mxu0 %v11711_v14  ;;  %9110 = vmatpush3.msra.mxu1 %v11716_v15 }
 0xada   : > { %9076 = vmatprep.subr.mxu0 %v11723_v16  ;;  %9111 = vmatprep.subr.mxu1 %v11728_v19 }
 0xadb   : > { %9077 = vmatpush3.msra.mxu0 %v11735_v20  ;;  %9112 = vmatpush3.msra.mxu1 %v11740_v21 }
 0xadc   : > { %9078 = vmatprep.subr.mxu0 %v11747_v22  ;;  %9113 = vmatprep.subr.mxu1 %v11752_v26 }
 0xadd   : > { %9079 = vmatpush3.msra.mxu0 %v11759_v41  ;;  %9114 = vmatpush3.msra.mxu1 %v11764_v50 }
 0xade   : > { %9080 = vmatprep.subr.mxu0 %v11771_v27  ;;  %9115 = vmatprep.subr.mxu1 %v11776_v30 }
 0xadf   : > { %9081 = vmatpush3.msra.mxu0 %v11783_v31  ;;  %9116 = vmatpush3.msra.mxu1 %v11788_v32 }
 0xae0   : > { %9082 = vmatprep.subr.mxu0 %v11795_v38  ;;  %9117 = vmatprep.subr.mxu1 %v11800_v37 }
 0xae1   : > { %9083 = vmatpush3.msra.mxu0 %v11807_v17  ;;  %9118 = vmatpush3.msra.mxu1 %v11812_v24 }
 0xae2   : > { %9084 = vmatprep.subr.mxu0 %v11819_v28  ;;  %9119 = vmatprep.subr.mxu1 %v11824_v18 }
 0xae3   : > { %9085 = vmatpush3.msra.mxu0 %v11831_v39  ;;  %9120 = vmatpush3.msra.mxu1 %v11836_v52 }
 0xae4   : > { %9086 = vmatprep.subr.mxu0 %v11843_v33  ;;  %9121 = vmatprep.subr.mxu1 %v11848_v29 }
 0xae5   : > { %9087 = vmatpush3.msra.mxu0 %v11855_v44  ;;  %9122 = vmatpush3.msra.mxu1 %v11860_v45 }
 0xae6   : > { %9088 = vmatprep.subr.mxu0 %v11867_v49  ;;  %9123 = vmatprep.subr.mxu1 %v11872_v51 }
 0xae7   : > { %9089 = vmatpush3.msra.mxu0 %v11879_v35  ;;  %9124 = vmatpush3.msra.mxu1 %v11884_v36 }
 0xae8   : > { %9090 = vmatprep.subr.mxu0 %v11895_v9  ;;  %9125 = vmatprep.subr.mxu1 %v11900_v25 }
 0xae9   : > { %9091 = vmatpush3.msra.mxu0 %v11907_v43  ;;  %9126 = vmatpush3.msra.mxu1 %v11912_v40 }
 0xaea   : > { %9092 = vmatprep.subr.mxu0 %v11919_v47  ;;  %9127 = vmatprep.subr.mxu1 %v11924_v5 }
 0xaeb   : > { %9093 = vmatpush3.msra.mxu0 %v11931_v46  ;;  %9128 = vmatpush3.msra.mxu1 %v11936_v4 }
 0xaec   : > { %9094 = vmatprep.subr.mxu0 %v11943_v34  ;;  %9129 = vmatprep.subr.mxu1 %v4462_v6 }
 0xaed   : > { %9095 = vmatpush3.msra.mxu0 %v11952_v42  ;;  %9130 = vmatpush3.msra.mxu1 %v4446_v11 }
 0xaee   : > { %9169 = vmatprep.subr.mxu1 %v11588_v54 }
 0xb4e   : > { %v3964_v46 = vpop.f32.mrf.mxu0  ;;  %v4005_v47 = vpop.f32.mrf.mxu1 }
 0xb50   : > { %v3966_v43 = vpop.f32.mrf.mxu0  ;;  %v4007_v9 = vpop.f32.mrf.mxu1 }
 0xb52   : > { %v3968_v34 = vpop.f32.mrf.mxu0  ;;  %v4009_v35 = vpop.f32.mrf.mxu1 }
 0xb53   : > { %v9899_v35 = vld [vmem:[#allocation9 + $0xf0] ss:$24 sps:$4 sm:$0xff]  }
 0xb54   : > { %v3969_v49 = vpop.f32.mrf.mxu0  ;;  %v4010_v44 = vpop.f32.mrf.mxu1 }
 0xb55   : > { %v9901_v49 = vld [vmem:[#allocation9 + $0xf4] ss:$24 sps:$4 sm:$0xff]  }
 0xb8e   : > { %v4366_v33 = vpop.f32.mrf.mxu0  ;;  %v4407_v39 = vpop.f32.mrf.mxu1 }
 0xb8f   : > { %v11963_v42 = vadd.f32 %v4366_v33, %v3964_v46  ;;  %v11965_v27 = vadd.f32 %v4407_v39, %v4005_v47  ;;  %v4479_v46 = vld [vmem:[%s12172_s15 + $0x8] sm:$0xff]  ;;  %v12007_v47 = vld [vmem:[%s12172_s15] sm:$0xff] }
 0xb90   : > { %v4368_v28 = vpop.f32.mrf.mxu0  ;;  %v4409_v17 = vpop.f32.mrf.mxu1  ;;  %4656 = vmatprep.subr.mxu0 %v4479_v46  ;;  %v9895_v39 = vld [vmem:[#allocation9 + $0x124] ss:$24 sps:$4 sm:$0xff]  }
 0xb91   : > { %v11959_v38 = vadd.f32 %v4368_v28, %v3966_v43  ;;  %v11961_v31 = vadd.f32 %v4409_v17, %v4007_v9  ;;  %v12242_v43 = vmov 0.0   ;;  %v9887_v28 = vld [vmem:[#allocation9 + $0x150] ss:$24 sps:$4 sm:$0xff]  }
 0xb92   : > { %v4370_v54 = vpop.f32.mrf.mxu0  ;;  %v4411_v41 = vpop.f32.mrf.mxu1 }
 0xb93   : > { %4546 = vmatprep.mubr.f32.mxu0 %v11959_v38  ;;  %4616 = vmatprep.mubr.f32.mxu1 %v11961_v31  ;;  %v9889_v41 = vld [vmem:[#allocation9 + $0x154] ss:$24 sps:$4 sm:$0xff]   ;;  %v9902_v54 = vld [vmem:[#allocation9 + $0x3f0] ss:$24 sps:$4 sm:$0xff]  }
 0xb94   : > { %v4371_v34 = vpop.f32.mrf.mxu0  ;;  %v4412_v44 = vpop.f32.mrf.mxu1  ;;  %4547 = vmatmul.mubr.f32.vlgmr.msra.gmra.mxu0 %v11963_v42  ;;  %4617 = vmatmul.mubr.f32.vlgmr.msra.gmra.mxu1 %v11965_v27 }
 0xb95   : > { %4690 = vmatprep.mubr.f32.mxu0 %v12242_v43  ;;  %9170 = vmatpush3.msra.mxu1 %v11600_v48  ;;  %v4480_v48 = vld [vmem:[%s12172_s15 + $0x10] sm:$0xff]  ;;  %v9907_v34 = vld [vmem:[#allocation9 + $0xc4] ss:$24 sps:$4 sm:$0xff]  }
 0xb96   : > { %9171 = vmatprep.subr.mxu1 %v11610_v55  ;;  %4657 = vmatpush1.msra.mxu0 %v12007_v47  ;;  %v12246_v55 = vld [vmem:[#allocation25_spill] sm:$0xff] }
 0xb97   : > { %9172 = vmatpush3.msra.mxu1 %v11622_v57  ;;  %v12248_v57 = vld [vmem:[#allocation27_spill] sm:$0xff]  ;;  %v9910_v44 = vld [vmem:[#allocation9 + $0x3c4] ss:$24 sps:$4 sm:$0xff]  }
 0xb98   : > { %9173 = vmatprep.subr.mxu1 %v11634_v60  ;;  %v12250_v60 = vld [vmem:[#allocation29_spill] sm:$0xff] }
 0xb99   : > { %9174 = vmatpush3.msra.mxu1 %v11644_v62  ;;  %v12252_v62 = vld [vmem:[#allocation31_spill] sm:$0xff] }
 0xb9a   : > { %9175 = vmatprep.subr.mxu1 %v11656_v0  ;;  %v12254_v0 = vld [vmem:[#allocation33_spill] sm:$0xff] }
 0xb9b   : > { %9176 = vmatpush3.msra.mxu1 %v11668_v2  ;;  %v12256_v2 = vld [vmem:[#allocation35_spill] sm:$0xff] }
 0xb9c   : > { %9177 = vmatprep.subr.mxu1 %v11680_v7  ;;  %v12258_v7 = vld [vmem:[#allocation37_spill] sm:$0xff] }
 0xb9d   : > { %9178 = vmatpush3.msra.mxu1 %v11692_v10 }
 0xb9e   : > { %9179 = vmatprep.subr.mxu1 %v11704_v13 }
 0xb9f   : > { %9180 = vmatpush3.msra.mxu1 %v11716_v15 }
 0xba0   : > { %9181 = vmatprep.subr.mxu1 %v11728_v19 }
 0xba1   : > { %9182 = vmatpush3.msra.mxu1 %v11740_v21 }
 0xba2   : > { %9183 = vmatprep.subr.mxu1 %v11752_v26 }
 0xba3   : > { %9184 = vmatpush3.msra.mxu1 %v11764_v50  ;;  %v9892_v50 = vld [vmem:[#allocation9 + $0x454] ss:$24 sps:$4 sm:$0xff]  }
 0xba4   : > { %9185 = vmatprep.subr.mxu1 %v11776_v30 }
 0xba5   : > { %9186 = vmatpush3.msra.mxu1 %v11788_v32 }
 0xba6   : > { %9187 = vmatprep.subr.mxu1 %v11800_v37 }
 0xba7   : > { %9188 = vmatpush3.msra.mxu1 %v11812_v24 }
 0xba8   : > { %9189 = vmatprep.subr.mxu1 %v11824_v18  ;;  %v9890_v18 = vld [vmem:[#allocation9 + $0x450] ss:$24 sps:$4 sm:$0xff]  }
 0xba9   : > { %9190 = vmatpush3.msra.mxu1 %v11836_v52  ;;  %v9898_v52 = vld [vmem:[#allocation9 + $0x424] ss:$24 sps:$4 sm:$0xff]  }
 0xbaa   : > { %9191 = vmatprep.subr.mxu1 %v11848_v29  ;;  %v9893_v29 = vld [vmem:[#allocation9 + $0x120] ss:$24 sps:$4 sm:$0xff]  }
 0xbab   : > { %9192 = vmatpush3.msra.mxu1 %v11860_v45  ;;  %v9896_v45 = vld [vmem:[#allocation9 + $0x420] ss:$24 sps:$4 sm:$0xff]  }
 0xbac   : > { %9193 = vmatprep.subr.mxu1 %v11872_v51  ;;  %v9904_v51 = vld [vmem:[#allocation9 + $0x3f4] ss:$24 sps:$4 sm:$0xff]  }
 0xbad   : > { %9194 = vmatpush3.msra.mxu1 %v11884_v36  ;;  %v4481_v36 = vld [vmem:[%s12172_s15 + $0x18] sm:$0xff] }
 0xbae   : > { %9195 = vmatprep.subr.mxu1 %v11900_v25  ;;  %4727 = vmatprep.subr.mxu0 %v4481_v36 }
 0xbaf   : > { %9196 = vmatpush3.msra.mxu1 %v11912_v40 }
 0xbb0   : > { %9197 = vmatprep.subr.mxu1 %v11924_v5 }
 0xbb1   : > { %9198 = vmatpush3.msra.mxu1 %v11936_v4 }
 0xbb2   : > { %9199 = vmatprep.subr.mxu1 %v4462_v6 }
 0xbb3   : > { %9200 = vmatpush3.msra.mxu1 %v4446_v11 }
 0xbb4   : > { %5021 = vmatprep.subr.mxu1 %v4481_v36  ;;  %v9916_v36 = vld [vmem:[#allocation9 + $0x394] ss:$24 sps:$4 sm:$0xff]  }
 0xc54   : > { %v9096_v40 = vpop.f32.mrf.mxu0  ;;  %v9131_v4 = vpop.f32.mrf.mxu1 }
 0xc56   : > { %v9097_v5 = vpop.f32.mrf.mxu0  ;;  %v9132_v9 = vpop.f32.mrf.mxu1 }
 0xc57   : > { %v9098_v25 = vadd.f32 %v9097_v5, %v9096_v40  ;;  %v9133_v6 = vadd.f32 %v9132_v9, %v9131_v4  ;;  %v9911_v40 = vld [vmem:[#allocation9 + $0x90] ss:$24 sps:$4 sm:$0xff]   ;;  %v9919_v5 = vld [vmem:[#allocation9 + $0x64] ss:$24 sps:$4 sm:$0xff]  }
 0xc58   : > { %v9914_v4 = vld [vmem:[#allocation9 + $0x390] ss:$24 sps:$4 sm:$0xff]   ;;  %v9922_v9 = vld [vmem:[#allocation9 + $0x364] ss:$24 sps:$4 sm:$0xff]  }
 0xc59   : > { %v4619_v11 = vadd.f32 %v9133_v6, %v9098_v25  ;;  %v9917_v25 = vld [vmem:[#allocation9 + $0x60] ss:$24 sps:$4 sm:$0xff]  }
 0xc5a   : > { %v9920_v6 = vld [vmem:[#allocation9 + $0x360] ss:$24 sps:$4 sm:$0xff]  }
 0xc5b   : > { %8512 = vmatmul.mubr.msk.f32.vlgmr.msra.gmra.mxu0 %vm4622_vm7, %v4619_v11 }
 0xc5c   : > { %4728 = vmatpush1.msra.mxu0 %v4480_v48  ;;  %4761 = vmatprep.mubr.f32.mxu0 %v12242_v43 }
 0xc5d   : > { %9134 = vmatprep.subr.mxu0 %v11583_v53  ;;  %v12243_v53 = vld [vmem:[#allocation22_spill] sm:$0xff] }
 0xc5f   : > { %8513 = vmatmul.mubr.msk.f32.vlgmr.msra.gmra.mxu0 %vm4622_vm7, %v4619_v11  ;;  %v9925_v11 = vld [vmem:[#allocation9 + $0x34] ss:$24 sps:$4 sm:$0xff]  }
 0xc60   : > { %9135 = vmatpush3.msra.mxu0 %v11593_v58  ;;  %v12244_v58 = vld [vmem:[#allocation23_spill] sm:$0xff] }
 0xc61   : > { %9136 = vmatprep.subr.mxu0 %v11605_v23  ;;  %v12245_v23 = vld [vmem:[#allocation24_spill] sm:$0xff] }
 0xc62   : > { %9137 = vmatpush3.msra.mxu0 %v11617_v56  ;;  %v12247_v56 = vld [vmem:[#allocation26_spill] sm:$0xff] }
 0xc63   : > { %9138 = vmatprep.subr.mxu0 %v11627_v59  ;;  %v12249_v59 = vld [vmem:[#allocation28_spill] sm:$0xff] }
 0xc64   : > { %9139 = vmatpush3.msra.mxu0 %v11639_v61  ;;  %v12251_v61 = vld [vmem:[#allocation30_spill] sm:$0xff] }
 0xc65   : > { %9140 = vmatprep.subr.mxu0 %v11651_v63  ;;  %v12253_v63 = vld [vmem:[#allocation32_spill] sm:$0xff] }
 0xc66   : > { %9141 = vmatpush3.msra.mxu0 %v11663_v1  ;;  %v12255_v1 = vld [vmem:[#allocation34_spill] sm:$0xff] }
 0xc67   : > { %9142 = vmatprep.subr.mxu0 %v11675_v3  ;;  %v12257_v3 = vld [vmem:[#allocation36_spill] sm:$0xff] }
 0xc68   : > { %9143 = vmatpush3.msra.mxu0 %v11687_v8  ;;  %v12259_v8 = vld [vmem:[#allocation38_spill] sm:$0xff] }
 0xc69   : > { %9144 = vmatprep.subr.mxu0 %v11699_v12 }
 0xc6a   : > { %9145 = vmatpush3.msra.mxu0 %v11711_v14 }
 0xc6b   : > { %9146 = vmatprep.subr.mxu0 %v11723_v16 }
 0xc6c   : > { %9147 = vmatpush3.msra.mxu0 %v11735_v20 }
 0xc6d   : > { %9148 = vmatprep.subr.mxu0 %v11747_v22 }
 0xc6e   : > { %9149 = vmatpush3.msra.mxu0 %v12243_v53  ;;  %v9923_v53 = vld [vmem:[#allocation9 + $0x30] ss:$24 sps:$4 sm:$0xff]  }
 0xc6f   : > { %9150 = vmatprep.subr.mxu0 %v12244_v58  ;;  %v9926_v58 = vld [vmem:[#allocation9 + $0x330] ss:$24 sps:$4 sm:$0xff]  }
 0xc70   : > { %9151 = vmatpush3.msra.mxu0 %v12245_v23  ;;  %v9931_v23 = vld [vmem:[#allocation9 + $0x4] ss:$24 sps:$4 sm:$0xff]  }
 0xc71   : > { %9152 = vmatprep.subr.mxu0 %v12246_v55  ;;  %v9934_v55 = vld [vmem:[#allocation9 + $0x304] ss:$24 sps:$4 sm:$0xff]  }
 0xc72   : > { %9153 = vmatpush3.msra.mxu0 %v12247_v56  ;;  %v9929_v56 = vld [vmem:[#allocation9] ss:$24 sps:$4 sm:$0xff]  }
 0xc73   : > { %9154 = vmatprep.subr.mxu0 %v12248_v57  ;;  %v9932_v57 = vld [vmem:[#allocation9 + $0x300] ss:$24 sps:$4 sm:$0xff]  }
 0xc74   : > { %9155 = vmatpush3.msra.mxu0 %v12249_v59  ;;  %v9937_v59 = vld [vmem:[#allocation9 + $0x2d4] ss:$24 sps:$4 sm:$0xff]  }
 0xc75   : > { %9156 = vmatprep.subr.mxu0 %v12250_v60  ;;  %v9940_v60 = vld [vmem:[#allocation9 + $0x5d4] ss:$24 sps:$4 sm:$0xff]  }
 0xc76   : > { %9157 = vmatpush3.msra.mxu0 %v12251_v61  ;;  %v9935_v61 = vld [vmem:[#allocation9 + $0x2d0] ss:$24 sps:$4 sm:$0xff]  }
 0xc77   : > { %9158 = vmatprep.subr.mxu0 %v12252_v62  ;;  %v9938_v62 = vld [vmem:[#allocation9 + $0x5d0] ss:$24 sps:$4 sm:$0xff]  }
 0xc78   : > { %9159 = vmatpush3.msra.mxu0 %v12253_v63  ;;  %v9943_v63 = vld [vmem:[#allocation9 + $0x2a4] ss:$24 sps:$4 sm:$0xff]  }
 0xc79   : > { %9160 = vmatprep.subr.mxu0 %v12254_v0  ;;  %v9946_v0 = vld [vmem:[#allocation9 + $0x5a4] ss:$24 sps:$4 sm:$0xff]  }
 0xc7a   : > { %9161 = vmatpush3.msra.mxu0 %v12255_v1  ;;  %v9941_v1 = vld [vmem:[#allocation9 + $0x2a0] ss:$24 sps:$4 sm:$0xff]  }
 0xc7b   : > { %9162 = vmatprep.subr.mxu0 %v12256_v2  ;;  %v9944_v2 = vld [vmem:[#allocation9 + $0x5a0] ss:$24 sps:$4 sm:$0xff]  }
 0xc7c   : > { %9163 = vmatpush3.msra.mxu0 %v12257_v3  ;;  %v9949_v3 = vld [vmem:[#allocation9 + $0x274] ss:$24 sps:$4 sm:$0xff]  }
 0xc7d   : > { %9164 = vmatprep.subr.mxu0 %v12258_v7  ;;  %v9952_v7 = vld [vmem:[#allocation9 + $0x574] ss:$24 sps:$4 sm:$0xff]  }
 0xc7e   : > { %9165 = vmatpush3.msra.mxu0 %v12259_v8  ;;  %v9947_v8 = vld [vmem:[#allocation9 + $0x270] ss:$24 sps:$4 sm:$0xff]  }
 0xc7f   : > { %4950 = vmatprep.subr.mxu0 %v4479_v46  ;;  %v9908_v46 = vld [vmem:[#allocation9 + $0x3c0] ss:$24 sps:$4 sm:$0xff]  }
 0xd1b   : > { %v4692_v10 = vpop.f32.mrf.mxu0 }
 0xd1c   : > { %v12052_v12 = vsub.f32 %v11963_v42, %v4692_v10  ;;  %v9950_v10 = vld [vmem:[#allocation9 + $0x570] ss:$24 sps:$4 sm:$0xff]  }
 0xd1d   : > { %v4694_v13 = vpop.f32.mrf.mxu0 }
 0xd1e   : > { %v12055_v14 = vsub.f32 %v11959_v38, %v4694_v13  ;;  %v4772_v19 = vmul.f32 %v12052_v12, %v12052_v12  ;;  %v9955_v13 = vld [vmem:[#allocation9 + $0x244] ss:$24 sps:$4 sm:$0xff]  }
 0xd1f   : > { %v4763_v15 = vpop.f32.mrf.mxu0 }
 0xd20   : > { %v4773_v16 = vmul.f32 %v12055_v14, %v12055_v14  ;;  %v12062_v20 = vsub.f32 %v11965_v27, %v4763_v15  ;;  %v9958_v15 = vld [vmem:[#allocation9 + $0x544] ss:$24 sps:$4 sm:$0xff]  }
 0xd21   : > { %v4765_v21 = vpop.f32.mrf.mxu0 }
 0xd22   : > { %v12065_v22 = vsub.f32 %v11961_v31, %v4765_v21  ;;  %4840 = vmatprep.mubr.f32.mxu0 %v4773_v16  ;;  %v4774_v26 = vmul.f32 %v12062_v20, %v12062_v20  ;;  %v9953_v16 = vld [vmem:[#allocation9 + $0x240] ss:$24 sps:$4 sm:$0xff]   ;;  %v9961_v21 = vld [vmem:[#allocation9 + $0x214] ss:$24 sps:$4 sm:$0xff]  }
 0xd23   : > { %4841 = vmatmul.mubr.f32.vlgmr.msra.gmra.mxu0 %v4772_v19  ;;  %v9956_v19 = vld [vmem:[#allocation9 + $0x540] ss:$24 sps:$4 sm:$0xff]  }
 0xd24   : > { %v4775_v42 = vmul.f32 %v12065_v22, %v12065_v22  ;;  %4951 = vmatpush1.msra.mxu0 %v12007_v47  ;;  %4984 = vmatprep.mubr.f32.mxu0 %v12242_v43  ;;  %v9913_v47 = vld [vmem:[#allocation9 + $0x94] ss:$24 sps:$4 sm:$0xff]  }
 0xd25   : > { %6426 = vmatprep.subr.bf16.mxu0 %v9889_v41  ;;  %v9962_v41 = vld [vmem:[#allocation9 + $0x510] ss:$24 sps:$4 sm:$0xff]  }
 0xd26   : > { %4910 = vmatprep.mubr.f32.mxu1 %v4775_v42  ;;  %v9964_v42 = vld [vmem:[#allocation9 + $0x514] ss:$24 sps:$4 sm:$0xff]  }
 0xd27   : > { %4911 = vmatmul.mubr.f32.vlgmr.msra.gmra.mxu1 %v4774_v26  ;;  %v9959_v26 = vld [vmem:[#allocation9 + $0x210] ss:$24 sps:$4 sm:$0xff]  }
 0xd28   : > { %5022 = vmatpush1.msra.mxu1 %v4480_v48  ;;  %5055 = vmatprep.mubr.f32.mxu1 %v12242_v43  ;;  %v9905_v43 = vld [vmem:[#allocation9 + $0xc0] ss:$24 sps:$4 sm:$0xff]   ;;  %v9928_v48 = vld [vmem:[#allocation9 + $0x334] ss:$24 sps:$4 sm:$0xff]  }
 0xd29   : > { %6467 = vmatprep.subr.bf16.mxu1 %v9892_v50  ;;  %v9967_v50 = vld [vmem:[#allocation9 + $0x1e4] ss:$24 sps:$4 sm:$0xff]  }
 0xde3   : > { %v9166_v27 = vpop.f32.mrf.mxu0 }
 0xde5   : > { %v9167_v30 = vpop.f32.mrf.mxu0 }
 0xde6   : > { %v9168_v31 = vadd.f32 %v9167_v30, %v9166_v27  ;;  %v9970_v27 = vld [vmem:[#allocation9 + $0x4e4] ss:$24 sps:$4 sm:$0xff]   ;;  %v9965_v30 = vld [vmem:[#allocation9 + $0x1e0] ss:$24 sps:$4 sm:$0xff]  }
 0xde7   : > { %v9201_v32 = vpop.f32.mrf.mxu1 }
 0xde8   : > { %v4843_v37 = vadd.f32 1e-05, %v9168_v31  ;;  %v9968_v31 = vld [vmem:[#allocation9 + $0x4e0] ss:$24 sps:$4 sm:$0xff]  }
 0xde9   : > { %v9202_v38 = vpop.f32.mrf.mxu1 }
 0xdea   : > { %v9203_v17 = vadd.f32 %v9202_v38, %v9201_v32  ;;  %v9973_v32 = vld [vmem:[#allocation9 + $0x1b4] ss:$24 sps:$4 sm:$0xff]  }
 0xdeb   : > { %v9976_v38 = vld [vmem:[#allocation9 + $0x4b4] ss:$24 sps:$4 sm:$0xff]  }
 0xdec   : > { %v4913_v24 = vadd.f32 %v9203_v17, %v4843_v37  ;;  %v9971_v37 = vld [vmem:[#allocation9 + $0x1b0] ss:$24 sps:$4 sm:$0xff]  }
 0xded   : > { %v9974_v17 = vld [vmem:[#allocation9 + $0x4b0] ss:$24 sps:$4 sm:$0xff]  }
 0xdee   : > { %10467 = vrsqrt.f32 %v4913_v24  ;;  %v9979_v24 = vld [vmem:[#allocation9 + $0x184] ss:$24 sps:$4 sm:$0xff]  }
 0xdfb   : > { %v10468_v33 = vpop.eup %10467 }
 0xdfc   : > { %8514 = vmatmul.mubr.msk.f32.vlgmr.msra.gmra.mxu0 %vm4622_vm7, %v10468_v33  ;;  %8515 = vmatmul.mubr.msk.f32.vlgmr.msra.gmra.mxu1 %vm4622_vm7, %v10468_v33  ;;  %v9988_v33 = vld [vmem:[#allocation9 + $0x45c] ss:$24 sps:$4 sm:$0xff]  }
 0xdfd   : > { %6427 = vmatpush1.bf16.msra.mxu0 %v9887_v28  ;;  %6468 = vmatpush1.bf16.msra.mxu1 %v9890_v18  ;;  %v9982_v28 = vld [vmem:[#allocation9 + $0x484] ss:$24 sps:$4 sm:$0xff]   ;;  %v9977_v18 = vld [vmem:[#allocation9 + $0x180] ss:$24 sps:$4 sm:$0xff]  }
 0xdfe   : > { %6428 = vmatprep.subr.bf16.mxu0 %v9895_v39  ;;  %6469 = vmatprep.subr.bf16.mxu1 %v9898_v52  ;;  %v9980_v39 = vld [vmem:[#allocation9 + $0x480] ss:$24 sps:$4 sm:$0xff]   ;;  %v9985_v52 = vld [vmem:[#allocation9 + $0x15c] ss:$24 sps:$4 sm:$0xff]  }
 0xe01   : > { %6429 = vmatpush1.bf16.msra.mxu0 %v9893_v29  ;;  %6470 = vmatpush1.bf16.msra.mxu1 %v9896_v45 }
 0xe02   : > { %6430 = vmatprep.subr.bf16.mxu0 %v9901_v49  ;;  %6471 = vmatprep.subr.bf16.mxu1 %v9904_v51 }
 0xe05   : > { %6431 = vmatpush1.bf16.msra.mxu0 %v9899_v35  ;;  %6472 = vmatpush1.bf16.msra.mxu1 %v9902_v54 }
 0xe06   : > { %6432 = vmatprep.subr.bf16.mxu0 %v9907_v34  ;;  %6473 = vmatprep.subr.bf16.mxu1 %v9910_v44 }
 0xe09   : > { %6433 = vmatpush1.bf16.msra.mxu0 %v9905_v43  ;;  %6474 = vmatpush1.bf16.msra.mxu1 %v9908_v46 }
 0xe0a   : > { %6434 = vmatprep.subr.bf16.mxu0 %v9913_v47  ;;  %6475 = vmatprep.subr.bf16.mxu1 %v9916_v36 }
 0xe0d   : > { %6435 = vmatpush1.bf16.msra.mxu0 %v9911_v40  ;;  %6476 = vmatpush1.bf16.msra.mxu1 %v9914_v4 }
 0xe0e   : > { %6436 = vmatprep.subr.bf16.mxu0 %v9919_v5  ;;  %6477 = vmatprep.subr.bf16.mxu1 %v9922_v9  ;;  %v9983_v5 = vld [vmem:[#allocation9 + $0x158] ss:$24 sps:$4 sm:$0xff]  }
 0xe0f   : > { %v9986_v9 = vld [vmem:[#allocation9 + $0x458] ss:$24 sps:$4 sm:$0xff]  }
 0xe11   : > { %6437 = vmatpush1.bf16.msra.mxu0 %v9917_v25  ;;  %6478 = vmatpush1.bf16.msra.mxu1 %v9920_v6  ;;  %v9992_v6 = vld [vmem:[#allocation9 + $0x428] ss:$24 sps:$4 sm:$0xff]  }
 0xe12   : > { %6438 = vmatprep.subr.bf16.mxu0 %v9925_v11  ;;  %6479 = vmatprep.subr.bf16.mxu1 %v9928_v48  ;;  %v9997_v11 = vld [vmem:[#allocation9 + $0xfc] ss:$24 sps:$4 sm:$0xff]  }
 0xe13   : > { %v10000_v48 = vld [vmem:[#allocation9 + $0x3fc] ss:$24 sps:$4 sm:$0xff]  }
 0xe15   : > { %6439 = vmatpush1.bf16.msra.mxu0 %v9923_v53  ;;  %6480 = vmatpush1.bf16.msra.mxu1 %v9926_v58  ;;  %v9995_v53 = vld [vmem:[#allocation9 + $0xf8] ss:$24 sps:$4 sm:$0xff]  }
 0xe16   : > { %6440 = vmatprep.subr.bf16.mxu0 %v9931_v23  ;;  %6481 = vmatprep.subr.bf16.mxu1 %v9934_v55  ;;  %v9998_v58 = vld [vmem:[#allocation9 + $0x3f8] ss:$24 sps:$4 sm:$0xff]   ;;  %v10003_v23 = vld [vmem:[#allocation9 + $0xcc] ss:$24 sps:$4 sm:$0xff]  }
 0xe17   : > { %v10006_v55 = vld [vmem:[#allocation9 + $0x3cc] ss:$24 sps:$4 sm:$0xff]  }
 0xe19   : > { %6441 = vmatpush1.bf16.msra.mxu0 %v9929_v56  ;;  %6482 = vmatpush1.bf16.msra.mxu1 %v9932_v57  ;;  %v10001_v56 = vld [vmem:[#allocation9 + $0xc8] ss:$24 sps:$4 sm:$0xff]  }
 0xe1a   : > { %6442 = vmatprep.subr.bf16.mxu0 %v9937_v59  ;;  %6483 = vmatprep.subr.bf16.mxu1 %v9940_v60  ;;  %v10004_v57 = vld [vmem:[#allocation9 + $0x3c8] ss:$24 sps:$4 sm:$0xff]   ;;  %v10009_v59 = vld [vmem:[#allocation9 + $0x9c] ss:$24 sps:$4 sm:$0xff]  }
 0xe1b   : > { %v10012_v60 = vld [vmem:[#allocation9 + $0x39c] ss:$24 sps:$4 sm:$0xff]  }
 0xe1d   : > { %6443 = vmatpush2.bf16.msra.mxu0 %v9935_v61  ;;  %6484 = vmatpush2.bf16.msra.mxu1 %v9938_v62  ;;  %v10007_v61 = vld [vmem:[#allocation9 + $0x98] ss:$24 sps:$4 sm:$0xff]  }
 0xe1e   : > { %6444 = vmatprep.subr.bf16.mxu0 %v9943_v63  ;;  %6485 = vmatprep.subr.bf16.mxu1 %v9946_v0  ;;  %v10010_v62 = vld [vmem:[#allocation9 + $0x398] ss:$24 sps:$4 sm:$0xff]   ;;  %v10015_v63 = vld [vmem:[#allocation9 + $0x6c] ss:$24 sps:$4 sm:$0xff]  }
 0xe1f   : > { %v10018_v0 = vld [vmem:[#allocation9 + $0x36c] ss:$24 sps:$4 sm:$0xff]  }
 0xe21   : > { %6445 = vmatpush2.bf16.msra.mxu0 %v9941_v1  ;;  %6486 = vmatpush2.bf16.msra.mxu1 %v9944_v2  ;;  %v10013_v1 = vld [vmem:[#allocation9 + $0x68] ss:$24 sps:$4 sm:$0xff]  }
 0xe22   : > { %6446 = vmatprep.subr.bf16.mxu0 %v9949_v3  ;;  %6487 = vmatprep.subr.bf16.mxu1 %v9952_v7  ;;  %v10016_v2 = vld [vmem:[#allocation9 + $0x368] ss:$24 sps:$4 sm:$0xff]   ;;  %v10021_v3 = vld [vmem:[#allocation9 + $0x3c] ss:$24 sps:$4 sm:$0xff]  }
 0xe23   : > { %v10024_v7 = vld [vmem:[#allocation9 + $0x33c] ss:$24 sps:$4 sm:$0xff]  }
 0xe25   : > { %6447 = vmatpush2.bf16.msra.mxu0 %v9947_v8  ;;  %6488 = vmatpush2.bf16.msra.mxu1 %v9950_v10  ;;  %v10019_v8 = vld [vmem:[#allocation9 + $0x38] ss:$24 sps:$4 sm:$0xff]  }
 0xe26   : > { %6448 = vmatprep.subr.bf16.mxu0 %v9955_v13  ;;  %6489 = vmatprep.subr.bf16.mxu1 %v9958_v15  ;;  %v10022_v10 = vld [vmem:[#allocation9 + $0x338] ss:$24 sps:$4 sm:$0xff]   ;;  %v10027_v13 = vld [vmem:[#allocation9 + $0xc] ss:$24 sps:$4 sm:$0xff]  }
 0xe27   : > { %v10030_v15 = vld [vmem:[#allocation9 + $0x30c] ss:$24 sps:$4 sm:$0xff]  }
 0xe29   : > { %6449 = vmatpush2.bf16.msra.mxu0 %v9953_v16  ;;  %6490 = vmatpush2.bf16.msra.mxu1 %v9956_v19  ;;  %v10025_v16 = vld [vmem:[#allocation9 + $0x8] ss:$24 sps:$4 sm:$0xff]  }
 0xe2a   : > { %6450 = vmatprep.subr.bf16.mxu0 %v9961_v21  ;;  %6491 = vmatprep.subr.bf16.mxu1 %v9964_v42  ;;  %v10028_v19 = vld [vmem:[#allocation9 + $0x308] ss:$24 sps:$4 sm:$0xff]   ;;  %v10033_v21 = vld [vmem:[#allocation9 + $0x2dc] ss:$24 sps:$4 sm:$0xff]  }
 0xe2b   : > { %v10036_v42 = vld [vmem:[#allocation9 + $0x5dc] ss:$24 sps:$4 sm:$0xff]  }
 0xe2d   : > { %6451 = vmatpush2.bf16.msra.mxu0 %v9959_v26  ;;  %6492 = vmatpush2.bf16.msra.mxu1 %v9962_v41  ;;  %v10031_v26 = vld [vmem:[#allocation9 + $0x2d8] ss:$24 sps:$4 sm:$0xff]  }
 0xe2e   : > { %6452 = vmatprep.subr.bf16.mxu0 %v9967_v50  ;;  %6493 = vmatprep.subr.bf16.mxu1 %v9970_v27  ;;  %v10034_v41 = vld [vmem:[#allocation9 + $0x5d8] ss:$24 sps:$4 sm:$0xff]   ;;  %v10039_v50 = vld [vmem:[#allocation9 + $0x2ac] ss:$24 sps:$4 sm:$0xff]  }
 0xe2f   : > { %v10042_v27 = vld [vmem:[#allocation9 + $0x5ac] ss:$24 sps:$4 sm:$0xff]  }
 0xe31   : > { %6453 = vmatpush2.bf16.msra.mxu0 %v9965_v30  ;;  %6494 = vmatpush2.bf16.msra.mxu1 %v9968_v31  ;;  %v10037_v30 = vld [vmem:[#allocation9 + $0x2a8] ss:$24 sps:$4 sm:$0xff]  }
 0xe32   : > { %6454 = vmatprep.subr.bf16.mxu0 %v9973_v32  ;;  %6495 = vmatprep.subr.bf16.mxu1 %v9976_v38  ;;  %v10040_v31 = vld [vmem:[#allocation9 + $0x5a8] ss:$24 sps:$4 sm:$0xff]   ;;  %v10045_v32 = vld [vmem:[#allocation9 + $0x27c] ss:$24 sps:$4 sm:$0xff]  }
 0xe33   : > { %v10048_v38 = vld [vmem:[#allocation9 + $0x57c] ss:$24 sps:$4 sm:$0xff]  }
 0xe35   : > { %6455 = vmatpush2.bf16.msra.mxu0 %v9971_v37  ;;  %6496 = vmatpush2.bf16.msra.mxu1 %v9974_v17  ;;  %v10043_v37 = vld [vmem:[#allocation9 + $0x278] ss:$24 sps:$4 sm:$0xff]  }
 0xe36   : > { %6456 = vmatprep.subr.bf16.mxu0 %v9979_v24  ;;  %6497 = vmatprep.subr.bf16.mxu1 %v9982_v28  ;;  %v10046_v17 = vld [vmem:[#allocation9 + $0x578] ss:$24 sps:$4 sm:$0xff]   ;;  %v10051_v24 = vld [vmem:[#allocation9 + $0x24c] ss:$24 sps:$4 sm:$0xff]  }
 0xe37   : > { %v10054_v28 = vld [vmem:[#allocation9 + $0x54c] ss:$24 sps:$4 sm:$0xff]  }
 0xe39   : > { %6457 = vmatpush2.bf16.msra.mxu0 %v9977_v18  ;;  %6498 = vmatpush2.bf16.msra.mxu1 %v9980_v39  ;;  %v10049_v18 = vld [vmem:[#allocation9 + $0x248] ss:$24 sps:$4 sm:$0xff]  }
 0xe3a   : > { %6508 = vmatprep.subr.bf16.mxu0 %v9985_v52  ;;  %6549 = vmatprep.subr.bf16.mxu1 %v9988_v33  ;;  %v10052_v39 = vld [vmem:[#allocation9 + $0x548] ss:$24 sps:$4 sm:$0xff]   ;;  %v10057_v52 = vld [vmem:[#allocation9 + $0x21c] ss:$24 sps:$4 sm:$0xff]  }
 0xe3b   : > { %v10060_v33 = vld [vmem:[#allocation9 + $0x51c] ss:$24 sps:$4 sm:$0xff]  }
 0xebc   : > { %v4986_v29 = vpop.f32.mrf.mxu0  ;;  %v5057_v45 = vpop.f32.mrf.mxu1 }
 0xebd   : > { %v5062_v49 = vmul.f32 %v4986_v29, %v12052_v12  ;;  %v5064_v51 = vmul.f32 %v5057_v45, %v12062_v20  ;;  %v9994_v20 = vld [vmem:[#allocation9 + $0x42c] ss:$24 sps:$4 sm:$0xff]   ;;  %v10055_v29 = vld [vmem:[#allocation9 + $0x218] ss:$24 sps:$4 sm:$0xff]  }
 0xebe   : > { %v4988_v35 = vpop.f32.mrf.mxu0  ;;  %v5059_v54 = vpop.f32.mrf.mxu1  ;;  %v10058_v45 = vld [vmem:[#allocation9 + $0x518] ss:$24 sps:$4 sm:$0xff]  }
 0xebf   : > { %v5063_v34 = vmul.f32 %v4988_v35, %v12055_v14  ;;  %v5065_v44 = vmul.f32 %v5059_v54, %v12065_v22  ;;  %v5266_v43 = vmax.f32 %v5062_v49, 0.0  ;;  %v5268_v46 = vmax.f32 %v5064_v51, 0.0  ;;  %v9991_v14 = vld [vmem:[#allocation9 + $0x12c] ss:$24 sps:$4 sm:$0xff]   ;;  %v9989_v22 = vld [vmem:[#allocation9 + $0x128] ss:$24 sps:$4 sm:$0xff]  }
 0xec0   : > { %v10063_v49 = vld [vmem:[#allocation9 + $0x1ec] ss:$24 sps:$4 sm:$0xff]   ;;  %v10061_v35 = vld [vmem:[#allocation9 + $0x1e8] ss:$24 sps:$4 sm:$0xff]  }
 0xec1   : > { %v5267_v47 = vmax.f32 %v5063_v34, 0.0  ;;  %v5269_v36 = vmax.f32 %v5065_v44, 0.0  ;;  %v12084_v25 = vpack.c.bf16 %v5266_v43, %v5266_v43  ;;  %v12086_v12 = vpack.c.bf16 %v5268_v46, %v5268_v46  ;;  %v10066_v51 = vld [vmem:[#allocation9 + $0x4ec] ss:$24 sps:$4 sm:$0xff]   ;;  %v10064_v54 = vld [vmem:[#allocation9 + $0x4e8] ss:$24 sps:$4 sm:$0xff]  }
 0xec2   : > { %v10069_v34 = vld [vmem:[#allocation9 + $0x1bc] ss:$24 sps:$4 sm:$0xff]   ;;  %v10067_v43 = vld [vmem:[#allocation9 + $0x1b8] ss:$24 sps:$4 sm:$0xff]  }
 0xec3   : > { %v12080_v40 = vpack.c.bf16 %v5267_v47, %v5267_v47  ;;  %v12082_v4 = vpack.c.bf16 %v5269_v36, %v5269_v36  ;;  %v10072_v44 = vld [vmem:[#allocation9 + $0x4bc] ss:$24 sps:$4 sm:$0xff]   ;;  %v10070_v46 = vld [vmem:[#allocation9 + $0x4b8] ss:$24 sps:$4 sm:$0xff]   ;;  %v10075_v47 = vld [vmem:[#allocation9 + $0x18c] ss:$24 sps:$4 sm:$0xff]  }
 0xec4   : > { %v10078_v36 = vld [vmem:[#allocation9 + $0x48c] ss:$24 sps:$4 sm:$0xff]  }
 0xec5   : > { %6458 = vmatprep.mubr.bf16.mxu0 %v12080_v40  ;;  %6499 = vmatprep.mubr.bf16.mxu1 %v12082_v4 }
 0xec6   : > { %6459 = vmatmul.mubr.bf16.vlgmr.msra.gmra.mxu0 %v12084_v25  ;;  %6500 = vmatmul.mubr.bf16.vlgmr.msra.gmra.mxu1 %v12086_v12 }
 0xec7   : > { %6509 = vmatpush1.bf16.msra.mxu0 %v9983_v5  ;;  %6550 = vmatpush1.bf16.msra.mxu1 %v9986_v9  ;;  %v10073_v5 = vld [vmem:[#allocation9 + $0x188] ss:$24 sps:$4 sm:$0xff]  }
 0xec8   : > { %6540 = vmatprep.mubr.bf16.mxu0 %v12080_v40  ;;  %6581 = vmatprep.mubr.bf16.mxu1 %v12082_v4  ;;  %v10076_v9 = vld [vmem:[#allocation9 + $0x488] ss:$24 sps:$4 sm:$0xff]  }
 0xec9   : > { %6510 = vmatprep.subr.bf16.mxu0 %v9991_v14  ;;  %6551 = vmatprep.subr.bf16.mxu1 %v9994_v20  ;;  %v10081_v14 = vld [vmem:[#allocation9 + $0x164] ss:$24 sps:$4 sm:$0xff]  }
 0xeca   : > { %v10084_v20 = vld [vmem:[#allocation9 + $0x464] ss:$24 sps:$4 sm:$0xff]  }
 0xecb   : > { %6511 = vmatpush1.bf16.msra.mxu0 %v9989_v22  ;;  %6552 = vmatpush1.bf16.msra.mxu1 %v9992_v6  ;;  %v10079_v22 = vld [vmem:[#allocation9 + $0x160] ss:$24 sps:$4 sm:$0xff]  }
 0xecc   : > { %6512 = vmatprep.subr.bf16.mxu0 %v9997_v11  ;;  %6553 = vmatprep.subr.bf16.mxu1 %v10000_v48  ;;  %v10082_v6 = vld [vmem:[#allocation9 + $0x460] ss:$24 sps:$4 sm:$0xff]   ;;  %v10087_v11 = vld [vmem:[#allocation9 + $0x134] ss:$24 sps:$4 sm:$0xff]  }
 0xecd   : > { %v10090_v48 = vld [vmem:[#allocation9 + $0x434] ss:$24 sps:$4 sm:$0xff]  }
 0xecf   : > { %6513 = vmatpush1.bf16.msra.mxu0 %v9995_v53  ;;  %6554 = vmatpush1.bf16.msra.mxu1 %v9998_v58  ;;  %v10085_v53 = vld [vmem:[#allocation9 + $0x130] ss:$24 sps:$4 sm:$0xff]  }
 0xed0   : > { %6514 = vmatprep.subr.bf16.mxu0 %v10003_v23  ;;  %6555 = vmatprep.subr.bf16.mxu1 %v10006_v55  ;;  %v10088_v58 = vld [vmem:[#allocation9 + $0x430] ss:$24 sps:$4 sm:$0xff]   ;;  %v10093_v23 = vld [vmem:[#allocation9 + $0x104] ss:$24 sps:$4 sm:$0xff]  }
 0xed1   : > { %v10096_v55 = vld [vmem:[#allocation9 + $0x404] ss:$24 sps:$4 sm:$0xff]  }
 0xed3   : > { %6515 = vmatpush1.bf16.msra.mxu0 %v10001_v56  ;;  %6556 = vmatpush1.bf16.msra.mxu1 %v10004_v57  ;;  %v10091_v56 = vld [vmem:[#allocation9 + $0x100] ss:$24 sps:$4 sm:$0xff]  }
 0xed4   : > { %6516 = vmatprep.subr.bf16.mxu0 %v10009_v59  ;;  %6557 = vmatprep.subr.bf16.mxu1 %v10012_v60  ;;  %v10094_v57 = vld [vmem:[#allocation9 + $0x400] ss:$24 sps:$4 sm:$0xff]   ;;  %v10099_v59 = vld [vmem:[#allocation9 + $0xd4] ss:$24 sps:$4 sm:$0xff]  }
 0xed5   : > { %v10102_v60 = vld [vmem:[#allocation9 + $0x3d4] ss:$24 sps:$4 sm:$0xff]  }
 0xed7   : > { %6517 = vmatpush1.bf16.msra.mxu0 %v10007_v61  ;;  %6558 = vmatpush1.bf16.msra.mxu1 %v10010_v62  ;;  %v10097_v61 = vld [vmem:[#allocation9 + $0xd0] ss:$24 sps:$4 sm:$0xff]   ;;  %v10105_v62 = vld [vmem:[#allocation9 + $0xa4] ss:$24 sps:$4 sm:$0xff]  }
 0xed8   : > { %6518 = vmatprep.subr.bf16.mxu0 %v10015_v63  ;;  %6559 = vmatprep.subr.bf16.mxu1 %v10018_v0  ;;  %v10103_v63 = vld [vmem:[#allocation9 + $0xa0] ss:$24 sps:$4 sm:$0xff]  }
 0xed9   : > { %v10106_v0 = vld [vmem:[#allocation9 + $0x3a0] ss:$24 sps:$4 sm:$0xff]  }
 0xedb   : > { %6519 = vmatpush1.bf16.msra.mxu0 %v10013_v1  ;;  %6560 = vmatpush1.bf16.msra.mxu1 %v10016_v2  ;;  %v10111_v1 = vld [vmem:[#allocation9 + $0x74] ss:$24 sps:$4 sm:$0xff]  }
 0xedc   : > { %6520 = vmatprep.subr.bf16.mxu0 %v10021_v3  ;;  %6561 = vmatprep.subr.bf16.mxu1 %v10024_v7  ;;  %v10114_v2 = vld [vmem:[#allocation9 + $0x374] ss:$24 sps:$4 sm:$0xff]   ;;  %v10109_v3 = vld [vmem:[#allocation9 + $0x70] ss:$24 sps:$4 sm:$0xff]  }
 0xedd   : > { %v10112_v7 = vld [vmem:[#allocation9 + $0x370] ss:$24 sps:$4 sm:$0xff]  }
 0xedf   : > { %6521 = vmatpush1.bf16.msra.mxu0 %v10019_v8  ;;  %6562 = vmatpush1.bf16.msra.mxu1 %v10022_v10  ;;  %v10117_v8 = vld [vmem:[#allocation9 + $0x44] ss:$24 sps:$4 sm:$0xff]  }
 0xee0   : > { %6522 = vmatprep.subr.bf16.mxu0 %v10027_v13  ;;  %6563 = vmatprep.subr.bf16.mxu1 %v10030_v15  ;;  %v10120_v10 = vld [vmem:[#allocation9 + $0x344] ss:$24 sps:$4 sm:$0xff]   ;;  %v10115_v13 = vld [vmem:[#allocation9 + $0x40] ss:$24 sps:$4 sm:$0xff]  }
 0xee1   : > { %v10118_v15 = vld [vmem:[#allocation9 + $0x340] ss:$24 sps:$4 sm:$0xff]  }
 0xee3   : > { %6523 = vmatpush1.bf16.msra.mxu0 %v10025_v16  ;;  %6564 = vmatpush1.bf16.msra.mxu1 %v10028_v19  ;;  %v10123_v16 = vld [vmem:[#allocation9 + $0x14] ss:$24 sps:$4 sm:$0xff]  }
 0xee4   : > { %6524 = vmatprep.subr.bf16.mxu0 %v10033_v21  ;;  %6565 = vmatprep.subr.bf16.mxu1 %v10036_v42  ;;  %v10126_v19 = vld [vmem:[#allocation9 + $0x314] ss:$24 sps:$4 sm:$0xff]   ;;  %v10121_v21 = vld [vmem:[#allocation9 + $0x10] ss:$24 sps:$4 sm:$0xff]  }
 0xee5   : > { %v10124_v42 = vld [vmem:[#allocation9 + $0x310] ss:$24 sps:$4 sm:$0xff]  }
 0xee7   : > { %6525 = vmatpush2.bf16.msra.mxu0 %v10031_v26  ;;  %6566 = vmatpush2.bf16.msra.mxu1 %v10034_v41  ;;  %v10129_v26 = vld [vmem:[#allocation9 + $0x2e4] ss:$24 sps:$4 sm:$0xff]  }
 0xee8   : > { %6526 = vmatprep.subr.bf16.mxu0 %v10039_v50  ;;  %6567 = vmatprep.subr.bf16.mxu1 %v10042_v27  ;;  %v10132_v41 = vld [vmem:[#allocation9 + $0x5e4] ss:$24 sps:$4 sm:$0xff]   ;;  %v10127_v50 = vld [vmem:[#allocation9 + $0x2e0] ss:$24 sps:$4 sm:$0xff]  }
 0xee9   : > { %v10130_v27 = vld [vmem:[#allocation9 + $0x5e0] ss:$24 sps:$4 sm:$0xff]  }
 0xeeb   : > { %6527 = vmatpush2.bf16.msra.mxu0 %v10037_v30  ;;  %6568 = vmatpush2.bf16.msra.mxu1 %v10040_v31  ;;  %v10135_v30 = vld [vmem:[#allocation9 + $0x2b4] ss:$24 sps:$4 sm:$0xff]  }
 0xeec   : > { %6528 = vmatprep.subr.bf16.mxu0 %v10045_v32  ;;  %6569 = vmatprep.subr.bf16.mxu1 %v10048_v38  ;;  %v10138_v31 = vld [vmem:[#allocation9 + $0x5b4] ss:$24 sps:$4 sm:$0xff]   ;;  %v10133_v32 = vld [vmem:[#allocation9 + $0x2b0] ss:$24 sps:$4 sm:$0xff]  }
 0xeed   : > { %v10136_v38 = vld [vmem:[#allocation9 + $0x5b0] ss:$24 sps:$4 sm:$0xff]  }
 0xeef   : > { %6529 = vmatpush2.bf16.msra.mxu0 %v10043_v37  ;;  %6570 = vmatpush2.bf16.msra.mxu1 %v10046_v17  ;;  %v10141_v37 = vld [vmem:[#allocation9 + $0x284] ss:$24 sps:$4 sm:$0xff]  }
 0xef0   : > { %6530 = vmatprep.subr.bf16.mxu0 %v10051_v24  ;;  %6571 = vmatprep.subr.bf16.mxu1 %v10054_v28  ;;  %v10144_v17 = vld [vmem:[#allocation9 + $0x584] ss:$24 sps:$4 sm:$0xff]   ;;  %v10139_v24 = vld [vmem:[#allocation9 + $0x280] ss:$24 sps:$4 sm:$0xff]  }
 0xef1   : > { %v10142_v28 = vld [vmem:[#allocation9 + $0x580] ss:$24 sps:$4 sm:$0xff]  }
 0xef3   : > { %6531 = vmatpush2.bf16.msra.mxu0 %v10049_v18  ;;  %6572 = vmatpush2.bf16.msra.mxu1 %v10052_v39  ;;  %v10147_v18 = vld [vmem:[#allocation9 + $0x254] ss:$24 sps:$4 sm:$0xff]  }
 0xef4   : > { %6532 = vmatprep.subr.bf16.mxu0 %v10057_v52  ;;  %6573 = vmatprep.subr.bf16.mxu1 %v10060_v33  ;;  %v10150_v39 = vld [vmem:[#allocation9 + $0x554] ss:$24 sps:$4 sm:$0xff]   ;;  %v10145_v52 = vld [vmem:[#allocation9 + $0x250] ss:$24 sps:$4 sm:$0xff]  }
 0xef5   : > { %v10148_v33 = vld [vmem:[#allocation9 + $0x550] ss:$24 sps:$4 sm:$0xff]  }
 0xef7   : > { %6533 = vmatpush2.bf16.msra.mxu0 %v10055_v29  ;;  %6574 = vmatpush2.bf16.msra.mxu1 %v10058_v45  ;;  %v10153_v29 = vld [vmem:[#allocation9 + $0x224] ss:$24 sps:$4 sm:$0xff]  }
 0xef8   : > { %6534 = vmatprep.subr.bf16.mxu0 %v10063_v49  ;;  %6575 = vmatprep.subr.bf16.mxu1 %v10066_v51  ;;  %v10156_v45 = vld [vmem:[#allocation9 + $0x524] ss:$24 sps:$4 sm:$0xff]   ;;  %v10151_v49 = vld [vmem:[#allocation9 + $0x220] ss:$24 sps:$4 sm:$0xff]  }
 0xef9   : > { %v10154_v51 = vld [vmem:[#allocation9 + $0x520] ss:$24 sps:$4 sm:$0xff]  }
 0xefb   : > { %6535 = vmatpush2.bf16.msra.mxu0 %v10061_v35  ;;  %6576 = vmatpush2.bf16.msra.mxu1 %v10064_v54  ;;  %v10159_v35 = vld [vmem:[#allocation9 + $0x1f4] ss:$24 sps:$4 sm:$0xff]  }
 0xefc   : > { %6536 = vmatprep.subr.bf16.mxu0 %v10069_v34  ;;  %6577 = vmatprep.subr.bf16.mxu1 %v10072_v44  ;;  %v10162_v54 = vld [vmem:[#allocation9 + $0x4f4] ss:$24 sps:$4 sm:$0xff]   ;;  %v10157_v34 = vld [vmem:[#allocation9 + $0x1f0] ss:$24 sps:$4 sm:$0xff]  }
 0xefd   : > { %v10160_v44 = vld [vmem:[#allocation9 + $0x4f0] ss:$24 sps:$4 sm:$0xff]  }
 0xeff   : > { %6537 = vmatpush2.bf16.msra.mxu0 %v10067_v43  ;;  %6578 = vmatpush2.bf16.msra.mxu1 %v10070_v46  ;;  %v10165_v43 = vld [vmem:[#allocation9 + $0x1c4] ss:$24 sps:$4 sm:$0xff]  }
 0xf00   : > { %6538 = vmatprep.subr.bf16.mxu0 %v10075_v47  ;;  %6579 = vmatprep.subr.bf16.mxu1 %v10078_v36  ;;  %v10168_v46 = vld [vmem:[#allocation9 + $0x4c4] ss:$24 sps:$4 sm:$0xff]   ;;  %v10163_v47 = vld [vmem:[#allocation9 + $0x1c0] ss:$24 sps:$4 sm:$0xff]  }
 0xf01   : > { %v10166_v36 = vld [vmem:[#allocation9 + $0x4c0] ss:$24 sps:$4 sm:$0xff]  }
 0xf03   : > { %6539 = vmatpush2.bf16.msra.mxu0 %v10073_v5  ;;  %6580 = vmatpush2.bf16.msra.mxu1 %v10076_v9  ;;  %v10171_v5 = vld [vmem:[#allocation9 + $0x194] ss:$24 sps:$4 sm:$0xff]  }
 0xf04   : > { %6590 = vmatprep.subr.bf16.mxu0 %v10081_v14  ;;  %6631 = vmatprep.subr.bf16.mxu1 %v10084_v20  ;;  %v10174_v9 = vld [vmem:[#allocation9 + $0x494] ss:$24 sps:$4 sm:$0xff]   ;;  %v10169_v14 = vld [vmem:[#allocation9 + $0x190] ss:$24 sps:$4 sm:$0xff]  }
 0xf05   : > { %v10172_v20 = vld [vmem:[#allocation9 + $0x490] ss:$24 sps:$4 sm:$0xff]  }
 0xf06   : > { %6541 = vmatmul.mubr.bf16.vlgmr.msra.gmra.mxu0 %v12084_v25  ;;  %6582 = vmatmul.mubr.bf16.vlgmr.msra.gmra.mxu1 %v12086_v12 }
 0xf07   : > { %6591 = vmatpush1.bf16.msra.mxu0 %v10079_v22  ;;  %6622 = vmatprep.mubr.bf16.mxu0 %v12080_v40  ;;  %v10100_v40 = vld [vmem:[#allocation9 + $0x3d0] ss:$24 sps:$4 sm:$0xff]   ;;  %v10177_v22 = vld [vmem:[#allocation7 + $0x154] ss:$24 sps:$4 sm:$0xff]  }
 0xf08   : > { %6632 = vmatpush1.bf16.msra.mxu1 %v10082_v6  ;;  %6663 = vmatprep.mubr.bf16.mxu1 %v12082_v4  ;;  %v10108_v4 = vld [vmem:[#allocation9 + $0x3a4] ss:$24 sps:$4 sm:$0xff]   ;;  %v10180_v6 = vld [vmem:[#allocation7 + $0x454] ss:$24 sps:$4 sm:$0xff]  }
 0xf09   : > { %6592 = vmatprep.subr.bf16.mxu0 %v10087_v11  ;;  %6633 = vmatprep.subr.bf16.mxu1 %v10090_v48  ;;  %v12260_v11 = vld [vmem:[#allocation19_spill] sm:$0xff] }
 0xf0a   : > { %v5067_v48 = vmax.f32 %v12260_v11, 0.0  ;;  %v10267_v11 = vld [vmem:[#allocation7 + $0x184] ss:$24 sps:$4 sm:$0xff]  }
 0xf0b   : > { %6593 = vmatpush1.bf16.msra.mxu0 %v10085_v53  ;;  %v10175_v53 = vld [vmem:[#allocation7 + $0x150] ss:$24 sps:$4 sm:$0xff]  }
 0xf0c   : > { %6634 = vmatpush1.bf16.msra.mxu1 %v10088_v58  ;;  %6594 = vmatprep.subr.bf16.mxu0 %v10093_v23  ;;  %v12261_v58 = vld [vmem:[#allocation21_spill] sm:$0xff] }
 0xf0d   : > { %6635 = vmatprep.subr.bf16.mxu1 %v10096_v55  ;;  %v5069_v23 = vmax.f32 %v12261_v58, 0.0  ;;  %v10178_v55 = vld [vmem:[#allocation7 + $0x450] ss:$24 sps:$4 sm:$0xff]   ;;  %v10268_v58 = vld [vmem:[#allocation7 + $0x480] ss:$24 sps:$4 sm:$0xff]  }
 0xf0f   : > { %6595 = vmatpush1.bf16.msra.mxu0 %v10091_v56  ;;  %v10183_v56 = vld [vmem:[#allocation7 + $0x124] ss:$24 sps:$4 sm:$0xff]  }
 0xf10   : > { %6636 = vmatpush1.bf16.msra.mxu1 %v10094_v57  ;;  %6596 = vmatprep.subr.bf16.mxu0 %v10099_v59  ;;  %v12101_v57 = vpack.c.bf16 %v5067_v48, %v5067_v48  ;;  %v10186_v59 = vld [vmem:[#allocation7 + $0x424] ss:$24 sps:$4 sm:$0xff]  }
 0xf11   : > { %6637 = vmatprep.subr.bf16.mxu1 %v10102_v60  ;;  %v12104_v60 = vpack.c.bf16 %v5069_v23, %v5069_v23  ;;  %v10270_v48 = vld [vmem:[#allocation7 + $0x484] ss:$24 sps:$4 sm:$0xff]   ;;  %v12262_v23 = vld [vmem:[#allocation18_spill] sm:$0xff] }
 0xf13   : > { %6597 = vmatpush1.bf16.msra.mxu0 %v10097_v61  ;;  %v10181_v61 = vld [vmem:[#allocation7 + $0x120] ss:$24 sps:$4 sm:$0xff]  }
 0xf14   : > { %6638 = vmatpush1.bf16.msra.mxu1 %v10100_v40  ;;  %6598 = vmatprep.subr.bf16.mxu0 %v10105_v62  ;;  %v10184_v40 = vld [vmem:[#allocation7 + $0x420] ss:$24 sps:$4 sm:$0xff]   ;;  %v10189_v62 = vld [vmem:[#allocation7 + $0xf4] ss:$24 sps:$4 sm:$0xff]  }
 0xf15   : > { %6639 = vmatprep.subr.bf16.mxu1 %v10108_v4  ;;  %v10192_v4 = vld [vmem:[#allocation7 + $0x3f4] ss:$24 sps:$4 sm:$0xff]  }
 0xf17   : > { %6599 = vmatpush1.bf16.msra.mxu0 %v10103_v63  ;;  %v10190_v63 = vld [vmem:[#allocation7 + $0x3f0] ss:$24 sps:$4 sm:$0xff]  }
 0xf18   : > { %6640 = vmatpush1.bf16.msra.mxu1 %v10106_v0  ;;  %6600 = vmatprep.subr.bf16.mxu0 %v10111_v1  ;;  %v10198_v0 = vld [vmem:[#allocation7 + $0x3c4] ss:$24 sps:$4 sm:$0xff]   ;;  %v10193_v1 = vld [vmem:[#allocation7 + $0xc0] ss:$24 sps:$4 sm:$0xff]  }
 0xf19   : > { %6641 = vmatprep.subr.bf16.mxu1 %v10114_v2  ;;  %v10196_v2 = vld [vmem:[#allocation7 + $0x3c0] ss:$24 sps:$4 sm:$0xff]  }
 0xf1b   : > { %6601 = vmatpush1.bf16.msra.mxu0 %v10109_v3  ;;  %v10201_v3 = vld [vmem:[#allocation7 + $0x94] ss:$24 sps:$4 sm:$0xff]  }
 0xf1c   : > { %6642 = vmatpush1.bf16.msra.mxu1 %v10112_v7  ;;  %6602 = vmatprep.subr.bf16.mxu0 %v10117_v8  ;;  %v10204_v7 = vld [vmem:[#allocation7 + $0x394] ss:$24 sps:$4 sm:$0xff]   ;;  %v10199_v8 = vld [vmem:[#allocation7 + $0x90] ss:$24 sps:$4 sm:$0xff]  }
 0xf1d   : > { %6643 = vmatprep.subr.bf16.mxu1 %v10120_v10  ;;  %v10202_v10 = vld [vmem:[#allocation7 + $0x390] ss:$24 sps:$4 sm:$0xff]  }
 0xf1f   : > { %6603 = vmatpush1.bf16.msra.mxu0 %v10115_v13  ;;  %v10207_v13 = vld [vmem:[#allocation7 + $0x64] ss:$24 sps:$4 sm:$0xff]  }
 0xf20   : > { %6644 = vmatpush1.bf16.msra.mxu1 %v10118_v15  ;;  %6604 = vmatprep.subr.bf16.mxu0 %v10123_v16  ;;  %v10210_v15 = vld [vmem:[#allocation7 + $0x364] ss:$24 sps:$4 sm:$0xff]   ;;  %v10205_v16 = vld [vmem:[#allocation7 + $0x60] ss:$24 sps:$4 sm:$0xff]  }
 0xf21   : > { %6645 = vmatprep.subr.bf16.mxu1 %v10126_v19  ;;  %v10208_v19 = vld [vmem:[#allocation7 + $0x360] ss:$24 sps:$4 sm:$0xff]  }
 0xf23   : > { %6605 = vmatpush1.bf16.msra.mxu0 %v10121_v21  ;;  %v10213_v21 = vld [vmem:[#allocation7 + $0x34] ss:$24 sps:$4 sm:$0xff]  }
 0xf24   : > { %6646 = vmatpush1.bf16.msra.mxu1 %v10124_v42  ;;  %6606 = vmatprep.subr.bf16.mxu0 %v10129_v26  ;;  %v10216_v42 = vld [vmem:[#allocation7 + $0x334] ss:$24 sps:$4 sm:$0xff]   ;;  %v10211_v26 = vld [vmem:[#allocation7 + $0x30] ss:$24 sps:$4 sm:$0xff]  }
 0xf25   : > { %6647 = vmatprep.subr.bf16.mxu1 %v10132_v41  ;;  %v10214_v41 = vld [vmem:[#allocation7 + $0x330] ss:$24 sps:$4 sm:$0xff]  }
 0xf27   : > { %6607 = vmatpush2.bf16.msra.mxu0 %v10127_v50  ;;  %v10219_v50 = vld [vmem:[#allocation7 + $0x4] ss:$24 sps:$4 sm:$0xff]  }
 0xf28   : > { %6648 = vmatpush2.bf16.msra.mxu1 %v10130_v27  ;;  %6608 = vmatprep.subr.bf16.mxu0 %v10135_v30  ;;  %v10222_v27 = vld [vmem:[#allocation7 + $0x304] ss:$24 sps:$4 sm:$0xff]   ;;  %v10217_v30 = vld [vmem:[#allocation7] ss:$24 sps:$4 sm:$0xff]  }
 0xf29   : > { %6649 = vmatprep.subr.bf16.mxu1 %v10138_v31  ;;  %v10220_v31 = vld [vmem:[#allocation7 + $0x300] ss:$24 sps:$4 sm:$0xff]  }
 0xf2b   : > { %6609 = vmatpush2.bf16.msra.mxu0 %v10133_v32  ;;  %v10225_v32 = vld [vmem:[#allocation7 + $0x2d4] ss:$24 sps:$4 sm:$0xff]  }
 0xf2c   : > { %6650 = vmatpush2.bf16.msra.mxu1 %v10136_v38  ;;  %6610 = vmatprep.subr.bf16.mxu0 %v10141_v37  ;;  %v10228_v38 = vld [vmem:[#allocation7 + $0x5d4] ss:$24 sps:$4 sm:$0xff]   ;;  %v10223_v37 = vld [vmem:[#allocation7 + $0x2d0] ss:$24 sps:$4 sm:$0xff]  }
 0xf2d   : > { %6651 = vmatprep.subr.bf16.mxu1 %v10144_v17  ;;  %v10226_v17 = vld [vmem:[#allocation7 + $0x5d0] ss:$24 sps:$4 sm:$0xff]  }
 0xf2f   : > { %6611 = vmatpush2.bf16.msra.mxu0 %v10139_v24  ;;  %v10231_v24 = vld [vmem:[#allocation7 + $0x2a4] ss:$24 sps:$4 sm:$0xff]  }
 0xf30   : > { %6652 = vmatpush2.bf16.msra.mxu1 %v10142_v28  ;;  %6612 = vmatprep.subr.bf16.mxu0 %v10147_v18  ;;  %v10234_v28 = vld [vmem:[#allocation7 + $0x5a4] ss:$24 sps:$4 sm:$0xff]   ;;  %v10229_v18 = vld [vmem:[#allocation7 + $0x2a0] ss:$24 sps:$4 sm:$0xff]  }
 0xf31   : > { %6653 = vmatprep.subr.bf16.mxu1 %v10150_v39  ;;  %v10232_v39 = vld [vmem:[#allocation7 + $0x5a0] ss:$24 sps:$4 sm:$0xff]  }
 0xf33   : > { %6613 = vmatpush2.bf16.msra.mxu0 %v10145_v52  ;;  %v10237_v52 = vld [vmem:[#allocation7 + $0x274] ss:$24 sps:$4 sm:$0xff]  }
 0xf34   : > { %6654 = vmatpush2.bf16.msra.mxu1 %v10148_v33  ;;  %6614 = vmatprep.subr.bf16.mxu0 %v10153_v29  ;;  %v10240_v33 = vld [vmem:[#allocation7 + $0x574] ss:$24 sps:$4 sm:$0xff]   ;;  %v10235_v29 = vld [vmem:[#allocation7 + $0x270] ss:$24 sps:$4 sm:$0xff]  }
 0xf35   : > { %6655 = vmatprep.subr.bf16.mxu1 %v10156_v45  ;;  %v10238_v45 = vld [vmem:[#allocation7 + $0x570] ss:$24 sps:$4 sm:$0xff]  }
 0xf37   : > { %6615 = vmatpush2.bf16.msra.mxu0 %v10151_v49  ;;  %v10243_v49 = vld [vmem:[#allocation7 + $0x244] ss:$24 sps:$4 sm:$0xff]  }
 0xf38   : > { %6656 = vmatpush2.bf16.msra.mxu1 %v10154_v51  ;;  %6616 = vmatprep.subr.bf16.mxu0 %v10159_v35  ;;  %v10246_v51 = vld [vmem:[#allocation7 + $0x544] ss:$24 sps:$4 sm:$0xff]   ;;  %v10241_v35 = vld [vmem:[#allocation7 + $0x240] ss:$24 sps:$4 sm:$0xff]  }
 0xf39   : > { %6657 = vmatprep.subr.bf16.mxu1 %v10162_v54  ;;  %v10244_v54 = vld [vmem:[#allocation7 + $0x540] ss:$24 sps:$4 sm:$0xff]  }
 0xf3b   : > { %6617 = vmatpush2.bf16.msra.mxu0 %v10157_v34  ;;  %v10249_v34 = vld [vmem:[#allocation7 + $0x214] ss:$24 sps:$4 sm:$0xff]  }
 0xf3c   : > { %6658 = vmatpush2.bf16.msra.mxu1 %v10160_v44  ;;  %6618 = vmatprep.subr.bf16.mxu0 %v10165_v43  ;;  %v10252_v44 = vld [vmem:[#allocation7 + $0x514] ss:$24 sps:$4 sm:$0xff]   ;;  %v10247_v43 = vld [vmem:[#allocation7 + $0x210] ss:$24 sps:$4 sm:$0xff]  }
 0xf3d   : > { %6659 = vmatprep.subr.bf16.mxu1 %v10168_v46  ;;  %v10250_v46 = vld [vmem:[#allocation7 + $0x510] ss:$24 sps:$4 sm:$0xff]  }
 0xf3f   : > { %6619 = vmatpush2.bf16.msra.mxu0 %v10163_v47  ;;  %v10255_v47 = vld [vmem:[#allocation7 + $0x1e4] ss:$24 sps:$4 sm:$0xff]  }
 0xf40   : > { %6660 = vmatpush2.bf16.msra.mxu1 %v10166_v36  ;;  %6620 = vmatprep.subr.bf16.mxu0 %v10171_v5  ;;  %v10258_v36 = vld [vmem:[#allocation7 + $0x4e4] ss:$24 sps:$4 sm:$0xff]   ;;  %v10253_v5 = vld [vmem:[#allocation7 + $0x1e0] ss:$24 sps:$4 sm:$0xff]  }
 0xf41   : > { %6661 = vmatprep.subr.bf16.mxu1 %v10174_v9  ;;  %v10256_v9 = vld [vmem:[#allocation7 + $0x4e0] ss:$24 sps:$4 sm:$0xff]  }
 0xf43   : > { %6621 = vmatpush2.bf16.msra.mxu0 %v10169_v14  ;;  %v10261_v14 = vld [vmem:[#allocation7 + $0x1b4] ss:$24 sps:$4 sm:$0xff]  }
 0xf44   : > { %6662 = vmatpush2.bf16.msra.mxu1 %v10172_v20  ;;  %7632 = vmatprep.subr.bf16.mxu0 %v10177_v22  ;;  %v10264_v20 = vld [vmem:[#allocation7 + $0x4b4] ss:$24 sps:$4 sm:$0xff]   ;;  %v10259_v22 = vld [vmem:[#allocation7 + $0x1b0] ss:$24 sps:$4 sm:$0xff]  }
 0xf45   : > { %7673 = vmatprep.subr.bf16.mxu1 %v10180_v6  ;;  %v10262_v6 = vld [vmem:[#allocation7 + $0x4b0] ss:$24 sps:$4 sm:$0xff]  }
 0xf46   : > { %6623 = vmatmul.mubr.bf16.vlgmr.msra.gmra.mxu0 %v12084_v25  ;;  %v10187_v25 = vld [vmem:[#allocation7 + $0xf0] ss:$24 sps:$4 sm:$0xff]  }
 0xf47   : > { %6664 = vmatmul.mubr.bf16.vlgmr.msra.gmra.mxu1 %v12086_v12  ;;  %7633 = vmatpush1.bf16.msra.mxu0 %v10175_v53  ;;  %v10195_v12 = vld [vmem:[#allocation7 + $0xc4] ss:$24 sps:$4 sm:$0xff]   ;;  %v10265_v53 = vld [vmem:[#allocation7 + $0x180] ss:$24 sps:$4 sm:$0xff]  }
 0xf48   : > { %7664 = vmatprep.mubr.bf16.mxu0 %v12101_v57  ;;  %7674 = vmatpush1.bf16.msra.mxu1 %v10178_v55  ;;  %v5066_v55 = vmax.f32 %v12262_v23, 0.0  ;;  %v10337_v23 = vld [vmem:[#allocation7 + $0x248] ss:$24 sps:$4 sm:$0xff]  }
 0xf49   : > { %7705 = vmatprep.mubr.bf16.mxu1 %v12104_v60  ;;  %7634 = vmatprep.subr.bf16.mxu0 %v10183_v56  ;;  %v10273_v56 = vld [vmem:[#allocation7 + $0x15c] ss:$24 sps:$4 sm:$0xff]  }
 0xf4a   : > { %7675 = vmatprep.subr.bf16.mxu1 %v10186_v59  ;;  %v12263_v59 = vld [vmem:[#allocation20_spill] sm:$0xff] }
 0xf4b   : > { %7635 = vmatpush1.bf16.msra.mxu0 %v10181_v61  ;;  %v5068_v61 = vmax.f32 %v12263_v59, 0.0  ;;  %v10348_v59 = vld [vmem:[#allocation7 + $0x51c] ss:$24 sps:$4 sm:$0xff]  }
 0xf4c   : > { %7676 = vmatpush1.bf16.msra.mxu1 %v10184_v40  ;;  %7636 = vmatprep.subr.bf16.mxu0 %v10189_v62  ;;  %v10276_v40 = vld [vmem:[#allocation7 + $0x45c] ss:$24 sps:$4 sm:$0xff]   ;;  %v10271_v62 = vld [vmem:[#allocation7 + $0x158] ss:$24 sps:$4 sm:$0xff]  }
 0xf4d   : > { %7677 = vmatprep.subr.bf16.mxu1 %v10192_v4  ;;  %v12110_v4 = vpack.c.bf16 %v5066_v55, %v5066_v55  ;;  %v10340_v55 = vld [vmem:[#allocation7 + $0x548] ss:$24 sps:$4 sm:$0xff]  }
 0xf4f   : > { %7637 = vmatpush1.bf16.msra.mxu0 %v10187_v25  ;;  %v10274_v25 = vld [vmem:[#allocation7 + $0x458] ss:$24 sps:$4 sm:$0xff]  }
 0xf50   : > { %7678 = vmatpush1.bf16.msra.mxu1 %v10190_v63  ;;  %7638 = vmatprep.subr.bf16.mxu0 %v10195_v12  ;;  %v12112_v63 = vpack.c.bf16 %v5068_v61, %v5068_v61  ;;  %v10279_v12 = vld [vmem:[#allocation7 + $0x12c] ss:$24 sps:$4 sm:$0xff]   ;;  %v10343_v61 = vld [vmem:[#allocation7 + $0x218] ss:$24 sps:$4 sm:$0xff]  }
 0xf51   : > { %7679 = vmatprep.subr.bf16.mxu1 %v10198_v0 }
 0xf53   : > { %7639 = vmatpush1.bf16.msra.mxu0 %v10193_v1 }
 0xf54   : > { %7680 = vmatpush1.bf16.msra.mxu1 %v10196_v2  ;;  %7640 = vmatprep.subr.bf16.mxu0 %v10201_v3  ;;  %v10282_v2 = vld [vmem:[#allocation7 + $0x42c] ss:$24 sps:$4 sm:$0xff]  }
 0xf55   : > { %7681 = vmatprep.subr.bf16.mxu1 %v10204_v7  ;;  %v10277_v7 = vld [vmem:[#allocation7 + $0x128] ss:$24 sps:$4 sm:$0xff]  }
 0xf57   : > { %7641 = vmatpush1.bf16.msra.mxu0 %v10199_v8 }
 0xf58   : > { %7682 = vmatpush1.bf16.msra.mxu1 %v10202_v10  ;;  %7642 = vmatprep.subr.bf16.mxu0 %v10207_v13  ;;  %v10280_v13 = vld [vmem:[#allocation7 + $0x428] ss:$24 sps:$4 sm:$0xff]  }
 0xf59   : > { %7683 = vmatprep.subr.bf16.mxu1 %v10210_v15  ;;  %v10285_v15 = vld [vmem:[#allocation7 + $0xfc] ss:$24 sps:$4 sm:$0xff]  }
 0xf5b   : > { %7643 = vmatpush1.bf16.msra.mxu0 %v10205_v16 }
 0xf5c   : > { %7684 = vmatpush1.bf16.msra.mxu1 %v10208_v19  ;;  %7644 = vmatprep.subr.bf16.mxu0 %v10213_v21  ;;  %v10288_v19 = vld [vmem:[#allocation7 + $0x3fc] ss:$24 sps:$4 sm:$0xff]  }
 0xf5d   : > { %7685 = vmatprep.subr.bf16.mxu1 %v10216_v42 }
 0xf5f   : > { %7645 = vmatpush1.bf16.msra.mxu0 %v10211_v26  ;;  %v10283_v26 = vld [vmem:[#allocation7 + $0xf8] ss:$24 sps:$4 sm:$0xff]  }
 0xf60   : > { %7686 = vmatpush1.bf16.msra.mxu1 %v10214_v41  ;;  %7646 = vmatprep.subr.bf16.mxu0 %v10219_v50 }
 0xf61   : > { %7687 = vmatprep.subr.bf16.mxu1 %v10222_v27  ;;  %v10286_v27 = vld [vmem:[#allocation7 + $0x3f8] ss:$24 sps:$4 sm:$0xff]  }
 0xf63   : > { %7647 = vmatpush1.bf16.msra.mxu0 %v10217_v30  ;;  %v10291_v30 = vld [vmem:[#allocation7 + $0xcc] ss:$24 sps:$4 sm:$0xff]  }
 0xf64   : > { %7688 = vmatpush1.bf16.msra.mxu1 %v10220_v31  ;;  %7648 = vmatprep.subr.bf16.mxu0 %v10225_v32  ;;  %v10294_v31 = vld [vmem:[#allocation7 + $0x3cc] ss:$24 sps:$4 sm:$0xff]   ;;  %v10289_v32 = vld [vmem:[#allocation7 + $0xc8] ss:$24 sps:$4 sm:$0xff]  }
 0xf65   : > { %7689 = vmatprep.subr.bf16.mxu1 %v10228_v38  ;;  %v10292_v38 = vld [vmem:[#allocation7 + $0x3c8] ss:$24 sps:$4 sm:$0xff]  }
 0xf67   : > { %7649 = vmatpush2.bf16.msra.mxu0 %v10223_v37  ;;  %v10297_v37 = vld [vmem:[#allocation7 + $0x9c] ss:$24 sps:$4 sm:$0xff]  }
 0xf68   : > { %7690 = vmatpush2.bf16.msra.mxu1 %v10226_v17  ;;  %7650 = vmatprep.subr.bf16.mxu0 %v10231_v24  ;;  %v10300_v17 = vld [vmem:[#allocation7 + $0x39c] ss:$24 sps:$4 sm:$0xff]   ;;  %v10295_v24 = vld [vmem:[#allocation7 + $0x98] ss:$24 sps:$4 sm:$0xff]  }
 0xf69   : > { %7691 = vmatprep.subr.bf16.mxu1 %v10234_v28  ;;  %v10298_v28 = vld [vmem:[#allocation7 + $0x398] ss:$24 sps:$4 sm:$0xff]  }
 0xf6b   : > { %7651 = vmatpush2.bf16.msra.mxu0 %v10229_v18  ;;  %v10303_v18 = vld [vmem:[#allocation7 + $0x6c] ss:$24 sps:$4 sm:$0xff]  }
 0xf6c   : > { %7692 = vmatpush2.bf16.msra.mxu1 %v10232_v39  ;;  %7652 = vmatprep.subr.bf16.mxu0 %v10237_v52  ;;  %v10306_v39 = vld [vmem:[#allocation7 + $0x36c] ss:$24 sps:$4 sm:$0xff]   ;;  %v10301_v52 = vld [vmem:[#allocation7 + $0x68] ss:$24 sps:$4 sm:$0xff]  }
 0xf6d   : > { %7693 = vmatprep.subr.bf16.mxu1 %v10240_v33  ;;  %v10304_v33 = vld [vmem:[#allocation7 + $0x368] ss:$24 sps:$4 sm:$0xff]  }
 0xf6f   : > { %7653 = vmatpush2.bf16.msra.mxu0 %v10235_v29  ;;  %v10309_v29 = vld [vmem:[#allocation7 + $0x3c] ss:$24 sps:$4 sm:$0xff]  }
 0xf70   : > { %7694 = vmatpush2.bf16.msra.mxu1 %v10238_v45  ;;  %7654 = vmatprep.subr.bf16.mxu0 %v10243_v49  ;;  %v10312_v45 = vld [vmem:[#allocation7 + $0x33c] ss:$24 sps:$4 sm:$0xff]   ;;  %v10307_v49 = vld [vmem:[#allocation7 + $0x38] ss:$24 sps:$4 sm:$0xff]  }
 0xf71   : > { %7695 = vmatprep.subr.bf16.mxu1 %v10246_v51  ;;  %v10310_v51 = vld [vmem:[#allocation7 + $0x338] ss:$24 sps:$4 sm:$0xff]  }
 0xf73   : > { %7655 = vmatpush2.bf16.msra.mxu0 %v10241_v35  ;;  %v10315_v35 = vld [vmem:[#allocation7 + $0xc] ss:$24 sps:$4 sm:$0xff]  }
 0xf74   : > { %7696 = vmatpush2.bf16.msra.mxu1 %v10244_v54  ;;  %7656 = vmatprep.subr.bf16.mxu0 %v10249_v34  ;;  %v10318_v54 = vld [vmem:[#allocation7 + $0x30c] ss:$24 sps:$4 sm:$0xff]   ;;  %v10313_v34 = vld [vmem:[#allocation7 + $0x8] ss:$24 sps:$4 sm:$0xff]  }
 0xf75   : > { %7697 = vmatprep.subr.bf16.mxu1 %v10252_v44  ;;  %v10316_v44 = vld [vmem:[#allocation7 + $0x308] ss:$24 sps:$4 sm:$0xff]  }
 0xf77   : > { %7657 = vmatpush2.bf16.msra.mxu0 %v10247_v43  ;;  %v10321_v43 = vld [vmem:[#allocation7 + $0x2dc] ss:$24 sps:$4 sm:$0xff]  }
 0xf78   : > { %7698 = vmatpush2.bf16.msra.mxu1 %v10250_v46  ;;  %7658 = vmatprep.subr.bf16.mxu0 %v10255_v47  ;;  %v10324_v46 = vld [vmem:[#allocation7 + $0x5dc] ss:$24 sps:$4 sm:$0xff]   ;;  %v10319_v47 = vld [vmem:[#allocation7 + $0x2d8] ss:$24 sps:$4 sm:$0xff]  }
 0xf79   : > { %7699 = vmatprep.subr.bf16.mxu1 %v10258_v36  ;;  %v10322_v36 = vld [vmem:[#allocation7 + $0x5d8] ss:$24 sps:$4 sm:$0xff]  }
 0xf7b   : > { %7659 = vmatpush2.bf16.msra.mxu0 %v10253_v5  ;;  %v10327_v5 = vld [vmem:[#allocation7 + $0x2ac] ss:$24 sps:$4 sm:$0xff]  }
 0xf7c   : > { %7700 = vmatpush2.bf16.msra.mxu1 %v10256_v9  ;;  %7660 = vmatprep.subr.bf16.mxu0 %v10261_v14  ;;  %v10330_v9 = vld [vmem:[#allocation7 + $0x5ac] ss:$24 sps:$4 sm:$0xff]   ;;  %v10325_v14 = vld [vmem:[#allocation7 + $0x2a8] ss:$24 sps:$4 sm:$0xff]  }
 0xf7d   : > { %7701 = vmatprep.subr.bf16.mxu1 %v10264_v20  ;;  %v10328_v20 = vld [vmem:[#allocation7 + $0x5a8] ss:$24 sps:$4 sm:$0xff]  }
 0xf7f   : > { %7661 = vmatpush2.bf16.msra.mxu0 %v10259_v22  ;;  %v10333_v22 = vld [vmem:[#allocation7 + $0x27c] ss:$24 sps:$4 sm:$0xff]  }
 0xf80   : > { %7702 = vmatpush2.bf16.msra.mxu1 %v10262_v6  ;;  %7662 = vmatprep.subr.bf16.mxu0 %v10267_v11  ;;  %v10336_v6 = vld [vmem:[#allocation7 + $0x57c] ss:$24 sps:$4 sm:$0xff]   ;;  %v10331_v11 = vld [vmem:[#allocation7 + $0x278] ss:$24 sps:$4 sm:$0xff]  }
 0xf81   : > { %7703 = vmatprep.subr.bf16.mxu1 %v10270_v48  ;;  %v10334_v48 = vld [vmem:[#allocation7 + $0x578] ss:$24 sps:$4 sm:$0xff]  }
 0xf83   : > { %7663 = vmatpush2.bf16.msra.mxu0 %v10265_v53  ;;  %v10339_v53 = vld [vmem:[#allocation7 + $0x24c] ss:$24 sps:$4 sm:$0xff]  }
 0xf84   : > { %7704 = vmatpush2.bf16.msra.mxu1 %v10268_v58  ;;  %7714 = vmatprep.subr.bf16.mxu0 %v10273_v56  ;;  %v10342_v58 = vld [vmem:[#allocation7 + $0x54c] ss:$24 sps:$4 sm:$0xff]   ;;  %v10345_v56 = vld [vmem:[#allocation7 + $0x21c] ss:$24 sps:$4 sm:$0xff]  }
 0xf85   : > { %7755 = vmatprep.subr.bf16.mxu1 %v10276_v40  ;;  %v10346_v40 = vld [vmem:[#allocation7 + $0x518] ss:$24 sps:$4 sm:$0xff]  }
 0xf86   : > { %7665 = vmatmul.mubr.bf16.vlgmr.msra.gmra.mxu0 %v12110_v4  ;;  %v6460_v0 = vpop.f32.mrf.mxu0  ;;  %v6501_v1 = vpop.f32.mrf.mxu1 }
 0xf87   : > { %7706 = vmatmul.mubr.bf16.vlgmr.msra.gmra.mxu1 %v12112_v63  ;;  %v12116_v3 = vadd.f32 %v6501_v1, %v6460_v0  ;;  %7715 = vmatpush1.bf16.msra.mxu0 %v10271_v62  ;;  %v10351_v62 = vld [vmem:[#allocation7 + $0x1ec] ss:$24 sps:$4 sm:$0xff]   ;;  %v10352_v0 = vld [vmem:[#allocation7 + $0x4e8] ss:$24 sps:$4 sm:$0xff]   ;;  %v10357_v1 = vld [vmem:[#allocation7 + $0x1bc] ss:$24 sps:$4 sm:$0xff]  }
 0xf88   : > { %7746 = vmatprep.mubr.bf16.mxu0 %v12101_v57  ;;  %7756 = vmatpush1.bf16.msra.mxu1 %v10274_v25  ;;  %v6462_v8 = vpop.f32.mrf.mxu0  ;;  %v6503_v10 = vpop.f32.mrf.mxu1  ;;  %v10354_v25 = vld [vmem:[#allocation7 + $0x4ec] ss:$24 sps:$4 sm:$0xff]  }
 0xf89   : > { %7787 = vmatprep.mubr.bf16.mxu1 %v12104_v60  ;;  %v12120_v16 = vadd.f32 %v6503_v10, %v6462_v8  ;;  %7716 = vmatprep.subr.bf16.mxu0 %v10279_v12  ;;  %v10349_v12 = vld [vmem:[#allocation7 + $0x1e8] ss:$24 sps:$4 sm:$0xff]   ;;  %v10358_v8 = vld [vmem:[#allocation7 + $0x4b8] ss:$24 sps:$4 sm:$0xff]   ;;  %v10363_v10 = vld [vmem:[#allocation7 + $0x18c] ss:$24 sps:$4 sm:$0xff]  }
 0xf8a   : > { %7757 = vmatprep.subr.bf16.mxu1 %v10282_v2  ;;  %v6464_v21 = vpop.f32.mrf.mxu0  ;;  %v6505_v42 = vpop.f32.mrf.mxu1  ;;  %v10360_v2 = vld [vmem:[#allocation7 + $0x4bc] ss:$24 sps:$4 sm:$0xff]  }
 0xf8b   : > { %7717 = vmatpush1.bf16.msra.mxu0 %v10277_v7  ;;  %v10355_v7 = vld [vmem:[#allocation7 + $0x1b8] ss:$24 sps:$4 sm:$0xff]   ;;  %v10369_v21 = vld [vmem:[#allocation7 + $0x164] ss:$24 sps:$4 sm:$0xff]  }
 0xf8c   : > { %7758 = vmatpush1.bf16.msra.mxu1 %v10280_v13  ;;  %v6465_v41 = vpop.f32.mrf.mxu0  ;;  %v6506_v50 = vpop.f32.mrf.mxu1  ;;  %7718 = vmatprep.subr.bf16.mxu0 %v10285_v15  ;;  %v10366_v13 = vld [vmem:[#allocation7 + $0x48c] ss:$24 sps:$4 sm:$0xff]   ;;  %v10361_v15 = vld [vmem:[#allocation7 + $0x188] ss:$24 sps:$4 sm:$0xff]  }
 0xf8d   : > { %7759 = vmatprep.subr.bf16.mxu1 %v10288_v19  ;;  %v10364_v19 = vld [vmem:[#allocation7 + $0x488] ss:$24 sps:$4 sm:$0xff]   ;;  %v10372_v42 = vld [vmem:[#allocation7 + $0x464] ss:$24 sps:$4 sm:$0xff]   ;;  %v10375_v50 = vld [vmem:[#allocation7 + $0x134] ss:$24 sps:$4 sm:$0xff]  }
 0xf8e   : > { %v10370_v41 = vld [vmem:[#allocation7 + $0x460] ss:$24 sps:$4 sm:$0xff]  }
 0xf8f   : > { %7719 = vmatpush1.bf16.msra.mxu0 %v10283_v26  ;;  %v10367_v26 = vld [vmem:[#allocation7 + $0x160] ss:$24 sps:$4 sm:$0xff]  }
 0xf90   : > { %7760 = vmatpush1.bf16.msra.mxu1 %v10286_v27  ;;  %7720 = vmatprep.subr.bf16.mxu0 %v10291_v30 }
 0xf91   : > { %7761 = vmatprep.subr.bf16.mxu1 %v10294_v31  ;;  %v10378_v31 = vld [vmem:[#allocation7 + $0x434] ss:$24 sps:$4 sm:$0xff]  }
 0xf93   : > { %7721 = vmatpush1.bf16.msra.mxu0 %v10289_v32 }
 0xf94   : > { %7762 = vmatpush1.bf16.msra.mxu1 %v10292_v38  ;;  %7722 = vmatprep.subr.bf16.mxu0 %v10297_v37  ;;  %v10373_v38 = vld [vmem:[#allocation7 + $0x130] ss:$24 sps:$4 sm:$0xff]  }
 0xf95   : > { %7763 = vmatprep.subr.bf16.mxu1 %v10300_v17 }
 0xf97   : > { %7723 = vmatpush1.bf16.msra.mxu0 %v10295_v24  ;;  %v10376_v24 = vld [vmem:[#allocation7 + $0x430] ss:$24 sps:$4 sm:$0xff]  }
 0xf98   : > { %7764 = vmatpush1.bf16.msra.mxu1 %v10298_v28  ;;  %7724 = vmatprep.subr.bf16.mxu0 %v10303_v18  ;;  %v10381_v28 = vld [vmem:[#allocation7 + $0x104] ss:$24 sps:$4 sm:$0xff]  }
 0xf99   : > { %7765 = vmatprep.subr.bf16.mxu1 %v10306_v39  ;;  %v10384_v39 = vld [vmem:[#allocation7 + $0x404] ss:$24 sps:$4 sm:$0xff]  }
 0xf9b   : > { %7725 = vmatpush1.bf16.msra.mxu0 %v10301_v52 }
 0xf9c   : > { %7766 = vmatpush1.bf16.msra.mxu1 %v10304_v33  ;;  %7726 = vmatprep.subr.bf16.mxu0 %v10309_v29  ;;  %v10379_v29 = vld [vmem:[#allocation7 + $0x100] ss:$24 sps:$4 sm:$0xff]  }
 0xf9d   : > { %7767 = vmatprep.subr.bf16.mxu1 %v10312_v45 }
 0xf9f   : > { %7727 = vmatpush1.bf16.msra.mxu0 %v10307_v49 }
 0xfa0   : > { %7768 = vmatpush1.bf16.msra.mxu1 %v10310_v51  ;;  %7728 = vmatprep.subr.bf16.mxu0 %v10315_v35  ;;  %v10387_v51 = vld [vmem:[#allocation7 + $0xd4] ss:$24 sps:$4 sm:$0xff]  }
 0xfa1   : > { %7769 = vmatprep.subr.bf16.mxu1 %v10318_v54  ;;  %v10390_v35 = vld [vmem:[#allocation7 + $0x3d4] ss:$24 sps:$4 sm:$0xff]   ;;  %v10385_v54 = vld [vmem:[#allocation7 + $0xd0] ss:$24 sps:$4 sm:$0xff]  }
 0xfa3   : > { %7729 = vmatpush1.bf16.msra.mxu0 %v10313_v34  ;;  %v10393_v34 = vld [vmem:[#allocation7 + $0xa4] ss:$24 sps:$4 sm:$0xff]  }
 0xfa4   : > { %7770 = vmatpush1.bf16.msra.mxu1 %v10316_v44  ;;  %7730 = vmatprep.subr.bf16.mxu0 %v10321_v43  ;;  %v10396_v44 = vld [vmem:[#allocation7 + $0x3a4] ss:$24 sps:$4 sm:$0xff]   ;;  %v10391_v43 = vld [vmem:[#allocation7 + $0xa0] ss:$24 sps:$4 sm:$0xff]  }
 0xfa5   : > { %7771 = vmatprep.subr.bf16.mxu1 %v10324_v46  ;;  %v10394_v46 = vld [vmem:[#allocation7 + $0x3a0] ss:$24 sps:$4 sm:$0xff]  }
 0xfa7   : > { %7731 = vmatpush2.bf16.msra.mxu0 %v10319_v47  ;;  %v10399_v47 = vld [vmem:[#allocation7 + $0x74] ss:$24 sps:$4 sm:$0xff]  }
 0xfa8   : > { %7772 = vmatpush2.bf16.msra.mxu1 %v10322_v36  ;;  %7732 = vmatprep.subr.bf16.mxu0 %v10327_v5  ;;  %v10402_v36 = vld [vmem:[#allocation7 + $0x374] ss:$24 sps:$4 sm:$0xff]   ;;  %v10397_v5 = vld [vmem:[#allocation7 + $0x70] ss:$24 sps:$4 sm:$0xff]  }
 0xfa9   : > { %7773 = vmatprep.subr.bf16.mxu1 %v10330_v9  ;;  %v10400_v9 = vld [vmem:[#allocation7 + $0x370] ss:$24 sps:$4 sm:$0xff]  }
 0xfab   : > { %7733 = vmatpush2.bf16.msra.mxu0 %v10325_v14  ;;  %v10405_v14 = vld [vmem:[#allocation7 + $0x44] ss:$24 sps:$4 sm:$0xff]  }
 0xfac   : > { %7774 = vmatpush2.bf16.msra.mxu1 %v10328_v20  ;;  %7734 = vmatprep.subr.bf16.mxu0 %v10333_v22  ;;  %v10408_v20 = vld [vmem:[#allocation7 + $0x344] ss:$24 sps:$4 sm:$0xff]   ;;  %v10403_v22 = vld [vmem:[#allocation7 + $0x40] ss:$24 sps:$4 sm:$0xff]  }
 0xfad   : > { %7775 = vmatprep.subr.bf16.mxu1 %v10336_v6  ;;  %v10406_v6 = vld [vmem:[#allocation7 + $0x340] ss:$24 sps:$4 sm:$0xff]  }
 0xfaf   : > { %7735 = vmatpush2.bf16.msra.mxu0 %v10331_v11  ;;  %v10411_v11 = vld [vmem:[#allocation7 + $0x14] ss:$24 sps:$4 sm:$0xff]  }
 0xfb0   : > { %7776 = vmatpush2.bf16.msra.mxu1 %v10334_v48  ;;  %7736 = vmatprep.subr.bf16.mxu0 %v10339_v53  ;;  %v10414_v48 = vld [vmem:[#allocation7 + $0x314] ss:$24 sps:$4 sm:$0xff]   ;;  %v10409_v53 = vld [vmem:[#allocation7 + $0x10] ss:$24 sps:$4 sm:$0xff]  }
 0xfb1   : > { %7777 = vmatprep.subr.bf16.mxu1 %v10342_v58  ;;  %v10412_v58 = vld [vmem:[#allocation7 + $0x310] ss:$24 sps:$4 sm:$0xff]  }
 0xfb3   : > { %7737 = vmatpush2.bf16.msra.mxu0 %v10337_v23  ;;  %v10417_v23 = vld [vmem:[#allocation7 + $0x2e4] ss:$24 sps:$4 sm:$0xff]  }
 0xfb4   : > { %7778 = vmatpush2.bf16.msra.mxu1 %v10340_v55  ;;  %7738 = vmatprep.subr.bf16.mxu0 %v10345_v56  ;;  %v10420_v55 = vld [vmem:[#allocation7 + $0x5e4] ss:$24 sps:$4 sm:$0xff]   ;;  %v10415_v56 = vld [vmem:[#allocation7 + $0x2e0] ss:$24 sps:$4 sm:$0xff]  }
 0xfb5   : > { %7779 = vmatprep.subr.bf16.mxu1 %v10348_v59  ;;  %v10418_v59 = vld [vmem:[#allocation7 + $0x5e0] ss:$24 sps:$4 sm:$0xff]  }
 0xfb7   : > { %7739 = vmatpush2.bf16.msra.mxu0 %v10343_v61  ;;  %v10423_v61 = vld [vmem:[#allocation7 + $0x2b4] ss:$24 sps:$4 sm:$0xff]  }
 0xfb8   : > { %7780 = vmatpush2.bf16.msra.mxu1 %v10346_v40  ;;  %7740 = vmatprep.subr.bf16.mxu0 %v10351_v62  ;;  %v10426_v40 = vld [vmem:[#allocation7 + $0x5b4] ss:$24 sps:$4 sm:$0xff]   ;;  %v10421_v62 = vld [vmem:[#allocation7 + $0x2b0] ss:$24 sps:$4 sm:$0xff]  }
 0xfb9   : > { %7781 = vmatprep.subr.bf16.mxu1 %v10354_v25  ;;  %v10424_v25 = vld [vmem:[#allocation7 + $0x5b0] ss:$24 sps:$4 sm:$0xff]  }
 0xfbb   : > { %7741 = vmatpush2.bf16.msra.mxu0 %v10349_v12  ;;  %v10429_v12 = vld [vmem:[#allocation7 + $0x284] ss:$24 sps:$4 sm:$0xff]  }
 0xfbc   : > { %7782 = vmatpush2.bf16.msra.mxu1 %v10352_v0  ;;  %7742 = vmatprep.subr.bf16.mxu0 %v10357_v1  ;;  %v10432_v0 = vld [vmem:[#allocation7 + $0x584] ss:$24 sps:$4 sm:$0xff]   ;;  %v10427_v1 = vld [vmem:[#allocation7 + $0x280] ss:$24 sps:$4 sm:$0xff]  }
 0xfbd   : > { %7783 = vmatprep.subr.bf16.mxu1 %v10360_v2  ;;  %v10430_v2 = vld [vmem:[#allocation7 + $0x580] ss:$24 sps:$4 sm:$0xff]  }
 0xfbf   : > { %7743 = vmatpush2.bf16.msra.mxu0 %v10355_v7  ;;  %v10435_v7 = vld [vmem:[#allocation7 + $0x254] ss:$24 sps:$4 sm:$0xff]  }
 0xfc0   : > { %7784 = vmatpush2.bf16.msra.mxu1 %v10358_v8  ;;  %7744 = vmatprep.subr.bf16.mxu0 %v10363_v10  ;;  %v10438_v8 = vld [vmem:[#allocation7 + $0x554] ss:$24 sps:$4 sm:$0xff]   ;;  %v10433_v10 = vld [vmem:[#allocation7 + $0x250] ss:$24 sps:$4 sm:$0xff]  }
 0xfc1   : > { %7785 = vmatprep.subr.bf16.mxu1 %v10366_v13  ;;  %v10436_v13 = vld [vmem:[#allocation7 + $0x550] ss:$24 sps:$4 sm:$0xff]  }
 0xfc3   : > { %7745 = vmatpush2.bf16.msra.mxu0 %v10361_v15  ;;  %v10441_v15 = vld [vmem:[#allocation7 + $0x224] ss:$24 sps:$4 sm:$0xff]  }
 0xfc4   : > { %7786 = vmatpush2.bf16.msra.mxu1 %v10364_v19  ;;  %7796 = vmatprep.subr.bf16.mxu0 %v10369_v21  ;;  %v10444_v19 = vld [vmem:[#allocation7 + $0x524] ss:$24 sps:$4 sm:$0xff]   ;;  %v10439_v21 = vld [vmem:[#allocation7 + $0x220] ss:$24 sps:$4 sm:$0xff]  }
 0xfc5   : > { %7837 = vmatprep.subr.bf16.mxu1 %v10372_v42  ;;  %v10442_v42 = vld [vmem:[#allocation7 + $0x520] ss:$24 sps:$4 sm:$0xff]  }
 0xfc6   : > { %v6542_v27 = vpop.f32.mrf.mxu0  ;;  %v6583_v30 = vpop.f32.mrf.mxu1  ;;  %7747 = vmatmul.mubr.bf16.vlgmr.msra.gmra.mxu0 %v12110_v4 }
 0xfc7   : > { %v12123_v32 = vadd.f32 %v6583_v30, %v6542_v27  ;;  %7788 = vmatmul.mubr.bf16.vlgmr.msra.gmra.mxu1 %v12112_v63  ;;  %7797 = vmatpush1.bf16.msra.mxu0 %v10367_v26  ;;  %v10447_v26 = vld [vmem:[#allocation7 + $0x1f4] ss:$24 sps:$4 sm:$0xff]   ;;  %v10448_v27 = vld [vmem:[#allocation7 + $0x4f0] ss:$24 sps:$4 sm:$0xff]   ;;  %v10453_v30 = vld [vmem:[#allocation7 + $0x1c4] ss:$24 sps:$4 sm:$0xff]  }
 0xfc8   : > { %7828 = vmatprep.mubr.bf16.mxu0 %v12101_v57  ;;  %7838 = vmatpush1.bf16.msra.mxu1 %v10370_v41  ;;  %v6544_v37 = vpop.f32.mrf.mxu0  ;;  %v6585_v17 = vpop.f32.mrf.mxu1  ;;  %v10382_v57 = vld [vmem:[#allocation7 + $0x400] ss:$24 sps:$4 sm:$0xff]   ;;  %v10450_v41 = vld [vmem:[#allocation7 + $0x4f4] ss:$24 sps:$4 sm:$0xff]  }
 0xfc9   : > { %7869 = vmatprep.mubr.bf16.mxu1 %v12104_v60  ;;  %v12128_v18 = vadd.f32 %v6585_v17, %v6544_v37  ;;  %7798 = vmatprep.subr.bf16.mxu0 %v10375_v50  ;;  %v10388_v60 = vld [vmem:[#allocation7 + $0x3d0] ss:$24 sps:$4 sm:$0xff]   ;;  %v10454_v37 = vld [vmem:[#allocation7 + $0x4c0] ss:$24 sps:$4 sm:$0xff]   ;;  %v10459_v17 = vld [vmem:[#allocation7 + $0x194] ss:$24 sps:$4 sm:$0xff]  }
 0xfca   : > { %v6546_v52 = vpop.f32.mrf.mxu0  ;;  %v6587_v33 = vpop.f32.mrf.mxu1  ;;  %7839 = vmatprep.subr.bf16.mxu1 %v10378_v31  ;;  %v10445_v50 = vld [vmem:[#allocation7 + $0x1f0] ss:$24 sps:$4 sm:$0xff]   ;;  %v10456_v31 = vld [vmem:[#allocation7 + $0x4c4] ss:$24 sps:$4 sm:$0xff]  }
 0xfcb   : > { %7799 = vmatpush1.bf16.msra.mxu0 %v10373_v38  ;;  %v10451_v38 = vld [vmem:[#allocation7 + $0x1c0] ss:$24 sps:$4 sm:$0xff]  }
 0xfcc   : > { %7840 = vmatpush1.bf16.msra.mxu1 %v10376_v24  ;;  %v6547_v45 = vpop.f32.mrf.mxu0  ;;  %v6588_v49 = vpop.f32.mrf.mxu1  ;;  %7800 = vmatprep.subr.bf16.mxu0 %v10381_v28  ;;  %v10462_v24 = vld [vmem:[#allocation7 + $0x494] ss:$24 sps:$4 sm:$0xff]   ;;  %v10457_v28 = vld [vmem:[#allocation7 + $0x190] ss:$24 sps:$4 sm:$0xff]  }
 0xfcd   : > { %7841 = vmatprep.subr.bf16.mxu1 %v10384_v39  ;;  %v10460_v39 = vld [vmem:[#allocation7 + $0x490] ss:$24 sps:$4 sm:$0xff]  }
 0xfcf   : > { %7801 = vmatpush1.bf16.msra.mxu0 %v10379_v29 }
 0xfd0   : > { %7842 = vmatpush1.bf16.msra.mxu1 %v10382_v57  ;;  %7802 = vmatprep.subr.bf16.mxu0 %v10387_v51 }
 0xfd1   : > { %7843 = vmatprep.subr.bf16.mxu1 %v10390_v35 }
 0xfd3   : > { %7803 = vmatpush1.bf16.msra.mxu0 %v10385_v54 }
 0xfd4   : > { %7844 = vmatpush1.bf16.msra.mxu1 %v10388_v60  ;;  %7804 = vmatprep.subr.bf16.mxu0 %v10393_v34  ;;  %v7878_v34 = vld [vmem:[%s12168_s11] sm:$0x3f] }
 0xfd5   : > { %7845 = vmatprep.subr.bf16.mxu1 %v10396_v44 }
 0xfd7   : > { %7805 = vmatpush1.bf16.msra.mxu0 %v10391_v43 }
 0xfd8   : > { %7846 = vmatpush1.bf16.msra.mxu1 %v10394_v46  ;;  %7806 = vmatprep.subr.bf16.mxu0 %v10399_v47 }
 0xfd9   : > { %7847 = vmatprep.subr.bf16.mxu1 %v10402_v36 }
 0xfdb   : > { %7807 = vmatpush1.bf16.msra.mxu0 %v10397_v5 }
 0xfdc   : > { %7848 = vmatpush1.bf16.msra.mxu1 %v10400_v9  ;;  %7808 = vmatprep.subr.bf16.mxu0 %v10405_v14  ;;  %v12265_v14 = vld [vmem:[#allocation14_spill] sm:$0xff] }
 0xfdd   : > { %7849 = vmatprep.subr.bf16.mxu1 %v10408_v20  ;;  %v7887_v20 = vrot.slane %v7878_v34, %v12265_v14 }
 0xfdf   : > { %7809 = vmatpush1.bf16.msra.mxu0 %v10403_v22 }
 0xfe0   : > { %7850 = vmatpush1.bf16.msra.mxu1 %v10406_v6  ;;  %7810 = vmatprep.subr.bf16.mxu0 %v10411_v11 }
 0xfe1   : > { %7851 = vmatprep.subr.bf16.mxu1 %v10414_v48 }
 0xfe3   : > { %7811 = vmatpush1.bf16.msra.mxu0 %v10409_v53 }
 0xfe4   : > { %7852 = vmatpush1.bf16.msra.mxu1 %v10412_v58  ;;  %7812 = vmatprep.subr.bf16.mxu0 %v10417_v23 }
 0xfe5   : > { %7853 = vmatprep.subr.bf16.mxu1 %v10420_v55 }
 0xfe7   : > { %7813 = vmatpush2.bf16.msra.mxu0 %v10415_v56 }
 0xfe8   : > { %7854 = vmatpush2.bf16.msra.mxu1 %v10418_v59  ;;  %7814 = vmatprep.subr.bf16.mxu0 %v10423_v61 }
 0xfe9   : > { %7855 = vmatprep.subr.bf16.mxu1 %v10426_v40 }
 0xfeb   : > { %7815 = vmatpush2.bf16.msra.mxu0 %v10421_v62 }
 0xfec   : > { %7856 = vmatpush2.bf16.msra.mxu1 %v10424_v25  ;;  %7816 = vmatprep.subr.bf16.mxu0 %v10429_v12 }
 0xfed   : > { %7857 = vmatprep.subr.bf16.mxu1 %v10432_v0 }
 0xfef   : > { %7817 = vmatpush2.bf16.msra.mxu0 %v10427_v1 }
 0xff0   : > { %7858 = vmatpush2.bf16.msra.mxu1 %v10430_v2  ;;  %7818 = vmatprep.subr.bf16.mxu0 %v10435_v7  ;;  %v12267_v2 = vld [vmem:[#allocation15_spill] sm:$0xff] }
 0xff1   : > { %7859 = vmatprep.subr.bf16.mxu1 %v10438_v8  ;;  %v7895_v7 = vrot.slane %v7878_v34, %v12267_v2 }
 0xff3   : > { %7819 = vmatpush2.bf16.msra.mxu0 %v10433_v10 }
 0xff4   : > { %7860 = vmatpush2.bf16.msra.mxu1 %v10436_v13  ;;  %7820 = vmatprep.subr.bf16.mxu0 %v10441_v15 }
 0xff5   : > { %7861 = vmatprep.subr.bf16.mxu1 %v10444_v19 }
 0xff7   : > { %7821 = vmatpush2.bf16.msra.mxu0 %v10439_v21 }
 0xff8   : > { %7862 = vmatpush2.bf16.msra.mxu1 %v10442_v42  ;;  %7822 = vmatprep.subr.bf16.mxu0 %v10447_v26 }
 0xff9   : > { %7863 = vmatprep.subr.bf16.mxu1 %v10450_v41 }
 0xffb   : > { %7823 = vmatpush2.bf16.msra.mxu0 %v10445_v50 }
 0xffc   : > { %7864 = vmatpush2.bf16.msra.mxu1 %v10448_v27  ;;  %7824 = vmatprep.subr.bf16.mxu0 %v10453_v30  ;;  %v12268_v27 = vld [vmem:[#allocation13_spill] sm:$0xff] }
 0xffd   : > { %7865 = vmatprep.subr.bf16.mxu1 %v10456_v31 }
 0xfff   : > { %7825 = vmatpush2.bf16.msra.mxu0 %v10451_v38 }
0x1000   : > { %7866 = vmatpush2.bf16.msra.mxu1 %v10454_v37  ;;  %7826 = vmatprep.subr.bf16.mxu0 %v10459_v17 }
0x1001   : > { %7867 = vmatprep.subr.bf16.mxu1 %v10462_v24 }
0x1003   : > { %7827 = vmatpush2.bf16.msra.mxu0 %v10457_v28 }
0x1004   : > { %7868 = vmatpush2.bf16.msra.mxu1 %v10460_v39 }
0x1006   : > { %v6624_v52 = vpop.f32.mrf.mxu0  ;;  %7829 = vmatmul.mubr.bf16.vlgmr.msra.gmra.mxu0 %v12110_v4  ;;  %v12264_v4 = vld [vmem:[#allocation16_spill] sm:$0xff] }
0x1007   : > { %v6665_v33 = vpop.f32.mrf.mxu1  ;;  %7870 = vmatmul.mubr.bf16.vlgmr.msra.gmra.mxu1 %v12112_v63  ;;  %v7883_v47 = vrot.slane %v7878_v34, %v12264_v4 }
0x1008   : > { %v6666_v29 = vadd.f32 %v6665_v33, %v6624_v52  ;;  %v6626_v45 = vpop.f32.mrf.mxu0  ;;  %v12269_v52 = vsub.s32 4, %v12268_v27 }
0x1009   : > { %v6667_v49 = vpop.f32.mrf.mxu1 }
0x100a   : > { %v6668_v57 = vadd.f32 %v6667_v49, %v6626_v45  ;;  %v6628_v51 = vpop.f32.mrf.mxu0  ;;  %v7899_v33 = vrot.slane %v7878_v34, %v12269_v52 }
0x100b   : > { %v6669_v35 = vpop.f32.mrf.mxu1 }
0x100c   : > { %v6629_v54 = vpop.f32.mrf.mxu0 }
0x100d   : > { %v6670_v60 = vpop.f32.mrf.mxu1  ;;  %v12270_v54 = vsub.s32 5, %v12268_v27 }
0x100f   : > { %v7903_v60 = vrot.slane %v7878_v34, %v12270_v54 }
0x1046   : > { %v7666_v44 = vpop.f32.mrf.mxu0 }
0x1047   : > { %v7667_v43 = vadd.f32 %v7666_v44, %v12116_v3  ;;  %v7707_v46 = vpop.f32.mrf.mxu1 }
0x1048   : > { %v7668_v36 = vpop.f32.mrf.mxu0 }
0x1049   : > { %v7708_v63 = vadd.f32 %v7707_v46, %v7667_v43  ;;  %v7669_v5 = vadd.f32 %v7668_v36, %v12120_v16  ;;  %v7709_v9 = vpop.f32.mrf.mxu1  ;;  %v12266_v16 = vld [vmem:[#allocation17_spill] sm:$0xff] }
0x104a   : > { %v7670_v22 = vpop.f32.mrf.mxu0  ;;  %v7891_v62 = vrot.slane %v7878_v34, %v12266_v16  ;;  %v12271_v34 = vlaneseq }
0x104b   : > { %v7910_v6 = vadd.f32 %v7883_v47, %v7708_v63  ;;  %v7710_v11 = vadd.f32 %v7709_v9, %v7669_v5  ;;  %v7711_v48 = vpop.f32.mrf.mxu1 }
0x104c   : > { %v7671_v53 = vpop.f32.mrf.mxu0  ;;  %vm7971_vm8 = vcmp.lt.s32.totalorder %v12271_v34, 768 }
0x104d   : > { %v7911_v58 = vadd.f32 %v7887_v20, %v7710_v11  ;;  %v7712_v23 = vpop.f32.mrf.mxu1  ;;  %10469 = vtanh.f32 %v7910_v6 }
0x104f   : > { %10471 = vtanh.f32 %v7911_v58 }
0x105a   : > { %v10470_v3 = vpop.eup %10469 }
0x105c   : > { %v10472_v55 = vpop.eup %10471 }
0x105d   : > { %v7928_v56 = vcombine.low %v10470_v3, %v10472_v55 }
0x1086   : > { %v7748_v59 = vpop.f32.mrf.mxu0 }
0x1087   : > { %v7749_v61 = vadd.f32 %v7748_v59, %v12123_v32  ;;  %v7789_v40 = vpop.f32.mrf.mxu1  ;;  %v10642_v32 = vmov 1966171168  }
0x1088   : > { %v7750_v25 = vpop.f32.mrf.mxu0  ;;  %v7932_v26 = vunpack.c.l.s4 %v10642_v32 }
0x1089   : > { %v7790_v12 = vadd.f32 %v7789_v40, %v7749_v61  ;;  %v7751_v0 = vadd.f32 %v7750_v25, %v12128_v18  ;;  %v7791_v1 = vpop.f32.mrf.mxu1 }
0x108a   : > { %v7752_v8 = vpop.f32.mrf.mxu0  ;;  %v7933_v41 = vunpack.c.0.s8 %v7932_v26 }
0x108b   : > { %v7912_v10 = vadd.f32 %v7891_v62, %v7790_v12  ;;  %v7792_v13 = vadd.f32 %v7791_v1, %v7751_v0  ;;  %v7793_v15 = vpop.f32.mrf.mxu1 }
0x108c   : > { %v7753_v19 = vpop.f32.mrf.mxu0  ;;  %v7936_v30 = vsub.s32 %v7933_v41, %v12268_v27 }
0x108d   : > { %v7913_v21 = vadd.f32 %v7895_v7, %v7792_v13  ;;  %v7794_v42 = vpop.f32.mrf.mxu1  ;;  %10473 = vtanh.f32 %v7912_v10 }
0x108e   : > { %v7937_v38 = vrot.slane %v7928_v56, %v7936_v30 }
0x108f   : > { %10475 = vtanh.f32 %v7913_v21 }
0x109a   : > { %v10474_v50 = vpop.eup %10473 }
0x109c   : > { %v10476_v31 = vpop.eup %10475 }
0x109d   : > { %v7929_v18 = vcombine.low %v10474_v50, %v10476_v31 }
0x109f   : > { %v7944_v37 = vrot.slane %v7929_v18, %v7936_v30 }
0x10a1   : > { %v7952_v17 = vcombine.low %v7937_v38, %v7944_v37 }
0x10a3   : > { %v7959_v20 = vrot.slane %v7952_v17, %v7936_v30 }
0x10c6   : > { %v7830_v24 = vpop.f32.mrf.mxu0 }
0x10c7   : > { %v7831_v28 = vadd.f32 %v7830_v24, %v6666_v29  ;;  %v7871_v39 = vpop.f32.mrf.mxu1 }
0x10c8   : > { %v7832_v45 = vpop.f32.mrf.mxu0 }
0x10c9   : > { %v7872_v49 = vadd.f32 %v7871_v39, %v7831_v28  ;;  %v7833_v51 = vadd.f32 %v7832_v45, %v6668_v57  ;;  %v7873_v35 = vpop.f32.mrf.mxu1 }
0x10ca   : > { %v7834_v44 = vpop.f32.mrf.mxu0 }
0x10cb   : > { %v7914_v43 = vadd.f32 %v7899_v33, %v7872_v49  ;;  %v7874_v46 = vadd.f32 %v7873_v35, %v7833_v51  ;;  %v7875_v4 = vpop.f32.mrf.mxu1 }
0x10cc   : > { %v7835_v47 = vpop.f32.mrf.mxu0 }
0x10cd   : > { %v7915_v36 = vadd.f32 %v7903_v60, %v7874_v46  ;;  %v7876_v63 = vpop.f32.mrf.mxu1  ;;  %10477 = vtanh.f32 %v7914_v43 }
0x10cf   : > { %10479 = vtanh.f32 %v7915_v36 }
0x10da   : > { %v10478_v29 = vpop.eup %10477 }
0x10dc   : > { %v10480_v5 = vpop.eup %10479 }
0x10dd   : > { %v7930_v9 = vcombine.low %v10478_v29, %v10480_v5 }
0x10df   : > { %v7951_v14 = vrot.slane %v7930_v9, %v7936_v30 }
0x10e1   : > { %v7966_v57 = vrot.slane %v7951_v14, %v7936_v30 }
0x10e3   : > { %v7967_v22 = vcombine.low %v7959_v20, %v7966_v57 }
0x10e5   : > { %7973 = vst.msk [vmem:[%s589_s25] sm:$0x3f] %vm7971_vm8, %v7967_v22 }
0x10e6 PF: > { %s29_s21 = sadd.s32 1, %s10629_s21  }
0x10e7   : > { %p26_p3 = scmp.ge.s32.totalorder %s29_s21, 4  }
0x10e9   :  { %28 = sbr.rel (!%p26_p3) target bundleno = 6 (0x6), region = 135 }
0x10ee   :  { %7993 = vsyncpa [#allocation3], 1 }
0x10ef   :  { %7995 = vsyncpa [#allocation3 + $0x1], 1 }
0x10f0   :  { %7996 = vsyncpa [#allocation5], 1 }
0x10f1   :  { %7997 = vsyncpa [#allocation8], 1 }

</bundles_post_ra>
